<compile_context>
chip_gen: v5e
topology: v5e:2x2
jax: 0.10.0
libtpu: 0.0.40
codegen_flags: <defaults>
</compile_context>

<pallas_src>
import functools

import jax
import jax.numpy as jnp
from jax.experimental import pallas as pl
from jax.experimental.pallas import tpu as pltpu

EPS = 1e-5          # nn.LayerNorm default eps
NEG_INF = -1e9      # additive key-padding mask value
LANE = 128


def _round_up(x, m):
    return (x + m - 1) // m * m


# -----------------------------------------------------------------------------
# One-time weight transform (done OUTSIDE the kernel, once per parameter set).
# -----------------------------------------------------------------------------
def prepare_params(params, *, num_heads, mxu_dtype=jnp.float32):
    E = params["wq"].shape[0]
    assert E % num_heads == 0
    hd = E // num_heads
    Ep = _round_up(E, LANE)        # padded embed width (lane-dense)
    Dh = _round_up(hd, LANE)       # padded per-head width (128-aligned slices)
    scale = 1.0 / float(hd) ** 0.5
    f32 = jnp.float32

    def head_cols(w, s=1.0):
        # torch convention y = x @ w.T  ->  kernel uses x @ W with W = w.T,
        # output columns regrouped per head and zero-padded to (Ep, H*Dh).
        wt = (w.T * s).astype(f32)                                  # (E, E)
        wt = jnp.pad(wt, ((0, Ep - E), (0, 0)))                     # (Ep, E)
        wt = wt.reshape(Ep, num_heads, hd)
        wt = jnp.pad(wt, ((0, 0), (0, 0), (0, Dh - hd)))
        return wt.reshape(Ep, num_heads * Dh)

    def head_bias(b, s=1.0):
        bb = (b.reshape(1, E) * s).astype(f32)
        bb = bb.reshape(1, num_heads, hd)
        bb = jnp.pad(bb, ((0, 0), (0, 0), (0, Dh - hd)))
        return bb.reshape(1, num_heads * Dh)

    # fused QKV weight/bias; 1/sqrt(hd) folded into the Q block only
    w_qkv = jnp.concatenate([head_cols(params["wq"], scale),
                             head_cols(params["wk"]),
                             head_cols(params["wv"])], axis=1)
    b_qkv = jnp.concatenate([head_bias(params["bq"], scale),
                             head_bias(params["bk"]),
                             head_bias(params["bv"])], axis=1)

    # output projection: rows regrouped per (padded) head, cols padded to Ep
    wo_t = params["wo"].T.astype(f32).reshape(num_heads, hd, E)
    wo_t = jnp.pad(wo_t, ((0, 0), (0, Dh - hd), (0, Ep - E)))
    w_out = wo_t.reshape(num_heads * Dh, Ep)

    def pad_row(v):
        return jnp.pad(v.reshape(1, E).astype(f32), ((0, 0), (0, Ep - E)))

    return {
        "w_qkv": w_qkv.astype(mxu_dtype),
        "b_qkv": b_qkv,                       # biases / LN params stay f32
        "w_out": w_out.astype(mxu_dtype),
        "b_out": pad_row(params["bo"]),
        "ln1w": pad_row(params["ln1w"]), "ln1b": pad_row(params["ln1b"]),
        "ln2w": pad_row(params["ln2w"]), "ln2b": pad_row(params["ln2b"]),
        "num_heads": num_heads, "E": E, "Ep": Ep, "Dh": Dh,
        "mxu_dtype": mxu_dtype,
    }


# -----------------------------------------------------------------------------
# Kernel: one batch element per grid step (grid=(B,), "parallel" for v7x 2 TCs).
# With larger batches one could block several batch rows per step to raise MXU
# row occupancy; at small B keeping the parallel batch axis wins on v7x.
# -----------------------------------------------------------------------------
def _attn_stack_kernel(*refs, num_heads, head_dim, e_true, mxu_dtype,
                       has_mask, approx_recip):
    if has_mask:
        (x_ref, mask_ref, wqkv_ref, bqkv_ref, wout_ref, bout_ref,
         ln1w_ref, ln1b_ref, ln2w_ref, ln2b_ref, out_ref, ocat_ref) = refs
    else:
        (x_ref, wqkv_ref, bqkv_ref, wout_ref, bout_ref,
         ln1w_ref, ln1b_ref, ln2w_ref, ln2b_ref, out_ref, ocat_ref) = refs
        mask_ref = None

    x = x_ref[...]                      # (S, Ep) f32; padded lanes are zero
    S, Ep = x.shape
    HD = num_heads * head_dim

    # hoist every parameter read once (mha() is traced twice below)
    w_qkv = wqkv_ref[...]
    b_qkv = bqkv_ref[...]
    w_out = wout_ref[...]
    b_out = bout_ref[...]
    mask = mask_ref[...] if has_mask else None      # (1, S) additive, f32

    # lane-validity mask so LayerNorm statistics only see the true E lanes
    lane_valid = jax.lax.broadcasted_iota(jnp.int32, (S, Ep), 1) < e_true
    inv_e = 1.0 / float(e_true)

    def layer_norm(t, w, b):
        mu = jnp.sum(t, axis=-1, keepdims=True) * inv_e       # pads are zero
        c = jnp.where(lane_valid, t - mu, 0.0)
        var = jnp.sum(c * c, axis=-1, keepdims=True) * inv_e
        return c * jax.lax.rsqrt(var + EPS) * w + b           # pads stay zero

    qkT_dims = (((1,), (1,)), ((), ()))   # q @ k^T without an in-kernel .T

    def mha(t):
        tm = t.astype(mxu_dtype)
        # single fused QKV projection (scale already folded into the Q block)
        qkv = jnp.dot(tm, w_qkv, preferred_element_type=jnp.float32) + b_qkv
        for h in range(num_heads):        # static unroll, 128-aligned slices
            q_h = qkv[:, h * head_dim:(h + 1) * head_dim]
            k_h = qkv[:, HD + h * head_dim:HD + (h + 1) * head_dim]
            v_h = qkv[:, 2 * HD + h * head_dim:2 * HD + (h + 1) * head_dim]
            s = jax.lax.dot_general(q_h.astype(mxu_dtype),
                                    k_h.astype(mxu_dtype),
                                    qkT_dims,
                                    preferred_element_type=jnp.float32)
            if has_mask:
                s = s + mask                               # key-padding mask
            s = s - jnp.max(s, axis=-1, keepdims=True)     # stable softmax
            p = jnp.exp(s)
            p = p * pl.reciprocal(jnp.sum(p, axis=-1, keepdims=True),
                                  approx=approx_recip)
            o_h = jnp.dot(p.astype(mxu_dtype), v_h.astype(mxu_dtype),
                          preferred_element_type=jnp.float32)     # (S, Dh)
            ocat_ref[:, h * head_dim:(h + 1) * head_dim] = o_h
        # ONE output projection over the whole head-concat (K = H*Dh)
        return jnp.dot(ocat_ref[...].astype(mxu_dtype), w_out,
                       preferred_element_type=jnp.float32) + b_out   # (S, Ep)

    # Round 1: attention + residual + LayerNorm1
    t1 = layer_norm(mha(x) + x, ln1w_ref[...], ln1b_ref[...])
    # Round 2: SAME attention weights (module reuses one MHA) + LayerNorm2
    t2 = layer_norm(mha(t1) + t1, ln2w_ref[...], ln2b_ref[...])
    out_ref[...] = t2


# -----------------------------------------------------------------------------
# Wrapper
# -----------------------------------------------------------------------------
def attention_stack(text, key_padding_mask, prep):
    """text: (B, S, E) f32; key_padding_mask: None or (B, S) bool (True=pad)."""
    B, S, E = text.shape
    Ep, Dh, H = prep["Ep"], prep["Dh"], prep["num_heads"]
    assert E == prep["E"]
    HD = H * Dh

    x_p = jnp.pad(text.astype(jnp.float32), ((0, 0), (0, 0), (0, Ep - E)))

    has_mask = key_padding_mask is not None
    inputs = [x_p]
    in_specs = [pl.BlockSpec((None, S, Ep), lambda b: (b, 0, 0))]
    if has_mask:
        mask_add = jnp.where(key_padding_mask, NEG_INF, 0.0)
        mask_add = mask_add.astype(jnp.float32)[:, None, :]       # (B, 1, S)
        inputs.append(mask_add)
        in_specs.append(pl.BlockSpec((None, 1, S), lambda b: (b, 0, 0)))

    param_inputs = [prep["w_qkv"], prep["b_qkv"], prep["w_out"], prep["b_out"],
                    prep["ln1w"], prep["ln1b"], prep["ln2w"], prep["ln2b"]]
    param_specs = [pl.BlockSpec(p.shape, lambda b: (0, 0)) for p in param_inputs]

    is_bf16 = jnp.dtype(prep["mxu_dtype"]) == jnp.dtype(jnp.bfloat16)
    kernel = functools.partial(
        _attn_stack_kernel, num_heads=H, head_dim=Dh, e_true=E,
        mxu_dtype=prep["mxu_dtype"], has_mask=has_mask,
        approx_recip=bool(is_bf16))

    out_p = pl.pallas_call(
        kernel,
        out_shape=jax.ShapeDtypeStruct((B, S, Ep), jnp.float32),
        grid=(B,),
        in_specs=in_specs + param_specs,
        out_specs=pl.BlockSpec((None, S, Ep), lambda b: (b, 0, 0)),
        scratch_shapes=[pltpu.VMEM((S, HD), jnp.float32)],   # head-concat buf
        compiler_params=pltpu.CompilerParams(
            dimension_semantics=("parallel",)),
    )(*inputs, *param_inputs)
    return out_p[:, :, :E]


# -----------------------------------------------------------------------------
# Pure-JAX reference of the PyTorch forward semantics (for validation).
# -----------------------------------------------------------------------------
def attention_stack_ref(text, key_padding_mask, params, *, num_heads):
    B, S, E = text.shape
    hd = E // num_heads
    scale = 1.0 / float(hd) ** 0.5
    if key_padding_mask is None:
        mask_add = jnp.zeros((B, 1, 1, S), jnp.float32)
    else:
        mask_add = jnp.where(key_padding_mask, NEG_INF, 0.0)[:, None, None, :]

    def ln(x, w, b):
        mu = jnp.mean(x, -1, keepdims=True)
        var = jnp.mean((x - mu) ** 2, -1, keepdims=True)
        return (x - mu) * jax.lax.rsqrt(var + EPS) * w + b

    def mha(t):
        q = (t @ params["wq"].T + params["bq"]).reshape(B, S, num_heads, hd)
        k = (t @ params["wk"].T + params["bk"]).reshape(B, S, num_heads, hd)
        v = (t @ params["wv"].T + params["bv"]).reshape(B, S, num_heads, hd)
        s = jnp.einsum("bqhd,bkhd->bhqk", q, k) * scale + mask_add
        p = jax.nn.softmax(s, axis=-1)
        o = jnp.einsum("bhqk,bkhd->bqhd", p, v).reshape(B, S, E)
        return o @ params["wo"].T + params["bo"]

    t1 = ln(mha(text) + text, params["ln1w"], params["ln1b"])
    t2 = ln(mha(t1) + t1, params["ln2w"], params["ln2b"])
    return t2


def make_params(key, E):
    ks = jax.random.split(key, 8)
    f = jnp.float32
    return {
        "wq": (0.05 * jax.random.normal(ks[0], (E, E))).astype(f),
        "wk": (0.05 * jax.random.normal(ks[1], (E, E))).astype(f),
        "wv": (0.05 * jax.random.normal(ks[2], (E, E))).astype(f),
        "bq": (0.01 * jax.random.normal(ks[3], (1, E))).astype(f),
        "bk": (0.01 * jax.random.normal(ks[4], (1, E))).astype(f),
        "bv": (0.01 * jax.random.normal(ks[5], (1, E))).astype(f),
        "wo": (0.05 * jax.random.normal(ks[6], (E, E))).astype(f),
        "bo": (0.01 * jax.random.normal(ks[7], (1, E))).astype(f),
        "ln1w": jnp.ones((1, E), f) + 0.01,
        "ln1b": jnp.full((1, E), 0.02, f),
        "ln2w": jnp.ones((1, E), f) - 0.01,
        "ln2b": jnp.full((1, E), -0.02, f),
    }


if __name__ == "__main__":
    # TODO(synk): the tg_conv.GATConv sparse graph layers of Alignment have no
    # clean dense-Pallas equivalent; this kernel covers the shared-weight
    # attention + residual + LayerNorm stack carried over from prior reviews.
    B, S, E, H = 2, 8, 40, 5
    key = jax.random.PRNGKey(0)
    kx, kp = jax.random.split(key)
    text = jax.random.normal(kx, (B, S, E), dtype=jnp.float32)
    params = make_params(kp, E)

    # ---- f32 MXU operands (exact path), mask=None (mask add compiled out) ----
    prep_f32 = prepare_params(params, num_heads=H, mxu_dtype=jnp.float32)
    out = jax.block_until_ready(attention_stack(text, None, prep_f32))
    ref = attention_stack_ref(text, None, params, num_heads=H)
    assert out.shape == (B, S, E)
    err = float(jnp.max(jnp.abs(out - ref)))
    assert jnp.allclose(out, ref, atol=5e-4, rtol=5e-4), f"f32/no-mask err {err}"

    # ---- f32 MXU operands with a key-padding mask ----------------------------
    mask = jnp.zeros((B, S), dtype=bool).at[1, S - 3:].set(True)
    out_m = jax.block_until_ready(attention_stack(text, mask, prep_f32))
    ref_m = attention_stack_ref(text, mask, params, num_heads=H)
    err_m = float(jnp.max(jnp.abs(out_m - ref_m)))
    assert jnp.allclose(out_m, ref_m, atol=5e-4, rtol=5e-4), f"f32/mask err {err_m}"

    # ---- bf16 MXU operands (v6e/v7x feedback); softmax/LN stay in f32 --------
    prep_bf16 = prepare_params(params, num_heads=H, mxu_dtype=jnp.bfloat16)
    out_b = jax.block_until_ready(attention_stack(text, None, prep_bf16))
    err_b = float(jnp.max(jnp.abs(out_b - ref)))
    assert jnp.all(jnp.isfinite(out_b)), "bf16 path produced non-finite values"
    assert jnp.allclose(out_b, ref, atol=1e-1, rtol=1e-1), f"bf16 err {err_b}"

    print("KERNEL_OK")
</pallas_src>

<mosaic_0001>
module attributes {stable_mosaic.version = 11 : i64} {
  func.func @_attn_stack_kernel(%arg0: i32, %arg1: memref<1x8x128xf32, #tpu.memory_space<vmem>>, %arg2: memref<128x1920xf32, #tpu.memory_space<vmem>>, %arg3: memref<1x1920xf32, #tpu.memory_space<vmem>>, %arg4: memref<640x128xf32, #tpu.memory_space<vmem>>, %arg5: memref<1x128xf32, #tpu.memory_space<vmem>>, %arg6: memref<1x128xf32, #tpu.memory_space<vmem>>, %arg7: memref<1x128xf32, #tpu.memory_space<vmem>>, %arg8: memref<1x128xf32, #tpu.memory_space<vmem>>, %arg9: memref<1x128xf32, #tpu.memory_space<vmem>>, %arg10: memref<1x8x128xf32, #tpu.memory_space<vmem>>, %arg11: memref<8x640xf32, #tpu.memory_space<vmem>>) attributes {dimension_semantics = [#tpu.dimension_semantics<parallel>], iteration_bounds = array<i64: 2>, scalar_prefetch = 0 : i64, scratch_operands = 1 : i64, tpu.core_type = #tpu.core_type<tc>, window_params = [{transform_indices = @transform_0, window_bounds = array<i64: 1, 8, 128>}, {pipeline_mode = #tpu.pipeline_mode<synchronous>, transform_indices = @transform_1, window_bounds = array<i64: 128, 1920>}, {pipeline_mode = #tpu.pipeline_mode<synchronous>, transform_indices = @transform_2, window_bounds = array<i64: 1, 1920>}, {pipeline_mode = #tpu.pipeline_mode<synchronous>, transform_indices = @transform_3, window_bounds = array<i64: 640, 128>}, {pipeline_mode = #tpu.pipeline_mode<synchronous>, transform_indices = @transform_4, window_bounds = array<i64: 1, 128>}, {pipeline_mode = #tpu.pipeline_mode<synchronous>, transform_indices = @transform_5, window_bounds = array<i64: 1, 128>}, {pipeline_mode = #tpu.pipeline_mode<synchronous>, transform_indices = @transform_6, window_bounds = array<i64: 1, 128>}, {pipeline_mode = #tpu.pipeline_mode<synchronous>, transform_indices = @transform_7, window_bounds = array<i64: 1, 128>}, {pipeline_mode = #tpu.pipeline_mode<synchronous>, transform_indices = @transform_8, window_bounds = array<i64: 1, 128>}, {transform_indices = @transform_9, window_bounds = array<i64: 1, 8, 128>}]} {
    %c0 = arith.constant 0 : index
    %c0_0 = arith.constant 0 : index
    %c0_1 = arith.constant 0 : index
    %0 = vector.load %arg1[%c0, %c0_0, %c0_1] : memref<1x8x128xf32, #tpu.memory_space<vmem>>, vector<1x8x128xf32>
    %1 = vector.shape_cast %0 : vector<1x8x128xf32> to vector<8x128xf32>
    %c0_2 = arith.constant 0 : index
    %c0_3 = arith.constant 0 : index
    %2 = vector.load %arg2[%c0_2, %c0_3] : memref<128x1920xf32, #tpu.memory_space<vmem>>, vector<128x1920xf32>
    %c0_4 = arith.constant 0 : index
    %c0_5 = arith.constant 0 : index
    %3 = vector.load %arg3[%c0_4, %c0_5] : memref<1x1920xf32, #tpu.memory_space<vmem>>, vector<1x1920xf32>
    %c0_6 = arith.constant 0 : index
    %c0_7 = arith.constant 0 : index
    %4 = vector.load %arg4[%c0_6, %c0_7] : memref<640x128xf32, #tpu.memory_space<vmem>>, vector<640x128xf32>
    %c0_8 = arith.constant 0 : index
    %c0_9 = arith.constant 0 : index
    %5 = vector.load %arg5[%c0_8, %c0_9] : memref<1x128xf32, #tpu.memory_space<vmem>>, vector<1x128xf32>
    %6 = tpu.iota {dimensions = array<i32: 1>} : vector<8x128xi32>
    %c40_i32 = arith.constant 40 : i32
    %7 = vector.broadcast %c40_i32 : i32 to vector<8x128xi32>
    %8 = arith.cmpi slt, %6, %7 : vector<8x128xi32>
    %cst = arith.constant dense<0.000000e+00> : vector<8x1920xf32>
    %9 = tpu.matmul %1, %2, %cst {dimension_numbers = #tpu.dot_dimension_numbers<[1], [0], [0], [1], [0, 0, 1, 1], [], []>} : vector<8x128xf32>, vector<128x1920xf32>, vector<8x1920xf32> -> vector<8x1920xf32>
    %10 = vector.broadcast %3 : vector<1x1920xf32> to vector<8x1920xf32>
    %11 = arith.addf %9, %10 : vector<8x1920xf32>
    %12 = vector.extract_strided_slice %11 {offsets = [0, 0], sizes = [8, 128], strides = [1, 1]} : vector<8x1920xf32> to vector<8x128xf32>
    %13 = vector.extract_strided_slice %11 {offsets = [0, 640], sizes = [8, 128], strides = [1, 1]} : vector<8x1920xf32> to vector<8x128xf32>
    %14 = vector.extract_strided_slice %11 {offsets = [0, 1280], sizes = [8, 128], strides = [1, 1]} : vector<8x1920xf32> to vector<8x128xf32>
    %cst_10 = arith.constant dense<0.000000e+00> : vector<8x8xf32>
    %15 = tpu.matmul %12, %13, %cst_10 {dimension_numbers = #tpu.dot_dimension_numbers<[1], [1], [0], [0], [0, 0, 1, 0], [], []>} : vector<8x128xf32>, vector<8x128xf32>, vector<8x8xf32> -> vector<8x8xf32>
    %cst_11 = arith.constant dense<0xFF800000> : vector<8xf32>
    %16 = vector.multi_reduction <maximumf>, %15, %cst_11 [1] : vector<8x8xf32> to vector<8xf32>
    %17 = vector.shape_cast %16 : vector<8xf32> to vector<8x1xf32>
    %18 = vector.broadcast %17 : vector<8x1xf32> to vector<8x8xf32>
    %19 = arith.subf %15, %18 : vector<8x8xf32>
    %20 = math.exp %19 : vector<8x8xf32>
    %cst_12 = arith.constant dense<0.000000e+00> : vector<8xf32>
    %21 = vector.multi_reduction <add>, %20, %cst_12 [1] : vector<8x8xf32> to vector<8xf32>
    %22 = vector.shape_cast %21 : vector<8xf32> to vector<8x1xf32>
    %23 = tpu.reciprocal %22 : vector<8x1xf32> -> vector<8x1xf32>
    %24 = vector.broadcast %23 : vector<8x1xf32> to vector<8x8xf32>
    %25 = arith.mulf %20, %24 : vector<8x8xf32>
    %cst_13 = arith.constant dense<0.000000e+00> : vector<8x128xf32>
    %26 = tpu.matmul %25, %14, %cst_13 {dimension_numbers = #tpu.dot_dimension_numbers<[1], [0], [0], [1], [0, 0, 1, 1], [], []>} : vector<8x8xf32>, vector<8x128xf32>, vector<8x128xf32> -> vector<8x128xf32>
    %c0_14 = arith.constant 0 : index
    %c0_15 = arith.constant 0 : index
    %27 = vector.load %arg11[%c0_14, %c0_15] : memref<8x640xf32, #tpu.memory_space<vmem>>, vector<8x128xf32>
    tpu.vector_store %arg11[%c0_14, %c0_15], %26 {strides = array<i32>} : memref<8x640xf32, #tpu.memory_space<vmem>>, vector<8x128xf32>,
    %28 = vector.extract_strided_slice %11 {offsets = [0, 128], sizes = [8, 128], strides = [1, 1]} : vector<8x1920xf32> to vector<8x128xf32>
    %29 = vector.extract_strided_slice %11 {offsets = [0, 768], sizes = [8, 128], strides = [1, 1]} : vector<8x1920xf32> to vector<8x128xf32>
    %30 = vector.extract_strided_slice %11 {offsets = [0, 1408], sizes = [8, 128], strides = [1, 1]} : vector<8x1920xf32> to vector<8x128xf32>
    %cst_16 = arith.constant dense<0.000000e+00> : vector<8x8xf32>
    %31 = tpu.matmul %28, %29, %cst_16 {dimension_numbers = #tpu.dot_dimension_numbers<[1], [1], [0], [0], [0, 0, 1, 0], [], []>} : vector<8x128xf32>, vector<8x128xf32>, vector<8x8xf32> -> vector<8x8xf32>
    %cst_17 = arith.constant dense<0xFF800000> : vector<8xf32>
    %32 = vector.multi_reduction <maximumf>, %31, %cst_17 [1] : vector<8x8xf32> to vector<8xf32>
    %33 = vector.shape_cast %32 : vector<8xf32> to vector<8x1xf32>
    %34 = vector.broadcast %33 : vector<8x1xf32> to vector<8x8xf32>
    %35 = arith.subf %31, %34 : vector<8x8xf32>
    %36 = math.exp %35 : vector<8x8xf32>
    %cst_18 = arith.constant dense<0.000000e+00> : vector<8xf32>
    %37 = vector.multi_reduction <add>, %36, %cst_18 [1] : vector<8x8xf32> to vector<8xf32>
    %38 = vector.shape_cast %37 : vector<8xf32> to vector<8x1xf32>
    %39 = tpu.reciprocal %38 : vector<8x1xf32> -> vector<8x1xf32>
    %40 = vector.broadcast %39 : vector<8x1xf32> to vector<8x8xf32>
    %41 = arith.mulf %36, %40 : vector<8x8xf32>
    %cst_19 = arith.constant dense<0.000000e+00> : vector<8x128xf32>
    %42 = tpu.matmul %41, %30, %cst_19 {dimension_numbers = #tpu.dot_dimension_numbers<[1], [0], [0], [1], [0, 0, 1, 1], [], []>} : vector<8x8xf32>, vector<8x128xf32>, vector<8x128xf32> -> vector<8x128xf32>
    %c0_20 = arith.constant 0 : index
    %c128 = arith.constant 128 : index
    %43 = vector.load %arg11[%c0_20, %c128] : memref<8x640xf32, #tpu.memory_space<vmem>>, vector<8x128xf32>
    tpu.vector_store %arg11[%c0_20, %c128], %42 {strides = array<i32>} : memref<8x640xf32, #tpu.memory_space<vmem>>, vector<8x128xf32>,
    %44 = vector.extract_strided_slice %11 {offsets = [0, 256], sizes = [8, 128], strides = [1, 1]} : vector<8x1920xf32> to vector<8x128xf32>
    %45 = vector.extract_strided_slice %11 {offsets = [0, 896], sizes = [8, 128], strides = [1, 1]} : vector<8x1920xf32> to vector<8x128xf32>
    %46 = vector.extract_strided_slice %11 {offsets = [0, 1536], sizes = [8, 128], strides = [1, 1]} : vector<8x1920xf32> to vector<8x128xf32>
    %cst_21 = arith.constant dense<0.000000e+00> : vector<8x8xf32>
    %47 = tpu.matmul %44, %45, %cst_21 {dimension_numbers = #tpu.dot_dimension_numbers<[1], [1], [0], [0], [0, 0, 1, 0], [], []>} : vector<8x128xf32>, vector<8x128xf32>, vector<8x8xf32> -> vector<8x8xf32>
    %cst_22 = arith.constant dense<0xFF800000> : vector<8xf32>
    %48 = vector.multi_reduction <maximumf>, %47, %cst_22 [1] : vector<8x8xf32> to vector<8xf32>
    %49 = vector.shape_cast %48 : vector<8xf32> to vector<8x1xf32>
    %50 = vector.broadcast %49 : vector<8x1xf32> to vector<8x8xf32>
    %51 = arith.subf %47, %50 : vector<8x8xf32>
    %52 = math.exp %51 : vector<8x8xf32>
    %cst_23 = arith.constant dense<0.000000e+00> : vector<8xf32>
    %53 = vector.multi_reduction <add>, %52, %cst_23 [1] : vector<8x8xf32> to vector<8xf32>
    %54 = vector.shape_cast %53 : vector<8xf32> to vector<8x1xf32>
    %55 = tpu.reciprocal %54 : vector<8x1xf32> -> vector<8x1xf32>
    %56 = vector.broadcast %55 : vector<8x1xf32> to vector<8x8xf32>
    %57 = arith.mulf %52, %56 : vector<8x8xf32>
    %cst_24 = arith.constant dense<0.000000e+00> : vector<8x128xf32>
    %58 = tpu.matmul %57, %46, %cst_24 {dimension_numbers = #tpu.dot_dimension_numbers<[1], [0], [0], [1], [0, 0, 1, 1], [], []>} : vector<8x8xf32>, vector<8x128xf32>, vector<8x128xf32> -> vector<8x128xf32>
    %c0_25 = arith.constant 0 : index
    %c256 = arith.constant 256 : index
    %59 = vector.load %arg11[%c0_25, %c256] : memref<8x640xf32, #tpu.memory_space<vmem>>, vector<8x128xf32>
    tpu.vector_store %arg11[%c0_25, %c256], %58 {strides = array<i32>} : memref<8x640xf32, #tpu.memory_space<vmem>>, vector<8x128xf32>,
    %60 = vector.extract_strided_slice %11 {offsets = [0, 384], sizes = [8, 128], strides = [1, 1]} : vector<8x1920xf32> to vector<8x128xf32>
    %61 = vector.extract_strided_slice %11 {offsets = [0, 1024], sizes = [8, 128], strides = [1, 1]} : vector<8x1920xf32> to vector<8x128xf32>
    %62 = vector.extract_strided_slice %11 {offsets = [0, 1664], sizes = [8, 128], strides = [1, 1]} : vector<8x1920xf32> to vector<8x128xf32>
    %cst_26 = arith.constant dense<0.000000e+00> : vector<8x8xf32>
    %63 = tpu.matmul %60, %61, %cst_26 {dimension_numbers = #tpu.dot_dimension_numbers<[1], [1], [0], [0], [0, 0, 1, 0], [], []>} : vector<8x128xf32>, vector<8x128xf32>, vector<8x8xf32> -> vector<8x8xf32>
    %cst_27 = arith.constant dense<0xFF800000> : vector<8xf32>
    %64 = vector.multi_reduction <maximumf>, %63, %cst_27 [1] : vector<8x8xf32> to vector<8xf32>
    %65 = vector.shape_cast %64 : vector<8xf32> to vector<8x1xf32>
    %66 = vector.broadcast %65 : vector<8x1xf32> to vector<8x8xf32>
    %67 = arith.subf %63, %66 : vector<8x8xf32>
    %68 = math.exp %67 : vector<8x8xf32>
    %cst_28 = arith.constant dense<0.000000e+00> : vector<8xf32>
    %69 = vector.multi_reduction <add>, %68, %cst_28 [1] : vector<8x8xf32> to vector<8xf32>
    %70 = vector.shape_cast %69 : vector<8xf32> to vector<8x1xf32>
    %71 = tpu.reciprocal %70 : vector<8x1xf32> -> vector<8x1xf32>
    %72 = vector.broadcast %71 : vector<8x1xf32> to vector<8x8xf32>
    %73 = arith.mulf %68, %72 : vector<8x8xf32>
    %cst_29 = arith.constant dense<0.000000e+00> : vector<8x128xf32>
    %74 = tpu.matmul %73, %62, %cst_29 {dimension_numbers = #tpu.dot_dimension_numbers<[1], [0], [0], [1], [0, 0, 1, 1], [], []>} : vector<8x8xf32>, vector<8x128xf32>, vector<8x128xf32> -> vector<8x128xf32>
    %c0_30 = arith.constant 0 : index
    %c384 = arith.constant 384 : index
    %75 = vector.load %arg11[%c0_30, %c384] : memref<8x640xf32, #tpu.memory_space<vmem>>, vector<8x128xf32>
    tpu.vector_store %arg11[%c0_30, %c384], %74 {strides = array<i32>} : memref<8x640xf32, #tpu.memory_space<vmem>>, vector<8x128xf32>,
    %76 = vector.extract_strided_slice %11 {offsets = [0, 512], sizes = [8, 128], strides = [1, 1]} : vector<8x1920xf32> to vector<8x128xf32>
    %77 = vector.extract_strided_slice %11 {offsets = [0, 1152], sizes = [8, 128], strides = [1, 1]} : vector<8x1920xf32> to vector<8x128xf32>
    %78 = vector.extract_strided_slice %11 {offsets = [0, 1792], sizes = [8, 128], strides = [1, 1]} : vector<8x1920xf32> to vector<8x128xf32>
    %cst_31 = arith.constant dense<0.000000e+00> : vector<8x8xf32>
    %79 = tpu.matmul %76, %77, %cst_31 {dimension_numbers = #tpu.dot_dimension_numbers<[1], [1], [0], [0], [0, 0, 1, 0], [], []>} : vector<8x128xf32>, vector<8x128xf32>, vector<8x8xf32> -> vector<8x8xf32>
    %cst_32 = arith.constant dense<0xFF800000> : vector<8xf32>
    %80 = vector.multi_reduction <maximumf>, %79, %cst_32 [1] : vector<8x8xf32> to vector<8xf32>
    %81 = vector.shape_cast %80 : vector<8xf32> to vector<8x1xf32>
    %82 = vector.broadcast %81 : vector<8x1xf32> to vector<8x8xf32>
    %83 = arith.subf %79, %82 : vector<8x8xf32>
    %84 = math.exp %83 : vector<8x8xf32>
    %cst_33 = arith.constant dense<0.000000e+00> : vector<8xf32>
    %85 = vector.multi_reduction <add>, %84, %cst_33 [1] : vector<8x8xf32> to vector<8xf32>
    %86 = vector.shape_cast %85 : vector<8xf32> to vector<8x1xf32>
    %87 = tpu.reciprocal %86 : vector<8x1xf32> -> vector<8x1xf32>
    %88 = vector.broadcast %87 : vector<8x1xf32> to vector<8x8xf32>
    %89 = arith.mulf %84, %88 : vector<8x8xf32>
    %cst_34 = arith.constant dense<0.000000e+00> : vector<8x128xf32>
    %90 = tpu.matmul %89, %78, %cst_34 {dimension_numbers = #tpu.dot_dimension_numbers<[1], [0], [0], [1], [0, 0, 1, 1], [], []>} : vector<8x8xf32>, vector<8x128xf32>, vector<8x128xf32> -> vector<8x128xf32>
    %c0_35 = arith.constant 0 : index
    %c512 = arith.constant 512 : index
    %91 = vector.load %arg11[%c0_35, %c512] : memref<8x640xf32, #tpu.memory_space<vmem>>, vector<8x128xf32>
    tpu.vector_store %arg11[%c0_35, %c512], %90 {strides = array<i32>} : memref<8x640xf32, #tpu.memory_space<vmem>>, vector<8x128xf32>,
    %c0_36 = arith.constant 0 : index
    %c0_37 = arith.constant 0 : index
    %92 = vector.load %arg11[%c0_36, %c0_37] : memref<8x640xf32, #tpu.memory_space<vmem>>, vector<8x640xf32>
    %cst_38 = arith.constant dense<0.000000e+00> : vector<8x128xf32>
    %93 = tpu.matmul %92, %4, %cst_38 {dimension_numbers = #tpu.dot_dimension_numbers<[1], [0], [0], [1], [0, 0, 1, 1], [], []>} : vector<8x640xf32>, vector<640x128xf32>, vector<8x128xf32> -> vector<8x128xf32>
    %94 = vector.broadcast %5 : vector<1x128xf32> to vector<8x128xf32>
    %95 = arith.addf %93, %94 : vector<8x128xf32>
    %96 = arith.addf %95, %1 : vector<8x128xf32>
    %c0_39 = arith.constant 0 : index
    %c0_40 = arith.constant 0 : index
    %97 = vector.load %arg6[%c0_39, %c0_40] : memref<1x128xf32, #tpu.memory_space<vmem>>, vector<1x128xf32>
    %c0_41 = arith.constant 0 : index
    %c0_42 = arith.constant 0 : index
    %98 = vector.load %arg7[%c0_41, %c0_42] : memref<1x128xf32, #tpu.memory_space<vmem>>, vector<1x128xf32>
    %cst_43 = arith.constant dense<0.000000e+00> : vector<8xf32>
    %99 = vector.multi_reduction <add>, %96, %cst_43 [1] : vector<8x128xf32> to vector<8xf32>
    %100 = vector.shape_cast %99 : vector<8xf32> to vector<8x1xf32>
    %cst_44 = arith.constant 2.500000e-02 : f32
    %101 = vector.broadcast %cst_44 : f32 to vector<8x1xf32>
    %102 = arith.mulf %100, %101 : vector<8x1xf32>
    %103 = vector.broadcast %102 : vector<8x1xf32> to vector<8x128xf32>
    %104 = arith.subf %96, %103 : vector<8x128xf32>
    %cst_45 = arith.constant 0.000000e+00 : f32
    %105 = vector.broadcast %cst_45 : f32 to vector<8x128xf32>
    %106 = arith.select %8, %104, %105 : vector<8x128xi1>, vector<8x128xf32>
    %107 = arith.mulf %106, %106 : vector<8x128xf32>
    %cst_46 = arith.constant dense<0.000000e+00> : vector<8xf32>
    %108 = vector.multi_reduction <add>, %107, %cst_46 [1] : vector<8x128xf32> to vector<8xf32>
    %109 = vector.shape_cast %108 : vector<8xf32> to vector<8x1xf32>
    %cst_47 = arith.constant 2.500000e-02 : f32
    %110 = vector.broadcast %cst_47 : f32 to vector<8x1xf32>
    %111 = arith.mulf %109, %110 : vector<8x1xf32>
    %cst_48 = arith.constant 9.99999974E-6 : f32
    %112 = vector.broadcast %cst_48 : f32 to vector<8x1xf32>
    %113 = arith.addf %111, %112 : vector<8x1xf32>
    %114 = math.rsqrt %113 : vector<8x1xf32>
    %115 = vector.broadcast %114 : vector<8x1xf32> to vector<8x128xf32>
    %116 = arith.mulf %106, %115 : vector<8x128xf32>
    %117 = vector.broadcast %97 : vector<1x128xf32> to vector<8x128xf32>
    %118 = arith.mulf %116, %117 : vector<8x128xf32>
    %119 = vector.broadcast %98 : vector<1x128xf32> to vector<8x128xf32>
    %120 = arith.addf %118, %119 : vector<8x128xf32>
    %cst_49 = arith.constant dense<0.000000e+00> : vector<8x1920xf32>
    %121 = tpu.matmul %120, %2, %cst_49 {dimension_numbers = #tpu.dot_dimension_numbers<[1], [0], [0], [1], [0, 0, 1, 1], [], []>} : vector<8x128xf32>, vector<128x1920xf32>, vector<8x1920xf32> -> vector<8x1920xf32>
    %122 = vector.broadcast %3 : vector<1x1920xf32> to vector<8x1920xf32>
    %123 = arith.addf %121, %122 : vector<8x1920xf32>
    %124 = vector.extract_strided_slice %123 {offsets = [0, 0], sizes = [8, 128], strides = [1, 1]} : vector<8x1920xf32> to vector<8x128xf32>
    %125 = vector.extract_strided_slice %123 {offsets = [0, 640], sizes = [8, 128], strides = [1, 1]} : vector<8x1920xf32> to vector<8x128xf32>
    %126 = vector.extract_strided_slice %123 {offsets = [0, 1280], sizes = [8, 128], strides = [1, 1]} : vector<8x1920xf32> to vector<8x128xf32>
    %cst_50 = arith.constant dense<0.000000e+00> : vector<8x8xf32>
    %127 = tpu.matmul %124, %125, %cst_50 {dimension_numbers = #tpu.dot_dimension_numbers<[1], [1], [0], [0], [0, 0, 1, 0], [], []>} : vector<8x128xf32>, vector<8x128xf32>, vector<8x8xf32> -> vector<8x8xf32>
    %cst_51 = arith.constant dense<0xFF800000> : vector<8xf32>
    %128 = vector.multi_reduction <maximumf>, %127, %cst_51 [1] : vector<8x8xf32> to vector<8xf32>
    %129 = vector.shape_cast %128 : vector<8xf32> to vector<8x1xf32>
    %130 = vector.broadcast %129 : vector<8x1xf32> to vector<8x8xf32>
    %131 = arith.subf %127, %130 : vector<8x8xf32>
    %132 = math.exp %131 : vector<8x8xf32>
    %cst_52 = arith.constant dense<0.000000e+00> : vector<8xf32>
    %133 = vector.multi_reduction <add>, %132, %cst_52 [1] : vector<8x8xf32> to vector<8xf32>
    %134 = vector.shape_cast %133 : vector<8xf32> to vector<8x1xf32>
    %135 = tpu.reciprocal %134 : vector<8x1xf32> -> vector<8x1xf32>
    %136 = vector.broadcast %135 : vector<8x1xf32> to vector<8x8xf32>
    %137 = arith.mulf %132, %136 : vector<8x8xf32>
    %cst_53 = arith.constant dense<0.000000e+00> : vector<8x128xf32>
    %138 = tpu.matmul %137, %126, %cst_53 {dimension_numbers = #tpu.dot_dimension_numbers<[1], [0], [0], [1], [0, 0, 1, 1], [], []>} : vector<8x8xf32>, vector<8x128xf32>, vector<8x128xf32> -> vector<8x128xf32>
    %c0_54 = arith.constant 0 : index
    %c0_55 = arith.constant 0 : index
    %139 = vector.load %arg11[%c0_54, %c0_55] : memref<8x640xf32, #tpu.memory_space<vmem>>, vector<8x128xf32>
    tpu.vector_store %arg11[%c0_54, %c0_55], %138 {strides = array<i32>} : memref<8x640xf32, #tpu.memory_space<vmem>>, vector<8x128xf32>,
    %140 = vector.extract_strided_slice %123 {offsets = [0, 128], sizes = [8, 128], strides = [1, 1]} : vector<8x1920xf32> to vector<8x128xf32>
    %141 = vector.extract_strided_slice %123 {offsets = [0, 768], sizes = [8, 128], strides = [1, 1]} : vector<8x1920xf32> to vector<8x128xf32>
    %142 = vector.extract_strided_slice %123 {offsets = [0, 1408], sizes = [8, 128], strides = [1, 1]} : vector<8x1920xf32> to vector<8x128xf32>
    %cst_56 = arith.constant dense<0.000000e+00> : vector<8x8xf32>
    %143 = tpu.matmul %140, %141, %cst_56 {dimension_numbers = #tpu.dot_dimension_numbers<[1], [1], [0], [0], [0, 0, 1, 0], [], []>} : vector<8x128xf32>, vector<8x128xf32>, vector<8x8xf32> -> vector<8x8xf32>
    %cst_57 = arith.constant dense<0xFF800000> : vector<8xf32>
    %144 = vector.multi_reduction <maximumf>, %143, %cst_57 [1] : vector<8x8xf32> to vector<8xf32>
    %145 = vector.shape_cast %144 : vector<8xf32> to vector<8x1xf32>
    %146 = vector.broadcast %145 : vector<8x1xf32> to vector<8x8xf32>
    %147 = arith.subf %143, %146 : vector<8x8xf32>
    %148 = math.exp %147 : vector<8x8xf32>
    %cst_58 = arith.constant dense<0.000000e+00> : vector<8xf32>
    %149 = vector.multi_reduction <add>, %148, %cst_58 [1] : vector<8x8xf32> to vector<8xf32>
    %150 = vector.shape_cast %149 : vector<8xf32> to vector<8x1xf32>
    %151 = tpu.reciprocal %150 : vector<8x1xf32> -> vector<8x1xf32>
    %152 = vector.broadcast %151 : vector<8x1xf32> to vector<8x8xf32>
    %153 = arith.mulf %148, %152 : vector<8x8xf32>
    %cst_59 = arith.constant dense<0.000000e+00> : vector<8x128xf32>
    %154 = tpu.matmul %153, %142, %cst_59 {dimension_numbers = #tpu.dot_dimension_numbers<[1], [0], [0], [1], [0, 0, 1, 1], [], []>} : vector<8x8xf32>, vector<8x128xf32>, vector<8x128xf32> -> vector<8x128xf32>
    %c0_60 = arith.constant 0 : index
    %c128_61 = arith.constant 128 : index
    %155 = vector.load %arg11[%c0_60, %c128_61] : memref<8x640xf32, #tpu.memory_space<vmem>>, vector<8x128xf32>
    tpu.vector_store %arg11[%c0_60, %c128_61], %154 {strides = array<i32>} : memref<8x640xf32, #tpu.memory_space<vmem>>, vector<8x128xf32>,
    %156 = vector.extract_strided_slice %123 {offsets = [0, 256], sizes = [8, 128], strides = [1, 1]} : vector<8x1920xf32> to vector<8x128xf32>
    %157 = vector.extract_strided_slice %123 {offsets = [0, 896], sizes = [8, 128], strides = [1, 1]} : vector<8x1920xf32> to vector<8x128xf32>
    %158 = vector.extract_strided_slice %123 {offsets = [0, 1536], sizes = [8, 128], strides = [1, 1]} : vector<8x1920xf32> to vector<8x128xf32>
    %cst_62 = arith.constant dense<0.000000e+00> : vector<8x8xf32>
    %159 = tpu.matmul %156, %157, %cst_62 {dimension_numbers = #tpu.dot_dimension_numbers<[1], [1], [0], [0], [0, 0, 1, 0], [], []>} : vector<8x128xf32>, vector<8x128xf32>, vector<8x8xf32> -> vector<8x8xf32>
    %cst_63 = arith.constant dense<0xFF800000> : vector<8xf32>
    %160 = vector.multi_reduction <maximumf>, %159, %cst_63 [1] : vector<8x8xf32> to vector<8xf32>
    %161 = vector.shape_cast %160 : vector<8xf32> to vector<8x1xf32>
    %162 = vector.broadcast %161 : vector<8x1xf32> to vector<8x8xf32>
    %163 = arith.subf %159, %162 : vector<8x8xf32>
    %164 = math.exp %163 : vector<8x8xf32>
    %cst_64 = arith.constant dense<0.000000e+00> : vector<8xf32>
    %165 = vector.multi_reduction <add>, %164, %cst_64 [1] : vector<8x8xf32> to vector<8xf32>
    %166 = vector.shape_cast %165 : vector<8xf32> to vector<8x1xf32>
    %167 = tpu.reciprocal %166 : vector<8x1xf32> -> vector<8x1xf32>
    %168 = vector.broadcast %167 : vector<8x1xf32> to vector<8x8xf32>
    %169 = arith.mulf %164, %168 : vector<8x8xf32>
    %cst_65 = arith.constant dense<0.000000e+00> : vector<8x128xf32>
    %170 = tpu.matmul %169, %158, %cst_65 {dimension_numbers = #tpu.dot_dimension_numbers<[1], [0], [0], [1], [0, 0, 1, 1], [], []>} : vector<8x8xf32>, vector<8x128xf32>, vector<8x128xf32> -> vector<8x128xf32>
    %c0_66 = arith.constant 0 : index
    %c256_67 = arith.constant 256 : index
    %171 = vector.load %arg11[%c0_66, %c256_67] : memref<8x640xf32, #tpu.memory_space<vmem>>, vector<8x128xf32>
    tpu.vector_store %arg11[%c0_66, %c256_67], %170 {strides = array<i32>} : memref<8x640xf32, #tpu.memory_space<vmem>>, vector<8x128xf32>,
    %172 = vector.extract_strided_slice %123 {offsets = [0, 384], sizes = [8, 128], strides = [1, 1]} : vector<8x1920xf32> to vector<8x128xf32>
    %173 = vector.extract_strided_slice %123 {offsets = [0, 1024], sizes = [8, 128], strides = [1, 1]} : vector<8x1920xf32> to vector<8x128xf32>
    %174 = vector.extract_strided_slice %123 {offsets = [0, 1664], sizes = [8, 128], strides = [1, 1]} : vector<8x1920xf32> to vector<8x128xf32>
    %cst_68 = arith.constant dense<0.000000e+00> : vector<8x8xf32>
    %175 = tpu.matmul %172, %173, %cst_68 {dimension_numbers = #tpu.dot_dimension_numbers<[1], [1], [0], [0], [0, 0, 1, 0], [], []>} : vector<8x128xf32>, vector<8x128xf32>, vector<8x8xf32> -> vector<8x8xf32>
    %cst_69 = arith.constant dense<0xFF800000> : vector<8xf32>
    %176 = vector.multi_reduction <maximumf>, %175, %cst_69 [1] : vector<8x8xf32> to vector<8xf32>
    %177 = vector.shape_cast %176 : vector<8xf32> to vector<8x1xf32>
    %178 = vector.broadcast %177 : vector<8x1xf32> to vector<8x8xf32>
    %179 = arith.subf %175, %178 : vector<8x8xf32>
    %180 = math.exp %179 : vector<8x8xf32>
    %cst_70 = arith.constant dense<0.000000e+00> : vector<8xf32>
    %181 = vector.multi_reduction <add>, %180, %cst_70 [1] : vector<8x8xf32> to vector<8xf32>
    %182 = vector.shape_cast %181 : vector<8xf32> to vector<8x1xf32>
    %183 = tpu.reciprocal %182 : vector<8x1xf32> -> vector<8x1xf32>
    %184 = vector.broadcast %183 : vector<8x1xf32> to vector<8x8xf32>
    %185 = arith.mulf %180, %184 : vector<8x8xf32>
    %cst_71 = arith.constant dense<0.000000e+00> : vector<8x128xf32>
    %186 = tpu.matmul %185, %174, %cst_71 {dimension_numbers = #tpu.dot_dimension_numbers<[1], [0], [0], [1], [0, 0, 1, 1], [], []>} : vector<8x8xf32>, vector<8x128xf32>, vector<8x128xf32> -> vector<8x128xf32>
    %c0_72 = arith.constant 0 : index
    %c384_73 = arith.constant 384 : index
    %187 = vector.load %arg11[%c0_72, %c384_73] : memref<8x640xf32, #tpu.memory_space<vmem>>, vector<8x128xf32>
    tpu.vector_store %arg11[%c0_72, %c384_73], %186 {strides = array<i32>} : memref<8x640xf32, #tpu.memory_space<vmem>>, vector<8x128xf32>,
    %188 = vector.extract_strided_slice %123 {offsets = [0, 512], sizes = [8, 128], strides = [1, 1]} : vector<8x1920xf32> to vector<8x128xf32>
    %189 = vector.extract_strided_slice %123 {offsets = [0, 1152], sizes = [8, 128], strides = [1, 1]} : vector<8x1920xf32> to vector<8x128xf32>
    %190 = vector.extract_strided_slice %123 {offsets = [0, 1792], sizes = [8, 128], strides = [1, 1]} : vector<8x1920xf32> to vector<8x128xf32>
    %cst_74 = arith.constant dense<0.000000e+00> : vector<8x8xf32>
    %191 = tpu.matmul %188, %189, %cst_74 {dimension_numbers = #tpu.dot_dimension_numbers<[1], [1], [0], [0], [0, 0, 1, 0], [], []>} : vector<8x128xf32>, vector<8x128xf32>, vector<8x8xf32> -> vector<8x8xf32>
    %cst_75 = arith.constant dense<0xFF800000> : vector<8xf32>
    %192 = vector.multi_reduction <maximumf>, %191, %cst_75 [1] : vector<8x8xf32> to vector<8xf32>
    %193 = vector.shape_cast %192 : vector<8xf32> to vector<8x1xf32>
    %194 = vector.broadcast %193 : vector<8x1xf32> to vector<8x8xf32>
    %195 = arith.subf %191, %194 : vector<8x8xf32>
    %196 = math.exp %195 : vector<8x8xf32>
    %cst_76 = arith.constant dense<0.000000e+00> : vector<8xf32>
    %197 = vector.multi_reduction <add>, %196, %cst_76 [1] : vector<8x8xf32> to vector<8xf32>
    %198 = vector.shape_cast %197 : vector<8xf32> to vector<8x1xf32>
    %199 = tpu.reciprocal %198 : vector<8x1xf32> -> vector<8x1xf32>
    %200 = vector.broadcast %199 : vector<8x1xf32> to vector<8x8xf32>
    %201 = arith.mulf %196, %200 : vector<8x8xf32>
    %cst_77 = arith.constant dense<0.000000e+00> : vector<8x128xf32>
    %202 = tpu.matmul %201, %190, %cst_77 {dimension_numbers = #tpu.dot_dimension_numbers<[1], [0], [0], [1], [0, 0, 1, 1], [], []>} : vector<8x8xf32>, vector<8x128xf32>, vector<8x128xf32> -> vector<8x128xf32>
    %c0_78 = arith.constant 0 : index
    %c512_79 = arith.constant 512 : index
    %203 = vector.load %arg11[%c0_78, %c512_79] : memref<8x640xf32, #tpu.memory_space<vmem>>, vector<8x128xf32>
    tpu.vector_store %arg11[%c0_78, %c512_79], %202 {strides = array<i32>} : memref<8x640xf32, #tpu.memory_space<vmem>>, vector<8x128xf32>,
    %c0_80 = arith.constant 0 : index
    %c0_81 = arith.constant 0 : index
    %204 = vector.load %arg11[%c0_80, %c0_81] : memref<8x640xf32, #tpu.memory_space<vmem>>, vector<8x640xf32>
    %cst_82 = arith.constant dense<0.000000e+00> : vector<8x128xf32>
    %205 = tpu.matmul %204, %4, %cst_82 {dimension_numbers = #tpu.dot_dimension_numbers<[1], [0], [0], [1], [0, 0, 1, 1], [], []>} : vector<8x640xf32>, vector<640x128xf32>, vector<8x128xf32> -> vector<8x128xf32>
    %206 = vector.broadcast %5 : vector<1x128xf32> to vector<8x128xf32>
    %207 = arith.addf %205, %206 : vector<8x128xf32>
    %208 = arith.addf %207, %120 : vector<8x128xf32>
    %c0_83 = arith.constant 0 : index
    %c0_84 = arith.constant 0 : index
    %209 = vector.load %arg8[%c0_83, %c0_84] : memref<1x128xf32, #tpu.memory_space<vmem>>, vector<1x128xf32>
    %c0_85 = arith.constant 0 : index
    %c0_86 = arith.constant 0 : index
    %210 = vector.load %arg9[%c0_85, %c0_86] : memref<1x128xf32, #tpu.memory_space<vmem>>, vector<1x128xf32>
    %cst_87 = arith.constant dense<0.000000e+00> : vector<8xf32>
    %211 = vector.multi_reduction <add>, %208, %cst_87 [1] : vector<8x128xf32> to vector<8xf32>
    %212 = vector.shape_cast %211 : vector<8xf32> to vector<8x1xf32>
    %cst_88 = arith.constant 2.500000e-02 : f32
    %213 = vector.broadcast %cst_88 : f32 to vector<8x1xf32>
    %214 = arith.mulf %212, %213 : vector<8x1xf32>
    %215 = vector.broadcast %214 : vector<8x1xf32> to vector<8x128xf32>
    %216 = arith.subf %208, %215 : vector<8x128xf32>
    %cst_89 = arith.constant 0.000000e+00 : f32
    %217 = vector.broadcast %cst_89 : f32 to vector<8x128xf32>
    %218 = arith.select %8, %216, %217 : vector<8x128xi1>, vector<8x128xf32>
    %219 = arith.mulf %218, %218 : vector<8x128xf32>
    %cst_90 = arith.constant dense<0.000000e+00> : vector<8xf32>
    %220 = vector.multi_reduction <add>, %219, %cst_90 [1] : vector<8x128xf32> to vector<8xf32>
    %221 = vector.shape_cast %220 : vector<8xf32> to vector<8x1xf32>
    %cst_91 = arith.constant 2.500000e-02 : f32
    %222 = vector.broadcast %cst_91 : f32 to vector<8x1xf32>
    %223 = arith.mulf %221, %222 : vector<8x1xf32>
    %cst_92 = arith.constant 9.99999974E-6 : f32
    %224 = vector.broadcast %cst_92 : f32 to vector<8x1xf32>
    %225 = arith.addf %223, %224 : vector<8x1xf32>
    %226 = math.rsqrt %225 : vector<8x1xf32>
    %227 = vector.broadcast %226 : vector<8x1xf32> to vector<8x128xf32>
    %228 = arith.mulf %218, %227 : vector<8x128xf32>
    %229 = vector.broadcast %209 : vector<1x128xf32> to vector<8x128xf32>
    %230 = arith.mulf %228, %229 : vector<8x128xf32>
    %231 = vector.broadcast %210 : vector<1x128xf32> to vector<8x128xf32>
    %232 = arith.addf %230, %231 : vector<8x128xf32>
    %c0_93 = arith.constant 0 : index
    %c0_94 = arith.constant 0 : index
    %c0_95 = arith.constant 0 : index
    %233 = vector.load %arg10[%c0_93, %c0_94, %c0_95] : memref<1x8x128xf32, #tpu.memory_space<vmem>>, vector<1x8x128xf32>
    %234 = vector.shape_cast %233 : vector<1x8x128xf32> to vector<8x128xf32>
    %235 = vector.shape_cast %232 : vector<8x128xf32> to vector<1x8x128xf32>
    tpu.vector_store %arg10[%c0_93, %c0_94, %c0_95], %235 {strides = array<i32>} : memref<1x8x128xf32, #tpu.memory_space<vmem>>, vector<1x8x128xf32>,
    return
  }
  func.func @transform_0(%arg0: i32) -> (i32, i32, i32) {
    %c0_i32 = arith.constant 0 : i32
    %c0_i32_0 = arith.constant 0 : i32
    %c0_i32_1 = arith.constant 0 : i32
    return %arg0, %c0_i32, %c0_i32_0 : i32, i32, i32
  }
  func.func @transform_1(%arg0: i32) -> (i32, i32) {
    %c0_i32 = arith.constant 0 : i32
    %c0_i32_0 = arith.constant 0 : i32
    %c0_i32_1 = arith.constant 0 : i32
    return %c0_i32, %c0_i32_0 : i32, i32
  }
  func.func @transform_2(%arg0: i32) -> (i32, i32) {
    %c0_i32 = arith.constant 0 : i32
    %c0_i32_0 = arith.constant 0 : i32
    %c0_i32_1 = arith.constant 0 : i32
    return %c0_i32, %c0_i32_0 : i32, i32
  }
  func.func @transform_3(%arg0: i32) -> (i32, i32) {
    %c0_i32 = arith.constant 0 : i32
    %c0_i32_0 = arith.constant 0 : i32
    %c0_i32_1 = arith.constant 0 : i32
    return %c0_i32, %c0_i32_0 : i32, i32
  }
  func.func @transform_4(%arg0: i32) -> (i32, i32) {
    %c0_i32 = arith.constant 0 : i32
    %c0_i32_0 = arith.constant 0 : i32
    %c0_i32_1 = arith.constant 0 : i32
    return %c0_i32, %c0_i32_0 : i32, i32
  }
  func.func @transform_5(%arg0: i32) -> (i32, i32) {
    %c0_i32 = arith.constant 0 : i32
    %c0_i32_0 = arith.constant 0 : i32
    %c0_i32_1 = arith.constant 0 : i32
    return %c0_i32, %c0_i32_0 : i32, i32
  }
  func.func @transform_6(%arg0: i32) -> (i32, i32) {
    %c0_i32 = arith.constant 0 : i32
    %c0_i32_0 = arith.constant 0 : i32
    %c0_i32_1 = arith.constant 0 : i32
    return %c0_i32, %c0_i32_0 : i32, i32
  }
  func.func @transform_7(%arg0: i32) -> (i32, i32) {
    %c0_i32 = arith.constant 0 : i32
    %c0_i32_0 = arith.constant 0 : i32
    %c0_i32_1 = arith.constant 0 : i32
    return %c0_i32, %c0_i32_0 : i32, i32
  }
  func.func @transform_8(%arg0: i32) -> (i32, i32) {
    %c0_i32 = arith.constant 0 : i32
    %c0_i32_0 = arith.constant 0 : i32
    %c0_i32_1 = arith.constant 0 : i32
    return %c0_i32, %c0_i32_0 : i32, i32
  }
  func.func @transform_9(%arg0: i32) -> (i32, i32, i32) {
    %c0_i32 = arith.constant 0 : i32
    %c0_i32_0 = arith.constant 0 : i32
    %c0_i32_1 = arith.constant 0 : i32
    return %arg0, %c0_i32, %c0_i32_0 : i32, i32, i32
  }
}

</mosaic_0001>

<bundles_post_ra>
// kernel: tpu_custom_call.1
= control target key start
LH: loop header
LB: loop body
LE: loop exit
PB: predicated region body
PF: predicated region fallthrough
CT: control target
= control target key end

     0   :  { %s3686_s0 = inlined_call_operand.hbm [shape: f32[2,8,128], index: 0, kind: input, shape index: {}]   ;;  %s3687_s1 = inlined_call_operand.hbm [shape: f32[128,1920], index: 1, kind: input, shape index: {}]   ;;  %s3688_s2 = inlined_call_operand.hbm [shape: f32[1,1920], index: 2, kind: input, shape index: {}]   ;;  %s3689_s3 = inlined_call_operand.hbm [shape: f32[640,128], index: 3, kind: input, shape index: {}]   ;;  %s3690_s4 = inlined_call_operand.vmem [shape: f32[1,128], index: 4, kind: input, shape index: {}]   ;;  %s3691_s5 = inlined_call_operand.vmem [shape: f32[1,128], index: 5, kind: input, shape index: {}]   ;;  %s3692_s6 = inlined_call_operand.vmem [shape: f32[1,128], index: 6, kind: input, shape index: {}]   ;;  %s3693_s7 = inlined_call_operand.vmem [shape: f32[1,128], index: 7, kind: input, shape index: {}]   ;;  %s3694_s8 = inlined_call_operand.vmem [shape: f32[1,128], index: 8, kind: input, shape index: {}]   ;;  %s3695_s9 = inlined_call_operand.hbm [shape: f32[2,8,128], index: 9, kind: output, shape index: {}]  }
   0x1   :  { %3697 = sst [smem:[#allocation16_spill]] %s3687_s1 }
   0x2   :  { %3698 = sst [smem:[#allocation17_spill]] %s3688_s2 }
   0x3   :  { %3699 = sst [smem:[#allocation18_spill]] %s3689_s3 }
   0x4   :  { %14 = vsyncpa [#allocation4], 0 }
   0x5   :  { %16 = vsyncpa [#allocation4 + $0x1], 0 }
   0x6   :  { %17 = vsyncpa [#allocation7], 0 }
   0x7   :  { %18 = vsyncpa [#allocation10], 0 }
   0x8   :  { %19 = vsyncpa [#allocation5], 0 }
   0x9   :  { %21 = vsyncpa [#allocation5 + $0x1], 0  ;;  %s3133_s30 = smov 0   ;;  %s3135_s10 = smov 0  }
   0xa   :  { %s3137_s11 = smov 0   ;;  %s3139_s12 = smov 0  }
   0xb LB: > { %s3700_s1 = sld [smem:[#allocation16_spill]]  ;;  %s3157_s16 = sadd.s32 4294967295, %s3074_s12   ;;  %s3074_s12 = sphi %s3139_s12, %s3718_s12   ;;  %s3070_s11 = sphi %s3137_s11, %s3717_s11   ;;  %s3066_s10 = sphi %s3135_s10, %s3716_s10   ;;  %s3062_s30 = sphi %s3133_s30, %s3715_s30  }
   0xc   : > { %p2432_p0 = scmp.ge.s32.totalorder %s3074_s12, 1  ;;  %p48_p1 = scmp.eq.s32.totalorder %s3157_s16, 0 }
   0xd   : > { %p252_p2 = scmp.lt.s32.totalorder %s3074_s12, 3  ;;  %s3076_s18 = smov [#allocation6]  }
   0xe   : > { %s265_s19 = sshll.u32 %s3076_s18, 4  ;;  %s3702_s2 = sld [smem:[#allocation17_spill]]  ;;  %s266_s19 = int_to_ptr.vmem [resolvable:$true] %s265_s19 }
   0xf   : > { %p3162_p3 = pnand %p2432_p0, %p252_p2  ;;  %s3704_s3 = sld [smem:[#allocation18_spill]] }
  0x10   : > { %s3077_s27 = smov [#allocation8]   ;;  %s3078_s29 = smov 1920  }
  0x11   : > { %s263_s15 = sshll.u32 %s3700_s1, 4  ;;  %p2475_p4 = pneg %p3162_p3  ;;  %s264_s15 = int_to_ptr.hbm [resolvable:$true] %s263_s15 }
  0x12   : > { %s280_s28 = sshll.u32 %s3077_s27, 4  ;;  %s3079_s13 = smov 120   ;;  %s281_s28 = int_to_ptr.vmem [resolvable:$true] %s280_s28 }
  0x13   : > { %p3174_p6 = pnand %p2475_p4, %p48_p1  ;;  %s3080_s14 = smov [#allocation9]  }
  0x14   : > { %s278_s22 = sshll.u32 %s3702_s2, 4  ;;  %s291_s18 = sshll.u32 %s3080_s14, 4  ;;  %s279_s22 = int_to_ptr.hbm [resolvable:$true] %s278_s22  ;;  %s292_s18 = int_to_ptr.vmem [resolvable:$true] %s291_s18 }
  0x15   : > { %s289_s26 = sshll.u32 %s3704_s3, 4  ;;  %s3081_s20 = smov 128   ;;  %s290_s26 = int_to_ptr.hbm [resolvable:$true] %s289_s26 }
  0x16   : > { %2478 = dma.hbm_to_vmem [thread:$0]  (!%p3174_p6), %s264_s15, 30720, %s266_s19, [#allocation7], %s3078_s29, %s3078_s29, %s3079_s13  }
  0x17   : > { %2481 = dma.hbm_to_vmem [thread:$0]  (!%p3174_p6), %s279_s22, 240, %s281_s28, [#allocation7]  }
  0x18   : > { %s3082_s21 = smov 8   ;;  %s2431_s24 = sadd.s32 4294967294, %s3074_s12  }
  0x19   : > { %2484 = dma.hbm_to_vmem [thread:$0]  (!%p3174_p6), %s290_s26, 10240, %s292_s18, [#allocation10], %s3081_s20, %s3081_s20, %s3082_s21  }
  0x1a   : > { %s3189_s15 = sadd.s32 1, %s3074_s12   ;;  %s34_s19 = sadd.s32 1, %s3070_s11 }
  0x1b   : > { %s31_s25 = ssub.s32 %s3074_s12, %s3189_s15  ;;  %p41_p7 = scmp.ne.s32.totalorder %s3070_s11, %s3066_s10 }
  0x1c   : > { %p32_p8 = scmp.eq.s32.totalorder %s31_s25, 0  ;;  %p42_p9 = scmp.eq.s32.totalorder %s3074_s12, 0 }
  0x1d   : > { %p47_p10 = scmp.ne.s32.totalorder %s3066_s10, %s3062_s30  ;;  %p239_p11 = scmp.eq.s32.totalorder %s3157_s16, 1 }
  0x1e   : > { %s3201_s22 = scalar_select %p32_p8, %s3070_s11, %s34_s19  }
  0x1f   : > { %p3205_p12 = por %p48_p1, %p47_p10  ;;  %p3209_p13 = por %p239_p11, %p41_p7 }
  0x20   : > { %p245_p0 = scmp.eq.s32.totalorder %s2431_s24, 1  ;;  %p43_p2 = por %p42_p9, %p41_p7 }
  0x21   : > { %s320_s27 = sand.u32 1, %s3070_s11   ;;  %p2496_p6 = scmp.lt.s32.totalorder %s3074_s12, 2 }
  0x22   : > { %p3214_p4 = por %p245_p0, %p47_p10  ;;  %s2437_s29 = sshll.u32 %s320_s27, 3 }
  0x23   : > { %s2438_s13 = sshll.u32 %s3074_s12, 3  ;;  %s324_s19 = scalar_lea.vmem [#allocation3], %s2437_s29 }
  0x24   : > { %s328_s20 = scalar_lea.hbm %s3686_s0, %s2438_s13  ;;  %s332_s25 = sshll.u32 %s324_s19, 4  ;;  %s333_s25 = int_to_ptr.vmem [resolvable:$true] %s332_s25 }
  0x25   : > { %s330_s21 = sshll.u32 %s328_s20, 4  ;;  %p3223_p8 = pnand %p2496_p6, %p43_p2  ;;  %s331_s21 = int_to_ptr.hbm [resolvable:$true] %s330_s21 }
  0x26   : > { %s321_s1 = scalar_lea.sflag [#allocation4], %s320_s27  ;;  %s2970_s2 = sshra.s32 %s331_s21, 4  ;;  %s2971_s2 = int_to_ptr.hbm [resolvable:$true] %s2970_s2 }
  0x27   : > { %s2972_s3 = scalar_lea.hbm %s2971_s2, 8  ;;  %p2974_p9 = pneg %p3223_p8 }
  0x28   : > { %p2973_p7 = scmp.ne.s32.totalorder %s2971_s2, %s2972_s3  ;;  %s2977_s29 = scalar_lea.hbm %s3686_s0, 16 }
  0x29   : > { %p2978_p0 = scmp.lt.s32.totalorder %s2971_s2, %s3686_s0  ;;  %p2979_p2 = scmp.lt.s32.totalorder %s2977_s29, %s2972_s3 }
  0x2a   : > { %p2975_p10 = pnand %p2974_p9, %p2973_p7 }
  0x2b   : > { %p2980_p6 = por %p2979_p2, %p2978_p0 }
  0x2c   : > { %p2976_p11 = pneg %p2975_p10 }
  0x2e   : > { %p2981_p5 = pnand %p2980_p6, %p2976_p11 }
  0x30   : > { %2984 = shalt.err (!%p2981_p5)
}
  0x31   : > { %2488 = dma.hbm_to_vmem [thread:$0]  (!%p3223_p8), %s331_s21, 128, %s333_s25, %s321_s1  }
  0x32   : > { %341 = sbr.rel (%p3162_p3) target bundleno = 3084 (0xc0c), region = 56  ;;  %s3240_s27 = sand.u32 (!%p3162_p3), 1, %s3066_s10  }
  0x33   : > { %s2440_s19 = sshll.u32 (!%p3162_p3), %s3240_s27, 3  ;;  %s344_s13 = scalar_lea.sflag (!%p3162_p3), [#allocation4], %s3240_s27 }
  0x34   : > { %s3246_s2 = scalar_lea.vmem (!%p3162_p3), [#allocation3], %s2440_s19 }
  0x37   : > { %3045 = dma.done.wait (%p3205_p12), %s344_s13, 128  }
  0x38   : > { %3047 = vsyncadd (%p3205_p12), %s344_s13, 4294967168 }
  0x39   : > { %3049 = dma.done.wait (%p48_p1), [#allocation7], 30960  }
  0x3a   : > { %3051 = vsyncadd (%p48_p1), [#allocation7], 4294936336 }
  0x3b   : > { %3053 = dma.done.wait (%p48_p1), [#allocation10], 10240  }
  0x3c   : > { %3055 = vsyncadd (%p48_p1), [#allocation10], 4294957056  ;;  %v624_v0 = vld [vmem:[#allocation6 + $0x708] sm:$0xff]  ;;  %v625_v1 = vld [vmem:[#allocation6 + $0x710] sm:$0xff]  ;;  %vm1077_vm0 = vcmask 64512   ;;  %s2456_s24 = sshll.u32 %s3157_s16, 3 }
  0x3d   : > { %v609_v2 = vld [vmem:[#allocation6 + $0x690] sm:$0xff]  ;;  %757 = vmatpush.msra.mxu0 %v624_v0  ;;  %777 = vmatpush.msra.mxu1 %v625_v1  ;;  %v610_v3 = vld [vmem:[#allocation6 + $0x698] sm:$0xff]  ;;  %v595_v5 = vld [vmem:[#allocation6 + $0x620] sm:$0xff]  ;;  %s2327_s13 = scalar_lea.hbm %s3695_s9, %s2456_s24  ;;  %s397_s16 = scalar_lea.vmem [#allocation11], %s2440_s19 }
  0x3e   : > { %v594_v4 = vld [vmem:[#allocation6 + $0x618] sm:$0xff]  ;;  %v579_v6 = vld [vmem:[#allocation6 + $0x5a0] sm:$0xff]  ;;  %v580_v7 = vld [vmem:[#allocation6 + $0x5a8] sm:$0xff]  ;;  %s2329_s3 = sshll.u32 %s397_s16, 4  ;;  %s2331_s17 = sshll.u32 %s2327_s13, 4  ;;  %s2330_s3 = int_to_ptr.vmem [resolvable:$true] %s2329_s3  ;;  %s2332_s17 = int_to_ptr.hbm [resolvable:$true] %s2331_s17 }
  0x3f   : > { %758 = vmatpush.msra.mxu0 %v609_v2  ;;  %778 = vmatpush.msra.mxu1 %v610_v3  ;;  %v564_v8 = vld [vmem:[#allocation6 + $0x528] sm:$0xff]  ;;  %v565_v9 = vld [vmem:[#allocation6 + $0x530] sm:$0xff]  ;;  %v550_v11 = vld [vmem:[#allocation6 + $0x4b8] sm:$0xff]  ;;  %s2317_s23 = scalar_lea.sflag [#allocation5], %s3240_s27  ;;  %s3014_s21 = sshra.s32 %s2332_s17, 4  ;;  %s3015_s21 = int_to_ptr.hbm [resolvable:$true] %s3014_s21 }
  0x40   : > { %v549_v10 = vld [vmem:[#allocation6 + $0x4b0] sm:$0xff]  ;;  %v534_v12 = vld [vmem:[#allocation6 + $0x438] sm:$0xff]  ;;  %v535_v13 = vld [vmem:[#allocation6 + $0x440] sm:$0xff]  ;;  %s3016_s25 = scalar_lea.hbm %s3015_s21, 8  ;;  %s3020_s29 = scalar_lea.hbm %s3695_s9, 16 }
  0x41   : > { %759 = vmatpush.msra.mxu0 %v594_v4  ;;  %779 = vmatpush.msra.mxu1 %v595_v5  ;;  %v519_v14 = vld [vmem:[#allocation6 + $0x3c0] sm:$0xff]  ;;  %v520_v15 = vld [vmem:[#allocation6 + $0x3c8] sm:$0xff]  ;;  %v505_v17 = vld [vmem:[#allocation6 + $0x350] sm:$0xff]  ;;  %p3017_p1 = scmp.ne.s32.totalorder %s3015_s21, %s3016_s25  ;;  %p3021_p12 = scmp.lt.s32.totalorder %s3015_s21, %s3695_s9 }
  0x42   : > { %v504_v16 = vld [vmem:[#allocation6 + $0x348] sm:$0xff]  ;;  %v489_v18 = vld [vmem:[#allocation6 + $0x2d0] sm:$0xff]  ;;  %v490_v19 = vld [vmem:[#allocation6 + $0x2d8] sm:$0xff]  ;;  %p3022_p8 = scmp.lt.s32.totalorder %s3020_s29, %s3016_s25 }
  0x43   : > { %760 = vmatpush.msra.mxu0 %v579_v6  ;;  %780 = vmatpush.msra.mxu1 %v580_v7  ;;  %v474_v20 = vld [vmem:[#allocation6 + $0x258] sm:$0xff]  ;;  %v475_v21 = vld [vmem:[#allocation6 + $0x260] sm:$0xff]  ;;  %v460_v23 = vld [vmem:[#allocation6 + $0x1e8] sm:$0xff]  ;;  %p3018_p3 = pnand %p3017_p1, %p3209_p13 }
  0x44   : > { %v459_v22 = vld [vmem:[#allocation6 + $0x1e0] sm:$0xff]  ;;  %v444_v24 = vld [vmem:[#allocation6 + $0x168] sm:$0xff]  ;;  %v445_v25 = vld [vmem:[#allocation6 + $0x170] sm:$0xff]  ;;  %p3023_p7 = por %p3022_p8, %p3021_p12 }
  0x45   : > { %761 = vmatpush.msra.mxu0 %v564_v8  ;;  %781 = vmatpush.msra.mxu1 %v565_v9  ;;  %v429_v26 = vld [vmem:[#allocation6 + $0xf0] sm:$0xff]  ;;  %v430_v27 = vld [vmem:[#allocation6 + $0xf8] sm:$0xff]  ;;  %v415_v29 = vld [vmem:[#allocation6 + $0x80] sm:$0xff]  ;;  %p3019_p5 = pneg %p3018_p3 }
  0x46   : > { %v414_v28 = vld [vmem:[#allocation6 + $0x78] sm:$0xff]  ;;  %v627_v30 = vld [vmem:[#allocation6 + $0x720] sm:$0xff]  ;;  %v400_v32 = vld [vmem:[#allocation6 + $0x8] sm:$0xff] }
  0x47   : > { %762 = vmatpush.msra.mxu0 %v549_v10  ;;  %782 = vmatpush.msra.mxu1 %v550_v11  ;;  %v399_v31 = vld [vmem:[#allocation6] sm:$0xff]  ;;  %v612_v33 = vld [vmem:[#allocation6 + $0x6a8] sm:$0xff]  ;;  %v629_v35 = vld [vmem:[#allocation6 + $0x730] sm:$0xff]  ;;  %p3024_p9 = pnand %p3023_p7, %p3019_p5 }
  0x48   : > { %817 = vmatpush.msra.mxu3 %v627_v30  ;;  %v628_v34 = vld [vmem:[#allocation6 + $0x728] sm:$0xff]  ;;  %v3261_v36 = vld [vmem:[%s3246_s2] sm:$0xff]  ;;  %v599_v41 = vld [vmem:[#allocation6 + $0x640] sm:$0xff] }
  0x49   : > { %763 = vmatpush.msra.mxu0 %v534_v12  ;;  %783 = vmatpush.msra.mxu1 %v535_v13  ;;  %v613_v37 = vld [vmem:[#allocation6 + $0x6b0] sm:$0xff]  ;;  %v614_v38 = vld [vmem:[#allocation6 + $0x6b8] sm:$0xff]  ;;  %v583_v43 = vld [vmem:[#allocation6 + $0x5c0] sm:$0xff] }
  0x4a   : > { %818 = vmatpush.msra.mxu3 %v612_v33  ;;  %v597_v39 = vld [vmem:[#allocation6 + $0x630] sm:$0xff]  ;;  %v598_v40 = vld [vmem:[#allocation6 + $0x638] sm:$0xff]  ;;  %v584_v44 = vld [vmem:[#allocation6 + $0x5c8] sm:$0xff] }
  0x4b   : > { %764 = vmatpush.msra.mxu0 %v519_v14  ;;  %784 = vmatpush.msra.mxu1 %v520_v15  ;;  %v582_v42 = vld [vmem:[#allocation6 + $0x5b8] sm:$0xff]  ;;  %v567_v45 = vld [vmem:[#allocation6 + $0x540] sm:$0xff]  ;;  %v568_v46 = vld [vmem:[#allocation6 + $0x548] sm:$0xff] }
  0x4c   : > { %819 = vmatpush.msra.mxu3 %v597_v39  ;;  %v569_v47 = vld [vmem:[#allocation6 + $0x550] sm:$0xff]  ;;  %v552_v48 = vld [vmem:[#allocation6 + $0x4c8] sm:$0xff]  ;;  %v554_v50 = vld [vmem:[#allocation6 + $0x4d8] sm:$0xff] }
  0x4d   : > { %765 = vmatpush.msra.mxu0 %v504_v16  ;;  %785 = vmatpush.msra.mxu1 %v505_v17  ;;  %v553_v49 = vld [vmem:[#allocation6 + $0x4d0] sm:$0xff]  ;;  %v538_v52 = vld [vmem:[#allocation6 + $0x458] sm:$0xff]  ;;  %v539_v53 = vld [vmem:[#allocation6 + $0x460] sm:$0xff] }
  0x4e   : > { %820 = vmatpush.msra.mxu3 %v582_v42  ;;  %v537_v51 = vld [vmem:[#allocation6 + $0x450] sm:$0xff]  ;;  %v522_v54 = vld [vmem:[#allocation6 + $0x3d8] sm:$0xff]  ;;  %v523_v55 = vld [vmem:[#allocation6 + $0x3e0] sm:$0xff] }
  0x4f   : > { %766 = vmatpush.msra.mxu0 %v489_v18  ;;  %786 = vmatpush.msra.mxu1 %v490_v19  ;;  %v524_v56 = vld [vmem:[#allocation6 + $0x3e8] sm:$0xff]  ;;  %v507_v57 = vld [vmem:[#allocation6 + $0x360] sm:$0xff]  ;;  %v509_v59 = vld [vmem:[#allocation6 + $0x370] sm:$0xff] }
  0x50   : > { %821 = vmatpush.msra.mxu3 %v567_v45  ;;  %v508_v58 = vld [vmem:[#allocation6 + $0x368] sm:$0xff]  ;;  %v493_v61 = vld [vmem:[#allocation6 + $0x2f0] sm:$0xff]  ;;  %v494_v62 = vld [vmem:[#allocation6 + $0x2f8] sm:$0xff] }
  0x51   : > { %767 = vmatpush.msra.mxu0 %v474_v20  ;;  %787 = vmatpush.msra.mxu1 %v475_v21  ;;  %v492_v60 = vld [vmem:[#allocation6 + $0x2e8] sm:$0xff]  ;;  %v477_v63 = vld [vmem:[#allocation6 + $0x270] sm:$0xff]  ;;  %v478_v0 = vld [vmem:[#allocation6 + $0x278] sm:$0xff] }
  0x52   : > { %822 = vmatpush.msra.mxu3 %v552_v48  ;;  %v479_v1 = vld [vmem:[#allocation6 + $0x280] sm:$0xff]  ;;  %v462_v2 = vld [vmem:[#allocation6 + $0x1f8] sm:$0xff]  ;;  %v464_v4 = vld [vmem:[#allocation6 + $0x208] sm:$0xff] }
  0x53   : > { %768 = vmatpush.msra.mxu0 %v459_v22  ;;  %788 = vmatpush.msra.mxu1 %v460_v23  ;;  %v463_v3 = vld [vmem:[#allocation6 + $0x200] sm:$0xff]  ;;  %v448_v6 = vld [vmem:[#allocation6 + $0x188] sm:$0xff]  ;;  %v449_v7 = vld [vmem:[#allocation6 + $0x190] sm:$0xff] }
  0x54   : > { %823 = vmatpush.msra.mxu3 %v537_v51  ;;  %v447_v5 = vld [vmem:[#allocation6 + $0x180] sm:$0xff]  ;;  %v432_v8 = vld [vmem:[#allocation6 + $0x108] sm:$0xff]  ;;  %v433_v9 = vld [vmem:[#allocation6 + $0x110] sm:$0xff] }
  0x55   : > { %769 = vmatpush.msra.mxu0 %v444_v24  ;;  %789 = vmatpush.msra.mxu1 %v445_v25  ;;  %v434_v10 = vld [vmem:[#allocation6 + $0x118] sm:$0xff]  ;;  %v417_v11 = vld [vmem:[#allocation6 + $0x90] sm:$0xff]  ;;  %v419_v13 = vld [vmem:[#allocation6 + $0xa0] sm:$0xff] }
  0x56   : > { %824 = vmatpush.msra.mxu3 %v522_v54  ;;  %v418_v12 = vld [vmem:[#allocation6 + $0x98] sm:$0xff]  ;;  %v403_v15 = vld [vmem:[#allocation6 + $0x20] sm:$0xff]  ;;  %v404_v16 = vld [vmem:[#allocation6 + $0x28] sm:$0xff] }
  0x57   : > { %770 = vmatpush.msra.mxu0 %v429_v26  ;;  %790 = vmatpush.msra.mxu1 %v430_v27  ;;  %v402_v14 = vld [vmem:[#allocation6 + $0x18] sm:$0xff]  ;;  %v632_v18 = vld [vmem:[#allocation6 + $0x748] sm:$0xff]  ;;  %v617_v19 = vld [vmem:[#allocation6 + $0x6d0] sm:$0xff] }
  0x58   : > { %825 = vmatpush.msra.mxu3 %v507_v57  ;;  %v626_v17 = vld [vmem:[#allocation6 + $0x718] sm:$0xff]  ;;  %v611_v20 = vld [vmem:[#allocation6 + $0x6a0] sm:$0xff]  ;;  %v596_v22 = vld [vmem:[#allocation6 + $0x628] sm:$0xff] }
  0x59   : > { %771 = vmatpush.msra.mxu0 %v414_v28  ;;  %791 = vmatpush.msra.mxu1 %v415_v29  ;;  %v602_v21 = vld [vmem:[#allocation6 + $0x658] sm:$0xff]  ;;  %v587_v23 = vld [vmem:[#allocation6 + $0x5e0] sm:$0xff]  ;;  %v581_v24 = vld [vmem:[#allocation6 + $0x5b0] sm:$0xff] }
  0x5a   : > { %826 = vmatpush.msra.mxu3 %v492_v60  ;;  %797 = vmatpush.msra.mxu2 %v626_v17  ;;  %v631_v25 = vld [vmem:[#allocation6 + $0x740] sm:$0xff]  ;;  %v572_v26 = vld [vmem:[#allocation6 + $0x568] sm:$0xff]  ;;  %v566_v27 = vld [vmem:[#allocation6 + $0x538] sm:$0xff] }
  0x5b   : > { %772 = vmatpush.msra.mxu0 %v399_v31  ;;  %792 = vmatpush.msra.mxu1 %v400_v32  ;;  %v616_v28 = vld [vmem:[#allocation6 + $0x6c8] sm:$0xff]  ;;  %v601_v29 = vld [vmem:[#allocation6 + $0x650] sm:$0xff]  ;;  %v551_v31 = vld [vmem:[#allocation6 + $0x4c0] sm:$0xff] }
  0x5c   : > { %793 = vmatmul.f32.vlgmr.msra.gmra.mxu1 %v3261_v36  ;;  %773 = vmatmul.f32.vlgmr.msra.gmra.mxu0 %v3261_v36  ;;  %v557_v30 = vld [vmem:[#allocation6 + $0x4f0] sm:$0xff]  ;;  %v586_v32 = vld [vmem:[#allocation6 + $0x5d8] sm:$0xff]  ;;  %v556_v39 = vld [vmem:[#allocation6 + $0x4e8] sm:$0xff] }
  0x5d   : > { %837 = vmatpush.msrb.mxu0 %v628_v34  ;;  %857 = vmatpush.msrb.mxu1 %v629_v35  ;;  %v542_v33 = vld [vmem:[#allocation6 + $0x478] sm:$0xff]  ;;  %v536_v34 = vld [vmem:[#allocation6 + $0x448] sm:$0xff]  ;;  %v571_v35 = vld [vmem:[#allocation6 + $0x560] sm:$0xff] }
  0x5e   : > { %827 = vmatpush.msra.mxu3 %v477_v63  ;;  %798 = vmatpush.msra.mxu2 %v611_v20  ;;  %v541_v42 = vld [vmem:[#allocation6 + $0x470] sm:$0xff]  ;;  %v526_v45 = vld [vmem:[#allocation6 + $0x3f8] sm:$0xff]  ;;  %v511_v48 = vld [vmem:[#allocation6 + $0x380] sm:$0xff] }
  0x5f   : > { %838 = vmatpush.msrb.mxu0 %v613_v37  ;;  %858 = vmatpush.msrb.mxu1 %v614_v38  ;;  %v527_v37 = vld [vmem:[#allocation6 + $0x400] sm:$0xff]  ;;  %v521_v38 = vld [vmem:[#allocation6 + $0x3d0] sm:$0xff]  ;;  %v496_v51 = vld [vmem:[#allocation6 + $0x308] sm:$0xff] }
  0x60   : > { %828 = vmatpush.msra.mxu3 %v462_v2  ;;  %799 = vmatpush.msra.mxu2 %v596_v22  ;;  %v481_v54 = vld [vmem:[#allocation6 + $0x290] sm:$0xff]  ;;  %v466_v57 = vld [vmem:[#allocation6 + $0x218] sm:$0xff]  ;;  %v451_v60 = vld [vmem:[#allocation6 + $0x1a0] sm:$0xff] }
  0x61   : > { %839 = vmatpush.msrb.mxu0 %v598_v40  ;;  %859 = vmatpush.msrb.mxu1 %v599_v41  ;;  %v512_v40 = vld [vmem:[#allocation6 + $0x388] sm:$0xff]  ;;  %v506_v41 = vld [vmem:[#allocation6 + $0x358] sm:$0xff]  ;;  %v421_v2 = vld [vmem:[#allocation6 + $0xb0] sm:$0xff] }
  0x62   : > { %829 = vmatpush.msra.mxu3 %v447_v5  ;;  %800 = vmatpush.msra.mxu2 %v581_v24  ;;  %v630_v63 = vld [vmem:[#allocation6 + $0x738] sm:$0xff]  ;;  %v585_v5 = vld [vmem:[#allocation6 + $0x5d0] sm:$0xff]  ;;  %v495_v17 = vld [vmem:[#allocation6 + $0x300] sm:$0xff] }
  0x63   : > { %840 = vmatpush.msrb.mxu0 %v583_v43  ;;  %860 = vmatpush.msrb.mxu1 %v584_v44  ;;  %v497_v43 = vld [vmem:[#allocation6 + $0x310] sm:$0xff]  ;;  %v491_v44 = vld [vmem:[#allocation6 + $0x2e0] sm:$0xff]  ;;  %v530_v20 = vld [vmem:[#allocation6 + $0x418] sm:$0xff] }
  0x64   : > { %830 = vmatpush.msra.mxu3 %v432_v8  ;;  %801 = vmatpush.msra.mxu2 %v566_v27  ;;  %v620_v8 = vld [vmem:[#allocation6 + $0x6e8] sm:$0xff]  ;;  %v515_v22 = vld [vmem:[#allocation6 + $0x3a0] sm:$0xff] }
  0x65   : > { %841 = vmatpush.msrb.mxu0 %v568_v46  ;;  %861 = vmatpush.msrb.mxu1 %v569_v47  ;;  %v482_v46 = vld [vmem:[#allocation6 + $0x298] sm:$0xff]  ;;  %v476_v47 = vld [vmem:[#allocation6 + $0x268] sm:$0xff] }
  0x66   : > { %831 = vmatpush.msra.mxu3 %v417_v11  ;;  %802 = vmatpush.msra.mxu2 %v551_v31  ;;  %v540_v11 = vld [vmem:[#allocation6 + $0x468] sm:$0xff]  ;;  %v634_v31 = vld [vmem:[#allocation6 + $0x758] sm:$0xff] }
  0x67   : > { %842 = vmatpush.msrb.mxu0 %v553_v49  ;;  %862 = vmatpush.msrb.mxu1 %v554_v50  ;;  %v467_v49 = vld [vmem:[#allocation6 + $0x220] sm:$0xff]  ;;  %v461_v50 = vld [vmem:[#allocation6 + $0x1f0] sm:$0xff]  ;;  %v500_v24 = vld [vmem:[#allocation6 + $0x328] sm:$0xff] }
  0x68   : > { %832 = vmatpush.msra.mxu3 %v402_v14  ;;  %803 = vmatpush.msra.mxu2 %v536_v34  ;;  %v575_v14 = vld [vmem:[#allocation6 + $0x580] sm:$0xff]  ;;  %v420_v27 = vld [vmem:[#allocation6 + $0xa8] sm:$0xff] }
  0x69   : > { %843 = vmatpush.msrb.mxu0 %v538_v52  ;;  %863 = vmatpush.msrb.mxu1 %v539_v53  ;;  %v452_v52 = vld [vmem:[#allocation6 + $0x1a8] sm:$0xff]  ;;  %v446_v53 = vld [vmem:[#allocation6 + $0x178] sm:$0xff] }
  0x6a   : > { %833 = vmatmul.f32.vlgmr.msra.gmra.mxu3 %v3261_v36  ;;  %804 = vmatpush.msra.mxu2 %v521_v38  ;;  %v440_v34 = vld [vmem:[#allocation6 + $0x148] sm:$0xff]  ;;  %v425_v38 = vld [vmem:[#allocation6 + $0xd0] sm:$0xff] }
  0x6b   : > { %844 = vmatpush.msrb.mxu0 %v523_v55  ;;  %864 = vmatpush.msrb.mxu1 %v524_v56  ;;  %v437_v55 = vld [vmem:[#allocation6 + $0x130] sm:$0xff]  ;;  %v431_v56 = vld [vmem:[#allocation6 + $0x100] sm:$0xff] }
  0x6c   : > { %897 = vmatpush.msrb.mxu3 %v631_v25  ;;  %805 = vmatpush.msra.mxu2 %v506_v41  ;;  %v435_v25 = vld [vmem:[#allocation6 + $0x120] sm:$0xff]  ;;  %v574_v41 = vld [vmem:[#allocation6 + $0x578] sm:$0xff] }
  0x6d   : > { %845 = vmatpush.msrb.mxu0 %v508_v58  ;;  %865 = vmatpush.msrb.mxu1 %v509_v59  ;;  %v422_v58 = vld [vmem:[#allocation6 + $0xb8] sm:$0xff]  ;;  %v416_v59 = vld [vmem:[#allocation6 + $0x88] sm:$0xff] }
  0x6e   : > { %898 = vmatpush.msrb.mxu3 %v616_v28  ;;  %806 = vmatpush.msra.mxu2 %v491_v44  ;;  %v470_v28 = vld [vmem:[#allocation6 + $0x238] sm:$0xff]  ;;  %v544_v44 = vld [vmem:[#allocation6 + $0x488] sm:$0xff] }
  0x6f   : > { %846 = vmatpush.msrb.mxu0 %v493_v61  ;;  %866 = vmatpush.msrb.mxu1 %v494_v62  ;;  %v407_v61 = vld [vmem:[#allocation6 + $0x40] sm:$0xff]  ;;  %v401_v62 = vld [vmem:[#allocation6 + $0x10] sm:$0xff] }
  0x70   : > { %899 = vmatpush.msrb.mxu3 %v601_v29  ;;  %807 = vmatpush.msra.mxu2 %v476_v47  ;;  %v405_v29 = vld [vmem:[#allocation6 + $0x30] sm:$0xff]  ;;  %v499_v47 = vld [vmem:[#allocation6 + $0x320] sm:$0xff] }
  0x71   : > { %847 = vmatpush.msrb.mxu0 %v478_v0  ;;  %867 = vmatpush.msrb.mxu1 %v479_v1  ;;  %v436_v0 = vld [vmem:[#allocation6 + $0x128] sm:$0xff]  ;;  %v615_v1 = vld [vmem:[#allocation6 + $0x6c0] sm:$0xff] }
  0x72   : > { %900 = vmatpush.msrb.mxu3 %v586_v32  ;;  %808 = vmatpush.msra.mxu2 %v461_v50  ;;  %v619_v32 = vld [vmem:[#allocation6 + $0x6e0] sm:$0xff]  ;;  %v454_v50 = vld [vmem:[#allocation6 + $0x1b8] sm:$0xff] }
  0x73   : > { %848 = vmatpush.msrb.mxu0 %v463_v3  ;;  %868 = vmatpush.msrb.mxu1 %v464_v4  ;;  %v600_v3 = vld [vmem:[#allocation6 + $0x648] sm:$0xff]  ;;  %v406_v4 = vld [vmem:[#allocation6 + $0x38] sm:$0xff] }
  0x74   : > { %901 = vmatpush.msrb.mxu3 %v571_v35  ;;  %809 = vmatpush.msra.mxu2 %v446_v53  ;;  %v633_v35 = vld [vmem:[#allocation6 + $0x750] sm:$0xff] }
  0x75   : > { %849 = vmatpush.msrb.mxu0 %v448_v6  ;;  %869 = vmatpush.msrb.mxu1 %v449_v7  ;;  %v635_v6 = vld [vmem:[#allocation6 + $0x760] sm:$0xff]  ;;  %v570_v7 = vld [vmem:[#allocation6 + $0x558] sm:$0xff]  ;;  %v409_v53 = vld [vmem:[#allocation6 + $0x50] sm:$0xff] }
  0x76   : > { %902 = vmatpush.msrb.mxu3 %v556_v39  ;;  %810 = vmatpush.msra.mxu2 %v431_v56  ;;  %v618_v39 = vld [vmem:[#allocation6 + $0x6d8] sm:$0xff]  ;;  %v588_v56 = vld [vmem:[#allocation6 + $0x5e8] sm:$0xff] }
  0x77   : > { %850 = vmatpush.msrb.mxu0 %v433_v9  ;;  %870 = vmatpush.msrb.mxu1 %v434_v10  ;;  %v555_v9 = vld [vmem:[#allocation6 + $0x4e0] sm:$0xff]  ;;  %v605_v10 = vld [vmem:[#allocation6 + $0x670] sm:$0xff] }
  0x78   : > { %903 = vmatpush.msrb.mxu3 %v541_v42  ;;  %811 = vmatpush.msra.mxu2 %v416_v59  ;;  %v603_v42 = vld [vmem:[#allocation6 + $0x660] sm:$0xff]  ;;  %v593_v59 = vld [vmem:[#allocation6 + $0x610] sm:$0xff] }
  0x79   : > { %851 = vmatpush.msrb.mxu0 %v418_v12  ;;  %871 = vmatpush.msrb.mxu1 %v419_v13  ;;  %v590_v12 = vld [vmem:[#allocation6 + $0x5f8] sm:$0xff]  ;;  %v525_v13 = vld [vmem:[#allocation6 + $0x3f0] sm:$0xff] }
  0x7a   : > { %904 = vmatpush.msrb.mxu3 %v526_v45  ;;  %812 = vmatpush.msra.mxu2 %v401_v62  ;;  %v529_v45 = vld [vmem:[#allocation6 + $0x410] sm:$0xff]  ;;  %v543_v62 = vld [vmem:[#allocation6 + $0x480] sm:$0xff] }
  0x7b   : > { %852 = vmatpush.msrb.mxu0 %v403_v15  ;;  %872 = vmatpush.msrb.mxu1 %v404_v16  ;;  %v510_v15 = vld [vmem:[#allocation6 + $0x378] sm:$0xff]  ;;  %v560_v16 = vld [vmem:[#allocation6 + $0x508] sm:$0xff] }
  0x7c   : > { %873 = vmatmul.f32.vlgmr.msrb.gmra.mxu1 %v3261_v36  ;;  %853 = vmatmul.f32.vlgmr.msrb.gmra.mxu0 %v3261_v36 }
  0x7d   : > { %917 = vmatpush.msra.mxu0 %v632_v18  ;;  %905 = vmatpush.msrb.mxu3 %v511_v48  ;;  %v545_v18 = vld [vmem:[#allocation6 + $0x490] sm:$0xff]  ;;  %v484_v48 = vld [vmem:[#allocation6 + $0x2a8] sm:$0xff] }
  0x7e   : > { %877 = vmatpush.msrb.mxu2 %v630_v63  ;;  %937 = vmatpush.msra.mxu1 %v633_v35  ;;  %v528_v63 = vld [vmem:[#allocation6 + $0x408] sm:$0xff]  ;;  %v517_v35 = vld [vmem:[#allocation6 + $0x3b0] sm:$0xff] }
  0x7f   : > { %918 = vmatpush.msra.mxu0 %v617_v19  ;;  %906 = vmatpush.msrb.mxu3 %v496_v51  ;;  %v480_v19 = vld [vmem:[#allocation6 + $0x288] sm:$0xff]  ;;  %v439_v51 = vld [vmem:[#allocation6 + $0x140] sm:$0xff] }
  0x80   : > { %813 = vmatmul.f32.vlgmr.msra.gmra.mxu2 %v3261_v36  ;;  %938 = vmatpush.msra.mxu1 %v618_v39  ;;  %v487_v39 = vld [vmem:[#allocation6 + $0x2c0] sm:$0xff] }
  0x81   : > { %919 = vmatpush.msra.mxu0 %v602_v21  ;;  %907 = vmatpush.msrb.mxu3 %v481_v54  ;;  %v465_v21 = vld [vmem:[#allocation6 + $0x210] sm:$0xff]  ;;  %v638_v54 = vld [vmem:[#allocation6 + $0x778] sm:$0xff] }
  0x82   : > { %878 = vmatpush.msrb.mxu2 %v615_v1  ;;  %939 = vmatpush.msra.mxu1 %v603_v42  ;;  %v513_v1 = vld [vmem:[#allocation6 + $0x390] sm:$0xff] }
  0x83   : > { %920 = vmatpush.msra.mxu0 %v587_v23  ;;  %908 = vmatpush.msrb.mxu3 %v466_v57  ;;  %v450_v23 = vld [vmem:[#allocation6 + $0x198] sm:$0xff]  ;;  %v608_v57 = vld [vmem:[#allocation6 + $0x688] sm:$0xff]  ;;  %v457_v42 = vld [vmem:[#allocation6 + $0x1d0] sm:$0xff] }
  0x84   : > { %879 = vmatpush.msrb.mxu2 %v600_v3  ;;  %940 = vmatpush.msra.mxu1 %v588_v56  ;;  %v498_v3 = vld [vmem:[#allocation6 + $0x318] sm:$0xff] }
  0x85   : > { %921 = vmatpush.msra.mxu0 %v572_v26  ;;  %909 = vmatpush.msrb.mxu3 %v451_v60  ;;  %v485_v26 = vld [vmem:[#allocation6 + $0x2b0] sm:$0xff]  ;;  %v558_v60 = vld [vmem:[#allocation6 + $0x4f8] sm:$0xff] }
  0x86   : > { %880 = vmatpush.msrb.mxu2 %v585_v5  ;;  %v483_v5 = vld [vmem:[#allocation6 + $0x2a0] sm:$0xff] }
  0x87   : > { %922 = vmatpush.msra.mxu0 %v557_v30  ;;  %910 = vmatpush.msrb.mxu3 %v436_v0  ;;  %v455_v30 = vld [vmem:[#allocation6 + $0x1c0] sm:$0xff] }
  0x88   : > { %881 = vmatpush.msrb.mxu2 %v570_v7  ;;  %v563_v0 = vld [vmem:[#allocation6 + $0x520] sm:$0xff]  ;;  %v468_v7 = vld [vmem:[#allocation6 + $0x228] sm:$0xff] }
  0x89   : > { %923 = vmatpush.msra.mxu0 %v542_v33  ;;  %911 = vmatpush.msrb.mxu3 %v421_v2  ;;  %v604_v33 = vld [vmem:[#allocation6 + $0x668] sm:$0xff] }
  0x8a   : > { %882 = vmatpush.msrb.mxu2 %v555_v9  ;;  %v548_v2 = vld [vmem:[#allocation6 + $0x4a8] sm:$0xff]  ;;  %v453_v9 = vld [vmem:[#allocation6 + $0x1b0] sm:$0xff] }
  0x8b   : > { %924 = vmatpush.msra.mxu0 %v527_v37  ;;  %912 = vmatpush.msrb.mxu3 %v406_v4  ;;  %v589_v37 = vld [vmem:[#allocation6 + $0x5f0] sm:$0xff] }
  0x8c   : > { %913 = vmatmul.f32.vlgmr.msrb.gmra.mxu3 %v3261_v36  ;;  %883 = vmatpush.msrb.mxu2 %v540_v11  ;;  %v533_v4 = vld [vmem:[#allocation6 + $0x430] sm:$0xff]  ;;  %v438_v11 = vld [vmem:[#allocation6 + $0x138] sm:$0xff] }
  0x8d   : > { %925 = vmatpush.msra.mxu0 %v512_v40  ;;  %977 = vmatpush.msra.mxu3 %v635_v6  ;;  %v410_v40 = vld [vmem:[#allocation6 + $0x58] sm:$0xff] }
  0x8e   : > { %884 = vmatpush.msrb.mxu2 %v525_v13  ;;  %v518_v6 = vld [vmem:[#allocation6 + $0x3b8] sm:$0xff]  ;;  %v423_v13 = vld [vmem:[#allocation6 + $0xc0] sm:$0xff] }
  0x8f   : > { %926 = vmatpush.msra.mxu0 %v497_v43  ;;  %978 = vmatpush.msra.mxu3 %v620_v8  ;;  %v559_v43 = vld [vmem:[#allocation6 + $0x500] sm:$0xff] }
  0x90   : > { %885 = vmatpush.msrb.mxu2 %v510_v15  ;;  %v503_v8 = vld [vmem:[#allocation6 + $0x340] sm:$0xff] }
  0x91   : > { %927 = vmatpush.msra.mxu0 %v482_v46  ;;  %979 = vmatpush.msra.mxu3 %v605_v10  ;;  %v514_v46 = vld [vmem:[#allocation6 + $0x398] sm:$0xff]  ;;  %v488_v10 = vld [vmem:[#allocation6 + $0x2c8] sm:$0xff] }
  0x92   : > { %886 = vmatpush.msrb.mxu2 %v495_v17  ;;  %v443_v17 = vld [vmem:[#allocation6 + $0x160] sm:$0xff] }
  0x93   : > { %928 = vmatpush.msra.mxu0 %v467_v49  ;;  %980 = vmatpush.msra.mxu3 %v590_v12  ;;  %v469_v49 = vld [vmem:[#allocation6 + $0x230] sm:$0xff] }
  0x94   : > { %887 = vmatpush.msrb.mxu2 %v480_v19  ;;  %v473_v12 = vld [vmem:[#allocation6 + $0x250] sm:$0xff] }
  0x95   : > { %929 = vmatpush.msra.mxu0 %v452_v52  ;;  %981 = vmatpush.msra.mxu3 %v575_v14  ;;  %v424_v52 = vld [vmem:[#allocation6 + $0xc8] sm:$0xff]  ;;  %v458_v14 = vld [vmem:[#allocation6 + $0x1d8] sm:$0xff]  ;;  %v413_v19 = vld [vmem:[#allocation6 + $0x70] sm:$0xff] }
  0x96   : > { %888 = vmatpush.msrb.mxu2 %v465_v21 }
  0x97   : > { %930 = vmatpush.msra.mxu0 %v437_v55  ;;  %982 = vmatpush.msra.mxu3 %v560_v16  ;;  %v623_v55 = vld [vmem:[#allocation6 + $0x700] sm:$0xff]  ;;  %v408_v16 = vld [vmem:[#allocation6 + $0x48] sm:$0xff] }
  0x98   : > { %889 = vmatpush.msrb.mxu2 %v450_v23 }
  0x99   : > { %931 = vmatpush.msra.mxu0 %v422_v58  ;;  %983 = vmatpush.msra.mxu3 %v545_v18  ;;  %v573_v58 = vld [vmem:[#allocation6 + $0x570] sm:$0xff]  ;;  %v428_v18 = vld [vmem:[#allocation6 + $0xe8] sm:$0xff] }
  0x9a   : > { %890 = vmatpush.msrb.mxu2 %v435_v25  ;;  %941 = vmatpush.msra.mxu1 %v573_v58 }
  0x9b   : > { %932 = vmatpush.msra.mxu0 %v407_v61  ;;  %984 = vmatpush.msra.mxu3 %v530_v20  ;;  %v578_v61 = vld [vmem:[#allocation6 + $0x598] sm:$0xff]  ;;  %v3277_v20 = vld [vmem:[#allocation8] sm:$0xff] }
  0x9c   : > { %933 = vmatmul.f32.vlgmr.msra.gmra.mxu0 %v3261_v36  ;;  %891 = vmatpush.msrb.mxu2 %v420_v27  ;;  %v732_v21 = vperm.slane %v3277_v20, 5  ;;  %v637_v27 = vld [vmem:[#allocation6 + $0x770] sm:$0xff] }
  0x9d   : > { %985 = vmatpush.msra.mxu3 %v515_v22  ;;  %942 = vmatpush.msra.mxu1 %v558_v60  ;;  %v727_v22 = vperm.slane %v3277_v20, 0 }
  0x9e   : > { %892 = vmatpush.msrb.mxu2 %v405_v29  ;;  %v607_v29 = vld [vmem:[#allocation6 + $0x680] sm:$0xff] }
  0x9f   : > { %986 = vmatpush.msra.mxu3 %v500_v24  ;;  %893 = vmatmul.f32.vlgmr.msrb.gmra.mxu2 %v3261_v36 }
  0xa0   : > { %957 = vmatpush.msra.mxu2 %v634_v31  ;;  %943 = vmatpush.msra.mxu1 %v543_v62  ;;  %v577_v31 = vld [vmem:[#allocation6 + $0x590] sm:$0xff] }
  0xa1   : > { %987 = vmatpush.msra.mxu3 %v485_v26 }
  0xa2   : > { %958 = vmatpush.msra.mxu2 %v619_v32  ;;  %944 = vmatpush.msra.mxu1 %v528_v63  ;;  %v562_v32 = vld [vmem:[#allocation6 + $0x518] sm:$0xff] }
  0xa3   : > { %988 = vmatpush.msra.mxu3 %v470_v28  ;;  %v622_v28 = vld [vmem:[#allocation6 + $0x6f8] sm:$0xff] }
  0xa4   : > { %959 = vmatpush.msra.mxu2 %v604_v33  ;;  %945 = vmatpush.msra.mxu1 %v513_v1  ;;  %v547_v33 = vld [vmem:[#allocation6 + $0x4a0] sm:$0xff]  ;;  %v731_v1 = vperm.slane %v3277_v20, 4 }
  0xa5   : > { %989 = vmatpush.msra.mxu3 %v455_v30  ;;  %v592_v30 = vld [vmem:[#allocation6 + $0x608] sm:$0xff] }
  0xa6   : > { %960 = vmatpush.msra.mxu2 %v589_v37  ;;  %946 = vmatpush.msra.mxu1 %v498_v3 }
  0xa7   : > { %990 = vmatpush.msra.mxu3 %v440_v34  ;;  %v532_v34 = vld [vmem:[#allocation6 + $0x428] sm:$0xff] }
  0xa8   : > { %961 = vmatpush.msra.mxu2 %v574_v41  ;;  %947 = vmatpush.msra.mxu1 %v483_v5  ;;  %v472_v41 = vld [vmem:[#allocation6 + $0x248] sm:$0xff] }
  0xa9   : > { %991 = vmatpush.msra.mxu3 %v425_v38  ;;  %v502_v38 = vld [vmem:[#allocation6 + $0x338] sm:$0xff] }
  0xaa   : > { %962 = vmatpush.msra.mxu2 %v559_v43  ;;  %948 = vmatpush.msra.mxu1 %v468_v7 }
  0xab   : > { %992 = vmatpush.msra.mxu3 %v410_v40  ;;  %v3286_v40 = vld [vmem:[#allocation8 + $0x8] sm:$0xff] }
  0xac   : > { %993 = vmatmul.f32.vlgmr.msra.gmra.mxu3 %v3261_v36  ;;  %963 = vmatpush.msra.mxu2 %v544_v44  ;;  %v735_v43 = vperm.slane %v3286_v40, 0  ;;  %v730_v44 = vperm.slane %v3277_v20, 3  ;;  %v737_v60 = vperm.slane %v3286_v40, 2  ;;  %v736_v63 = vperm.slane %v3286_v40, 1 }
  0xad   : > { %949 = vmatpush.msra.mxu1 %v453_v9 }
  0xae   : > { %964 = vmatpush.msra.mxu2 %v529_v45  ;;  %v442_v45 = vld [vmem:[#allocation6 + $0x158] sm:$0xff] }
  0xaf   : > { %950 = vmatpush.msra.mxu1 %v438_v11 }
  0xb0   : > { %965 = vmatpush.msra.mxu2 %v514_v46 }
  0xb1   : > { %951 = vmatpush.msra.mxu1 %v423_v13 }
  0xb2   : > { %966 = vmatpush.msra.mxu2 %v499_v47 }
  0xb3   : > { %952 = vmatpush.msra.mxu1 %v408_v16 }
  0xb4   : > { %967 = vmatpush.msra.mxu2 %v484_v48  ;;  %953 = vmatmul.f32.vlgmr.msra.gmra.mxu1 %v3261_v36  ;;  %v427_v48 = vld [vmem:[#allocation6 + $0xe0] sm:$0xff] }
  0xb5   : > { %1017 = vmatpush.msrb.mxu1 %v637_v27  ;;  %v636_v27 = vld [vmem:[#allocation6 + $0x768] sm:$0xff] }
  0xb6   : > { %968 = vmatpush.msra.mxu2 %v469_v49  ;;  %997 = vmatpush.msrb.mxu0 %v636_v27  ;;  %v643_v27 = vld [vmem:[#allocation9 + $0x10] sm:$0xff] }
  0xb7   : > { %1018 = vmatpush.msrb.mxu1 %v622_v28  ;;  %v621_v28 = vld [vmem:[#allocation6 + $0x6f0] sm:$0xff] }
  0xb8   : > { %969 = vmatpush.msra.mxu2 %v454_v50  ;;  %998 = vmatpush.msrb.mxu0 %v621_v28  ;;  %v642_v28 = vld [vmem:[#allocation9 + $0x8] sm:$0xff] }
  0xb9   : > { %1019 = vmatpush.msrb.mxu1 %v607_v29  ;;  %v606_v29 = vld [vmem:[#allocation6 + $0x678] sm:$0xff] }
  0xba   : > { %970 = vmatpush.msra.mxu2 %v439_v51  ;;  %v412_v51 = vld [vmem:[#allocation6 + $0x68] sm:$0xff]  ;;  %999 = vmatpush.msrb.mxu0 %v606_v29  ;;  %v3696_v29 = vperm.slane %v3286_v40, 6 }
  0xbb   : > { %1020 = vmatpush.msrb.mxu1 %v592_v30  ;;  %v591_v30 = vld [vmem:[#allocation6 + $0x600] sm:$0xff] }
  0xbc   : > { %971 = vmatpush.msra.mxu2 %v424_v52  ;;  %v734_v52 = vperm.slane %v3277_v20, 7  ;;  %1000 = vmatpush.msrb.mxu0 %v591_v30  ;;  %v739_v30 = vperm.slane %v3286_v40, 4 }
  0xbd   : > { %1021 = vmatpush.msrb.mxu1 %v577_v31  ;;  %v576_v31 = vld [vmem:[#allocation6 + $0x588] sm:$0xff] }
  0xbe   : > { %972 = vmatpush.msra.mxu2 %v409_v53  ;;  %1001 = vmatpush.msrb.mxu0 %v576_v31 }
  0xbf   : > { %973 = vmatmul.f32.vlgmr.msra.gmra.mxu2 %v3261_v36  ;;  %1022 = vmatpush.msrb.mxu1 %v562_v32  ;;  %v561_v32 = vld [vmem:[#allocation6 + $0x510] sm:$0xff] }
  0xc0   : > { %1037 = vmatpush.msrb.mxu2 %v638_v54  ;;  %1002 = vmatpush.msrb.mxu0 %v561_v32 }
  0xc1   : > { %1023 = vmatpush.msrb.mxu1 %v547_v33  ;;  %v546_v33 = vld [vmem:[#allocation6 + $0x498] sm:$0xff] }
  0xc2   : > { %1038 = vmatpush.msrb.mxu2 %v623_v55  ;;  %v729_v55 = vperm.slane %v3277_v20, 2  ;;  %1003 = vmatpush.msrb.mxu0 %v546_v33 }
  0xc3   : > { %1024 = vmatpush.msrb.mxu1 %v532_v34  ;;  %v531_v34 = vld [vmem:[#allocation6 + $0x420] sm:$0xff] }
  0xc4   : > { %1039 = vmatpush.msrb.mxu2 %v608_v57  ;;  %1004 = vmatpush.msrb.mxu0 %v531_v34 }
  0xc5   : > { %1025 = vmatpush.msrb.mxu1 %v517_v35  ;;  %v516_v35 = vld [vmem:[#allocation6 + $0x3a8] sm:$0xff] }
  0xc6   : > { %1040 = vmatpush.msrb.mxu2 %v593_v59  ;;  %v733_v59 = vperm.slane %v3277_v20, 6  ;;  %1005 = vmatpush.msrb.mxu0 %v516_v35 }
  0xc7   : > { %1026 = vmatpush.msrb.mxu1 %v502_v38  ;;  %v486_v38 = vld [vmem:[#allocation6 + $0x2b8] sm:$0xff] }
  0xc8   : > { %1041 = vmatpush.msrb.mxu2 %v578_v61 }
  0xc9   : > { %1027 = vmatpush.msrb.mxu1 %v487_v39  ;;  %v471_v39 = vld [vmem:[#allocation6 + $0x240] sm:$0xff] }
  0xca   : > { %1042 = vmatpush.msrb.mxu2 %v563_v0 }
  0xcb   : > { %1028 = vmatpush.msrb.mxu1 %v472_v41  ;;  %v456_v41 = vld [vmem:[#allocation6 + $0x1c8] sm:$0xff] }
  0xcc   : > { %1043 = vmatpush.msrb.mxu2 %v548_v2 }
  0xcd   : > { %1029 = vmatpush.msrb.mxu1 %v457_v42  ;;  %v441_v42 = vld [vmem:[#allocation6 + $0x150] sm:$0xff] }
  0xce   : > { %1044 = vmatpush.msrb.mxu2 %v533_v4 }
  0xcf   : > { %1030 = vmatpush.msrb.mxu1 %v442_v45  ;;  %v426_v45 = vld [vmem:[#allocation6 + $0xd8] sm:$0xff] }
  0xd0   : > { %1045 = vmatpush.msrb.mxu2 %v518_v6 }
  0xd1   : > { %1031 = vmatpush.msrb.mxu1 %v427_v48 }
  0xd2   : > { %1046 = vmatpush.msrb.mxu2 %v503_v8 }
  0xd3   : > { %1032 = vmatpush.msrb.mxu1 %v412_v51 }
  0xd4   : > { %1047 = vmatpush.msrb.mxu2 %v488_v10  ;;  %1033 = vmatmul.f32.vlgmr.msrb.gmra.mxu1 %v3261_v36 }
  0xd6   : > { %1048 = vmatpush.msrb.mxu2 %v473_v12 }
  0xd8   : > { %1049 = vmatpush.msrb.mxu2 %v458_v14 }
  0xd9   : > { %v3274_v15 = vpop.f32.mrf.mxu1  ;;  %v774_v23 = vpop.f32.mrf.mxu0 }
  0xda   : > { %1050 = vmatpush.msrb.mxu2 %v443_v17  ;;  %v775_v26 = vadd.f32 %v774_v23, %v727_v22 }
  0xdc   : > { %1051 = vmatpush.msrb.mxu2 %v428_v18 }
  0xde   : > { %1052 = vmatpush.msrb.mxu2 %v413_v19 }
  0xdf   : > { %1053 = vmatmul.f32.vlgmr.msrb.gmra.mxu2 %v3261_v36 }
  0xed   : > { %v834_v46 = vpop.f32.mrf.mxu3 }
  0xee   : > { %v835_v50 = vadd.f32 %v834_v46, %v730_v44 }
  0xf9   : > { %v874_v24 = vpop.f32.mrf.mxu1  ;;  %v854_v37 = vpop.f32.mrf.mxu0 }
  0xfa   : > { %v875_v25 = vadd.f32 %v874_v24, %v732_v21  ;;  %v855_v4 = vadd.f32 %v854_v37, %v731_v1  ;;  %v501_v37 = vld [vmem:[#allocation6 + $0x330] sm:$0xff] }
  0xfb   : > { %1006 = vmatpush.msrb.mxu0 %v501_v37 }
  0xfc   : > { %1072 = vmatpush.xpose.msrb.mxu3 %v875_v25 }
  0xfd   : > { %1007 = vmatpush.msrb.mxu0 %v486_v38 }
  0xff   : > { %1073 = vmatmul.f32.vlgmr.msrb.gmra.mxu3 %v775_v26  ;;  %1008 = vmatpush.msrb.mxu0 %v471_v39 }
 0x101   : > { %1009 = vmatpush.msrb.mxu0 %v456_v41 }
 0x103   : > { %v814_v56 = vpop.f32.mrf.mxu2  ;;  %1010 = vmatpush.msrb.mxu0 %v441_v42 }
 0x104   : > { %v815_v57 = vadd.f32 %v814_v56, %v729_v55 }
 0x105   : > { %1011 = vmatpush.msrb.mxu0 %v426_v45 }
 0x10f   : > { %v914_v53 = vpop.f32.mrf.mxu3 }
 0x110   : > { %v915_v54 = vadd.f32 %v914_v53, %v734_v52 }
 0x112   : > { %1209 = vmatpush.xpose.msra.mxu1 %v915_v54 }
 0x115   : > { %1210 = vmatmul.f32.vlgmr.msra.gmra.mxu1 %v815_v57  ;;  %v738_v57 = vperm.slane %v3286_v40, 3 }
 0x119   : > { %v934_v47 = vpop.f32.mrf.mxu0 }
 0x11a   : > { %v935_v49 = vadd.f32 %v934_v47, %v735_v43  ;;  %v411_v47 = vld [vmem:[#allocation6 + $0x60] sm:$0xff] }
 0x11b   : > { %1012 = vmatpush.msrb.mxu0 %v411_v47 }
 0x11c   : > { %1277 = vmatpush.xpose.msra.mxu2 %v935_v49  ;;  %1013 = vmatmul.f32.vlgmr.msrb.gmra.mxu0 %v3261_v36 }
 0x11f   : > { %1278 = vmatmul.f32.vlgmr.msra.gmra.mxu2 %v835_v50 }
 0x122   : > { %v894_v58 = vpop.f32.mrf.mxu2 }
 0x123   : > { %v895_v61 = vadd.f32 %v894_v58, %v733_v59 }
 0x12f   : > { %v3313_v5 = vpop.f32.mrf.mxu3 }
 0x131   : > { %v954_v2 = vpop.f32.mrf.mxu1 }
 0x132   : > { %v955_v3 = vadd.f32 %v954_v2, %v736_v63 }
 0x134   : > { %1345 = vmatpush.xpose.msrb.mxu2 %v955_v3  ;;  %v654_v3 = vld [vmem:[#allocation9 + $0x68] sm:$0xff] }
 0x137   : > { %1346 = vmatmul.f32.vlgmr.msrb.gmra.mxu2 %v855_v4  ;;  %v995_v4 = vadd.f32 %v3313_v5, %v738_v57 }
 0x142   : > { %v974_v62 = vpop.f32.mrf.mxu2 }
 0x143   : > { %v975_v0 = vadd.f32 %v974_v62, %v737_v60  ;;  %v656_v62 = vld [vmem:[#allocation9 + $0x78] sm:$0xff] }
 0x144   : > { %1406 = vmatpush.msra.mxu2 %v656_v62 }
 0x145   : > { %1120 = vmatpush.msra.mxu3 %v975_v0  ;;  %v655_v0 = vld [vmem:[#allocation9 + $0x70] sm:$0xff] }
 0x146   : > { %1407 = vmatpush.msra.mxu2 %v655_v0 }
 0x147   : > { %1141 = vmatpush.xpose.msrb.mxu3 %v895_v61 }
 0x148   : > { %1408 = vmatpush.msra.mxu2 %v654_v3  ;;  %v687_v3 = vld [vmem:[#allocation9 + $0x170] sm:$0xff] }
 0x162   : > { %v3316_v8 = vpop.f32.mrf.mxu2 }
 0x163   : > { %v1055_v31 = vadd.f32 %v3316_v8, %v3696_v29 }
 0x182   : > { %v1074_v6 = vpop.f32.mrf.mxu3 }
 0x183   : > { %v1078_v7 = vsel %vm1077_vm0, %v1074_v6, -inf }
 0x184   : > { %1079 = vmax.xlane.f32.xlu0 %v1078_v7  ;;  %v740_v7 = vperm.slane %v3286_v40, 5 }
 0x199   : > { %v1014_v32 = vpop.f32.mrf.mxu0 }
 0x19a   : > { %v1015_v33 = vadd.f32 %v1014_v32, %v739_v30 }
 0x19c   : > { %1256 = vmatpush.msrb.mxu1 %v1015_v33 }
 0x19e   : > { %1392 = vmatpush.msra.mxu1 %v1055_v31  ;;  %v717_v31 = vld [vmem:[#allocation9 + $0x260] sm:$0xff] }
 0x1a2   : > { %v1279_v9 = vpop.f32.mrf.mxu2 }
 0x1a3   : > { %v1282_v10 = vsel %vm1077_vm0, %v1279_v9, -inf }
 0x1a4   : > { %1283 = vmax.xlane.f32.xlu2 %v1282_v10  ;;  %v652_v10 = vld [vmem:[#allocation9 + $0x58] sm:$0xff] }
 0x1ba   : > { %v3319_v13 = vpop.f32.mrf.mxu2 }
 0x1bb   : > { %v1350_v16 = vsel %vm1077_vm0, %v3319_v13, -inf }
 0x1bc   : > { %1351 = vmax.xlane.f32.xlu2 %v1350_v16  ;;  %v650_v16 = vld [vmem:[#allocation9 + $0x48] sm:$0xff] }
 0x1f7   : > { %v1080_v11 = vpop.xlane.xlu0 %1079 }
 0x1f8   : > { %v1081_v12 = vsub.f32 %v1074_v6, %v1080_v11  ;;  %v653_v6 = vld [vmem:[#allocation9 + $0x60] sm:$0xff]  ;;  %v1034_v11 = vpop.f32.mrf.mxu1 }
 0x1f9   : > { %1409 = vmatpush.msra.mxu2 %v653_v6  ;;  %v686_v6 = vld [vmem:[#allocation9 + $0x168] sm:$0xff] }
 0x1fa   : > { %v1082_v14 = vmul.f32 1.442695, %v1081_v12  ;;  %v651_v12 = vld [vmem:[#allocation9 + $0x50] sm:$0xff] }
 0x1fb   : > { %1410 = vmatpush.msra.mxu2 %v652_v10 }
 0x1fc   : > { %2545 = vpow2.f32 %v1082_v14  ;;  %v1035_v14 = vadd.f32 %v1034_v11, %v740_v7 }
 0x1fd   : > { %1411 = vmatpush.msra.mxu2 %v651_v12 }
 0x1ff   : > { %1412 = vmatpush.msra.mxu2 %v650_v16  ;;  %v720_v16 = vld [vmem:[#allocation9 + $0x278] sm:$0xff] }
 0x200   : > { %v1211_v38 = vpop.f32.mrf.mxu1 }
 0x201   : > { %v1214_v39 = vsel %vm1077_vm0, %v1211_v38, -inf }
 0x202   : > { %v3323_v17 = vpop.eup %2545 }
 0x203   : > { %v1084_v18 = vsel %vm1077_vm0, %v3323_v17, 0.0 }
 0x204   : > { %1085 = vadd.xlane.f32.xlu0 %v1084_v18  ;;  %v648_v18 = vld [vmem:[#allocation9 + $0x38] sm:$0xff] }
 0x217   : > { %v1284_v19 = vpop.xlane.xlu2 %1283 }
 0x218   : > { %v1285_v23 = vsub.f32 %v1279_v9, %v1284_v19  ;;  %v728_v9 = vperm.slane %v3277_v20, 1  ;;  %v647_v19 = vld [vmem:[#allocation9 + $0x30] sm:$0xff] }
 0x21a   : > { %v1286_v24 = vmul.f32 1.442695, %v1285_v23  ;;  %v795_v5 = vadd.f32 %v3274_v15, %v728_v9  ;;  %v646_v23 = vld [vmem:[#allocation9 + $0x28] sm:$0xff]  ;;  %v641_v15 = vld [vmem:[#allocation9] sm:$0xff] }
 0x21c   : > { %2547 = vpow2.f32 %v1286_v24  ;;  %v645_v24 = vld [vmem:[#allocation9 + $0x20] sm:$0xff] }
 0x222   : > { %v3327_v25 = vpop.eup %2547 }
 0x223   : > { %v1288_v26 = vsel %vm1077_vm0, %v3327_v25, 0.0 }
 0x224   : > { %1289 = vadd.xlane.f32.xlu2 %v1288_v26  ;;  %v644_v26 = vld [vmem:[#allocation9 + $0x18] sm:$0xff] }
 0x22f   : > { %v1352_v45 = vpop.xlane.xlu2 %1351 }
 0x230   : > { %v1353_v8 = vsub.f32 %v3319_v13, %v1352_v45 }
 0x232   : > { %v1354_v47 = vmul.f32 1.442695, %v1353_v8 }
 0x277   : > { %v1086_v46 = vpop.xlane.xlu0 %1085 }
 0x278   : > { %2549 = vrcp.f32 %v1086_v46  ;;  %v1098_v51 = vand.u32 2147483648, %v1086_v46  ;;  %v1096_v54 = vand.u32 2147483647, %v1086_v46  ;;  %vm1092_vm2 = vweird.f32 %v1086_v46 }
 0x27a   : > { %v1099_v58 = vor.u32 1.1754944e-38, %v1098_v51  ;;  %vm1097_vm4 = vcmp.eq.f32.partialorder %v1096_v54, 8.507059e+37 }
 0x27e   : > { %v2550_v48 = vpop.eup %2549 }
 0x27f   : > { %v1088_v49 = vmul.f32 %v2550_v48, %v1086_v46  ;;  %vm1093_vm1 = vweird.f32 %v2550_v48 }
 0x280   : > { %vm1094_vm3 = vmor %vm1092_vm2, %vm1093_vm1 }
 0x281   : > { %v1089_v50 = vsub.f32 1.0, %v1088_v49 }
 0x283   : > { %v1090_v53 = vmul.f32 %v2550_v48, %v1089_v50 }
 0x285   : > { %v1091_v56 = vadd.f32 %v2550_v48, %v1090_v53 }
 0x287   : > { %v1095_v61 = vsel %vm1094_vm3, %v2550_v48, %v1091_v56 }
 0x288   : > { %v1100_v2 = vsel %vm1097_vm4, %v1099_v58, %v1095_v61 }
 0x289   : > { %v1101_v36 = vmul.f32 %v3323_v17, %v1100_v2  ;;  %v649_v17 = vld [vmem:[#allocation9 + $0x40] sm:$0xff] }
 0x28a   : > { %1413 = vmatpush.msra.mxu2 %v649_v17 }
 0x28b   : > { %2445 = vmatmul.msk.f32.vlgmr.msra.gmra.mxu3 %vm1077_vm0, %v1101_v36  ;;  %v688_v36 = vld [vmem:[#allocation9 + $0x178] sm:$0xff] }
 0x28c   : > { %1188 = vmatpush.msra.mxu3 %v995_v4  ;;  %1414 = vmatpush.msra.mxu2 %v648_v18 }
 0x28d   : > { %1446 = vmatpush.msra.mxu0 %v688_v36 }
 0x28e   : > { %1415 = vmatpush.msra.mxu2 %v647_v19  ;;  %v684_v19 = vld [vmem:[#allocation9 + $0x158] sm:$0xff] }
 0x28f   : > { %1447 = vmatpush.msra.mxu0 %v687_v3  ;;  %v671_v3 = vld [vmem:[#allocation9 + $0xf0] sm:$0xff] }
 0x290   : > { %1416 = vmatpush.msra.mxu2 %v646_v23  ;;  %v719_v23 = vld [vmem:[#allocation9 + $0x270] sm:$0xff] }
 0x291   : > { %1448 = vmatpush.msra.mxu0 %v686_v6 }
 0x292   : > { %1417 = vmatpush.msra.mxu2 %v645_v24 }
 0x293   : > { %1142 = vmatmul.f32.vlgmr.msrb.gmra.mxu3 %v795_v5  ;;  %v685_v5 = vld [vmem:[#allocation9 + $0x160] sm:$0xff] }
 0x294   : > { %1324 = vmatpush.msrb.mxu3 %v1035_v14  ;;  %1418 = vmatpush.msra.mxu2 %v644_v26 }
 0x295   : > { %1449 = vmatpush.msra.mxu0 %v685_v5  ;;  %v3415_v5 = vld [vmem:[#allocation9 + $0x130] sm:$0xff] }
 0x296   : > { %1419 = vmatpush.msra.mxu2 %v643_v27 }
 0x297   : > { %v3367_v61 = vpop.xlane.xlu2 %1289  ;;  %1450 = vmatpush.msra.mxu0 %v684_v19  ;;  %v3421_v19 = vld [vmem:[#allocation9 + $0x128] sm:$0xff] }
 0x298   : > { %1420 = vmatpush.msra.mxu2 %v642_v28  ;;  %v718_v28 = vld [vmem:[#allocation9 + $0x268] sm:$0xff]  ;;  %vm1296_vm10 = vweird.f32 %v3367_v61 }
 0x29a   : > { %1421 = vmatpush.msra.mxu2 %v641_v15  ;;  %v683_v15 = vld [vmem:[#allocation9 + $0x150] sm:$0xff] }
 0x29b   : > { %1451 = vmatpush.msra.mxu0 %v683_v15 }
 0x29c   : > { %1486 = vmatpush.msrb.mxu2 %v720_v16  ;;  %v3418_v16 = vld [vmem:[#allocation9 + $0x240] sm:$0xff] }
 0x29e   : > { %1487 = vmatpush.msrb.mxu2 %v719_v23 }
 0x2a0   : > { %1488 = vmatpush.msrb.mxu2 %v718_v28 }
 0x2a2   : > { %1489 = vmatpush.msrb.mxu2 %v717_v31 }
 0x30e   : > { %v1122_v34 = vpop.f32.mrf.mxu3 }
 0x30f   : > { %1422 = vmatmul.f32.vlgmr.msra.gmra.mxu2 %v1122_v34  ;;  %v1302_v34 = vand.u32 2147483648, %v3367_v61 }
 0x311   : > { %v1303_v36 = vor.u32 1.1754944e-38, %v1302_v34  ;;  %v668_v34 = vld [vmem:[#allocation9 + $0xd8] sm:$0xff] }
 0x316   : > { %v1143_v35 = vpop.f32.mrf.mxu3 }
 0x317   : > { %v1146_v37 = vsel %vm1077_vm0, %v1143_v35, -inf }
 0x318   : > { %1147 = vmax.xlane.f32.xlu1 %v1146_v37  ;;  %v3385_v37 = vld [vmem:[#allocation9 + $0x148] sm:$0xff] }
 0x319   : > { %1452 = vmatpush.msra.mxu0 %v3385_v37 }
 0x320   : > { %1215 = vmax.xlane.f32.xlu1 %v1214_v39 }
 0x38b   : > { %v1148_v41 = vpop.xlane.xlu1 %1147 }
 0x38c   : > { %v1149_v42 = vsub.f32 %v1143_v35, %v1148_v41 }
 0x38e   : > { %v1150_v46 = vmul.f32 1.442695, %v1149_v42 }
 0x390   : > { %2551 = vpow2.f32 %v1150_v46 }
 0x391   : > { %2553 = vpow2.f32 %v1354_v47  ;;  %v3391_v47 = vld [vmem:[#allocation9 + $0x140] sm:$0xff] }
 0x392   : > { %1453 = vmatpush.msra.mxu0 %v3391_v47 }
 0x393   : > { %v1216_v48 = vpop.xlane.xlu1 %1215 }
 0x394   : > { %v1217_v49 = vsub.f32 %v1211_v38, %v1216_v48  ;;  %v716_v38 = vld [vmem:[#allocation9 + $0x258] sm:$0xff]  ;;  %v1300_v48 = vand.u32 2147483647, %v3367_v61 }
 0x395   : > { %1490 = vmatpush.msrb.mxu2 %v716_v38 }
 0x396   : > { %v3355_v50 = vpop.eup %2551  ;;  %v1218_v51 = vmul.f32 1.442695, %v1217_v49  ;;  %vm1301_vm13 = vcmp.eq.f32.partialorder %v1300_v48, 8.507059e+37  ;;  %v666_v48 = vld [vmem:[#allocation9 + $0xc8] sm:$0xff] }
 0x397   : > { %v1152_v53 = vsel %vm1077_vm0, %v3355_v50, 0.0  ;;  %v3359_v54 = vpop.eup %2553 }
 0x398   : > { %2555 = vpow2.f32 %v1218_v51  ;;  %1153 = vadd.xlane.f32.xlu0 %v1152_v53  ;;  %v1356_v13 = vsel %vm1077_vm0, %v3359_v54, 0.0  ;;  %v672_v53 = vld [vmem:[#allocation9 + $0xf8] sm:$0xff] }
 0x399   : > { %2557 = vrcp.f32 %v3367_v61 }
 0x39e   : > { %v3361_v56 = vpop.eup %2555 }
 0x39f   : > { %v1220_v58 = vsel %vm1077_vm0, %v3361_v56, 0.0  ;;  %v3370_v0 = vpop.eup %2557 }
 0x3a0   : > { %1357 = vadd.xlane.f32.xlu0 %v1356_v13  ;;  %1221 = vadd.xlane.f32.xlu1 %v1220_v58  ;;  %v1292_v2 = vmul.f32 %v3370_v0, %v3367_v61  ;;  %vm1297_vm7 = vweird.f32 %v3370_v0  ;;  %v715_v13 = vld [vmem:[#allocation9 + $0x250] sm:$0xff] }
 0x3a1   : > { %vm3399_vm11 = vmor %vm1296_vm10, %vm1297_vm7  ;;  %1491 = vmatpush.msrb.mxu2 %v715_v13  ;;  %v664_v13 = vld [vmem:[#allocation9 + $0xb8] sm:$0xff] }
 0x3a2   : > { %v1293_v10 = vsub.f32 1.0, %v1292_v2  ;;  %v3403_v2 = vld [vmem:[#allocation9 + $0x138] sm:$0xff] }
 0x3a3   : > { %1454 = vmatpush.msra.mxu0 %v3403_v2 }
 0x3a4   : > { %v1294_v24 = vmul.f32 %v3370_v0, %v1293_v10 }
 0x3a5   : > { %1455 = vmatpush.msra.mxu0 %v3415_v5 }
 0x3a6   : > { %v1295_v41 = vadd.f32 %v3370_v0, %v1294_v24  ;;  %v669_v24 = vld [vmem:[#allocation9 + $0xe0] sm:$0xff] }
 0x3a7   : > { %1456 = vmatpush.msra.mxu0 %v3421_v19 }
 0x3a8   : > { %v1299_v61 = vsel %vm3399_vm11, %v3370_v0, %v1295_v41  ;;  %v670_v0 = vld [vmem:[#allocation9 + $0xe8] sm:$0xff]  ;;  %v3439_v41 = vld [vmem:[#allocation9 + $0x118] sm:$0xff] }
 0x40b   : > { %v1154_v62 = vpop.xlane.xlu0 %1153 }
 0x40c   : > { %2559 = vrcp.f32 %v1154_v62  ;;  %v1166_v18 = vand.u32 2147483648, %v1154_v62  ;;  %v1164_v27 = vand.u32 2147483647, %v1154_v62  ;;  %vm1160_vm6 = vweird.f32 %v1154_v62 }
 0x40e   : > { %v1167_v35 = vor.u32 1.1754944e-38, %v1166_v18  ;;  %vm1165_vm9 = vcmp.eq.f32.partialorder %v1164_v27, 8.507059e+37 }
 0x412   : > { %v2560_v4 = vpop.eup %2559 }
 0x413   : > { %v1156_v11 = vmul.f32 %v2560_v4, %v1154_v62  ;;  %v3374_v12 = vpop.xlane.xlu0 %1357  ;;  %v3376_v14 = vpop.xlane.xlu1 %1221  ;;  %vm1161_vm5 = vweird.f32 %v2560_v4 }
 0x414   : > { %2561 = vrcp.f32 %v3374_v12  ;;  %vm1162_vm8 = vmor %vm1160_vm6, %vm1161_vm5  ;;  %vm1228_vm14 = vweird.f32 %v3376_v14  ;;  %v1370_v15 = vand.u32 2147483648, %v3374_v12  ;;  %vm1364_vm3 = vweird.f32 %v3374_v12 }
 0x415   : > { %v1157_v17 = vsub.f32 1.0, %v1156_v11  ;;  %2563 = vrcp.f32 %v3376_v14  ;;  %v1232_v11 = vand.u32 2147483647, %v3376_v14 }
 0x417   : > { %v1158_v26 = vmul.f32 %v2560_v4, %v1157_v17  ;;  %v1304_v17 = vsel %vm1301_vm13, %v1303_v36, %v1299_v61  ;;  %vm1233_vm2 = vcmp.eq.f32.partialorder %v1232_v11, 8.507059e+37  ;;  %v663_v61 = vld [vmem:[#allocation9 + $0xb0] sm:$0xff]  ;;  %v3468_v11 = vld [vmem:[#allocation9 + $0x1b8] sm:$0xff] }
 0x418   : > { %v699_v36 = vld [vmem:[#allocation9 + $0x1d0] sm:$0xff] }
 0x419   : > { %v1159_v32 = vadd.f32 %v2560_v4, %v1158_v26  ;;  %v3426_v26 = vld [vmem:[#allocation9 + $0x238] sm:$0xff] }
 0x41a   : > { %v3381_v33 = vpop.eup %2561 }
 0x41b   : > { %v2564_v39 = vpop.eup %2563  ;;  %v1163_v42 = vsel %vm1162_vm8, %v2560_v4, %v1159_v32  ;;  %v1360_v45 = vmul.f32 %v3381_v33, %v3374_v12  ;;  %v3411_v4 = vld [vmem:[#allocation9 + $0x248] sm:$0xff]  ;;  %vm1365_vm1 = vweird.f32 %v3381_v33  ;;  %v1305_v32 = vmul.f32 %v3327_v25, %v1304_v17  ;;  %v667_v25 = vld [vmem:[#allocation9 + $0xd0] sm:$0xff] }
 0x41c   : > { %v1168_v8 = vsel %vm1165_vm9, %v1167_v35, %v1163_v42  ;;  %v1224_v46 = vmul.f32 %v2564_v39, %v3376_v14  ;;  %vm1229_vm12 = vweird.f32 %v2564_v39  ;;  %1492 = vmatpush.msrb.mxu2 %v3411_v4  ;;  %v1368_v35 = vand.u32 2147483647, %v3374_v12  ;;  %vm3444_vm4 = vmor %vm1364_vm3, %vm1365_vm1  ;;  %v3450_v12 = vld [vmem:[#allocation9 + $0x230] sm:$0xff]  ;;  %v3500_v42 = vld [vmem:[#allocation9 + $0x188] sm:$0xff] }
 0x41d   : > { %v1361_v49 = vsub.f32 1.0, %v1360_v45  ;;  %v1169_v51 = vmul.f32 %v3355_v50, %v1168_v8  ;;  %v1234_v50 = vand.u32 2147483648, %v3376_v14  ;;  %vm1230_vm15 = vmor %vm1228_vm14, %vm1229_vm12  ;;  %v3430_v14 = vld [vmem:[#allocation9 + $0x120] sm:$0xff]  ;;  %v703_v45 = vld [vmem:[#allocation9 + $0x1f0] sm:$0xff] }
 0x41e   : > { %v1225_v62 = vsub.f32 1.0, %v1224_v46  ;;  %1493 = vmatpush.msrb.mxu2 %v3418_v16  ;;  %1457 = vmatpush.msra.mxu0 %v3430_v14  ;;  %v3456_v8 = vld [vmem:[#allocation9 + $0x110] sm:$0xff]  ;;  %v1371_v46 = vor.u32 1.1754944e-38, %v1370_v15  ;;  %vm1369_vm5 = vcmp.eq.f32.partialorder %v1368_v35, 8.507059e+37  ;;  %v3483_v15 = vld [vmem:[#allocation9 + $0x228] sm:$0xff]  ;;  %v2589_v35 = vld [vmem:[#allocation6 + $0x708] sm:$0xff] }
 0x41f   : > { %2446 = vmatmul.msk.f32.vlgmr.msra.gmra.mxu3 %vm1077_vm0, %v1169_v51  ;;  %v1362_v6 = vmul.f32 %v3381_v33, %v1361_v49  ;;  %v1235_v23 = vor.u32 1.1754944e-38, %v1234_v50  ;;  %v702_v49 = vld [vmem:[#allocation9 + $0x1e8] sm:$0xff]  ;;  %v3471_v17 = vld [vmem:[#allocation9 + $0x1b0] sm:$0xff] }
 0x420   : > { %v1226_v10 = vmul.f32 %v2564_v39, %v1225_v62  ;;  %1426 = vmatpush.msra.mxu3 %v672_v53  ;;  %1494 = vmatpush.msrb.mxu2 %v3426_v26  ;;  %v665_v53 = vld [vmem:[#allocation9 + $0xc0] sm:$0xff]  ;;  %v700_v62 = vld [vmem:[#allocation9 + $0x1d8] sm:$0xff]  ;;  %v662_v50 = vld [vmem:[#allocation9 + $0xa8] sm:$0xff] }
 0x421   : > { %v1363_v27 = vadd.f32 %v3381_v33, %v1362_v6  ;;  %1458 = vmatpush.msra.mxu0 %v3439_v41  ;;  %v661_v6 = vld [vmem:[#allocation9 + $0xa0] sm:$0xff] }
 0x422   : > { %v1227_v18 = vadd.f32 %v2564_v39, %v1226_v10  ;;  %1427 = vmatpush.msra.mxu3 %v671_v3  ;;  %1495 = vmatpush.msrb.mxu2 %v3450_v12  ;;  %v3463_v3 = vld [vmem:[#allocation9 + $0x1c8] sm:$0xff]  ;;  %v3465_v10 = vld [vmem:[#allocation9 + $0x1c0] sm:$0xff] }
 0x423   : > { %1459 = vmatpush.msra.mxu0 %v3456_v8 }
 0x424   : > { %v1231_v28 = vsel %vm1230_vm15, %v2564_v39, %v1227_v18  ;;  %1428 = vmatpush.msra.mxu3 %v670_v0  ;;  %v704_v39 = vld [vmem:[#allocation9 + $0x1f8] sm:$0xff]  ;;  %v659_v0 = vld [vmem:[#allocation9 + $0x90] sm:$0xff]  ;;  %v658_v18 = vld [vmem:[#allocation9 + $0x88] sm:$0xff]  ;;  %1496 = vmatpush.msrb.mxu2 %v3483_v15 }
 0x425   : > { %v1236_v31 = vsel %vm1233_vm2, %v1235_v23, %v1231_v28  ;;  %v3474_v23 = vld [vmem:[#allocation9 + $0x1a8] sm:$0xff]  ;;  %v3480_v28 = vld [vmem:[#allocation9 + $0x1a0] sm:$0xff] }
 0x426   : > { %v1237_v38 = vmul.f32 %v3361_v56, %v1236_v31  ;;  %1429 = vmatpush.msra.mxu3 %v669_v24  ;;  %v1367_v56 = vsel %vm3444_vm4, %v3381_v33, %v1363_v27  ;;  %v701_v33 = vld [vmem:[#allocation9 + $0x1e0] sm:$0xff]  ;;  %v3478_v27 = vld [vmem:[#allocation9 + $0x108] sm:$0xff] }
 0x427   : > { %2448 = vmatmul.msk.f32.vlgmr.msrb.gmra.mxu3 %vm1077_vm0, %v1305_v32  ;;  %v1372_v51 = vsel %vm1369_vm5, %v1371_v46, %v1367_v56  ;;  %v657_v24 = vld [vmem:[#allocation9 + $0x80] sm:$0xff]  ;;  %1460 = vmatpush.msra.mxu0 %v3478_v27  ;;  %v3489_v32 = vld [vmem:[#allocation9 + $0x198] sm:$0xff]  ;;  %v3503_v56 = vld [vmem:[#allocation9 + $0x210] sm:$0xff] }
 0x428   : > { %2447 = vmatmul.msk.f32.vlgmr.msrb.gmra.mxu1 %vm1077_vm0, %v1237_v38  ;;  %1430 = vmatpush.msra.mxu3 %v668_v34  ;;  %v1373_v58 = vmul.f32 %v3359_v54, %v1372_v51  ;;  %v660_v54 = vld [vmem:[#allocation9 + $0x98] sm:$0xff]  ;;  %v3487_v31 = vld [vmem:[#allocation9 + $0x100] sm:$0xff]  ;;  %v3495_v38 = vld [vmem:[#allocation9 + $0x190] sm:$0xff] }
 0x429   : > { %1466 = vmatpush.msrb.mxu1 %v704_v39  ;;  %v3491_v34 = vld [vmem:[#allocation9 + $0x220] sm:$0xff]  ;;  %1461 = vmatpush.msra.mxu0 %v3487_v31  ;;  %v3497_v39 = vld [vmem:[#allocation9 + $0x218] sm:$0xff]  ;;  %v2592_v46 = vld [vmem:[#allocation6 + $0x698] sm:$0xff] }
 0x42a   : > { %1431 = vmatpush.msra.mxu3 %v667_v25  ;;  %1497 = vmatpush.msrb.mxu2 %v3491_v34  ;;  %v2590_v25 = vld [vmem:[#allocation6 + $0x710] sm:$0xff]  ;;  %v2593_v51 = vld [vmem:[#allocation6 + $0x618] sm:$0xff] }
 0x42b   : > { %1467 = vmatpush.msrb.mxu1 %v703_v45  ;;  %1558 = vmatpush.msrb.mxu0 %v2590_v25  ;;  %v2591_v45 = vld [vmem:[#allocation6 + $0x690] sm:$0xff]  ;;  %v2607_v25 = vld [vmem:[#allocation6 + $0x438] sm:$0xff] }
 0x42c   : > { %1432 = vmatpush.msra.mxu3 %v666_v48  ;;  %1498 = vmatpush.msrb.mxu2 %v3497_v39  ;;  %v3507_v48 = vld [vmem:[#allocation9 + $0x180] sm:$0xff] }
 0x42d   : > { %1468 = vmatpush.msrb.mxu1 %v702_v49  ;;  %1559 = vmatpush.msrb.mxu0 %v2592_v46  ;;  %v3509_v49 = vld [vmem:[#allocation9 + $0x208] sm:$0xff]  ;;  %v2609_v46 = vld [vmem:[#allocation6 + $0x440] sm:$0xff] }
 0x42e   : > { %1433 = vmatpush.msra.mxu3 %v665_v53  ;;  %1499 = vmatpush.msrb.mxu2 %v3503_v56  ;;  %v2594_v53 = vld [vmem:[#allocation6 + $0x620] sm:$0xff] }
 0x42f   : > { %1469 = vmatpush.msrb.mxu1 %v701_v33  ;;  %1560 = vmatpush.msrb.mxu0 %v2594_v53  ;;  %v2595_v33 = vld [vmem:[#allocation6 + $0x5a0] sm:$0xff] }
 0x430   : > { %2449 = vmatmul.msk.f32.vlgmr.msra.gmra.mxu1 %vm1077_vm0, %v1373_v58  ;;  %1434 = vmatpush.msra.mxu3 %v664_v13  ;;  %v3514_v13 = vld [vmem:[#allocation9 + $0x200] sm:$0xff]  ;;  %v2596_v58 = vld [vmem:[#allocation6 + $0x718] sm:$0xff]  ;;  %v2611_v53 = vld [vmem:[#allocation6 + $0x3c0] sm:$0xff] }
 0x431   : > { %1470 = vmatpush.msrb.mxu1 %v700_v62  ;;  %1500 = vmatpush.msrb.mxu2 %v3509_v49  ;;  %v2597_v62 = vld [vmem:[#allocation6 + $0x5a8] sm:$0xff] }
 0x432   : > { %1435 = vmatpush.msra.mxu3 %v663_v61  ;;  %1561 = vmatpush.msrb.mxu0 %v2597_v62  ;;  %v2598_v61 = vld [vmem:[#allocation6 + $0x528] sm:$0xff]  ;;  %v2614_v62 = vld [vmem:[#allocation6 + $0x4c0] sm:$0xff] }
 0x433   : > { %1471 = vmatpush.msrb.mxu1 %v699_v36  ;;  %1501 = vmatpush.msrb.mxu2 %v3514_v13  ;;  %v2599_v36 = vld [vmem:[#allocation6 + $0x6a0] sm:$0xff] }
 0x434   : > { %1436 = vmatpush.msra.mxu3 %v662_v50  ;;  %v2600_v50 = vld [vmem:[#allocation6 + $0x720] sm:$0xff] }
 0x435   : > { %1472 = vmatpush.msrb.mxu1 %v3463_v3  ;;  %1598 = vmatpush.msra.mxu2 %v2600_v50  ;;  %v2617_v50 = vld [vmem:[#allocation6 + $0x350] sm:$0xff] }
 0x436   : > { %1437 = vmatpush.msra.mxu3 %v661_v6  ;;  %v2601_v6 = vld [vmem:[#allocation6 + $0x530] sm:$0xff] }
 0x437   : > { %1473 = vmatpush.msrb.mxu1 %v3465_v10  ;;  %1562 = vmatpush.msrb.mxu0 %v2601_v6  ;;  %v2618_v6 = vld [vmem:[#allocation6 + $0x448] sm:$0xff] }
 0x438   : > { %1438 = vmatpush.msra.mxu3 %v660_v54  ;;  %v2602_v54 = vld [vmem:[#allocation6 + $0x628] sm:$0xff] }
 0x439   : > { %1474 = vmatpush.msrb.mxu1 %v3468_v11 }
 0x43a   : > { %1439 = vmatpush.msra.mxu3 %v659_v0  ;;  %v2603_v0 = vld [vmem:[#allocation6 + $0x4b0] sm:$0xff] }
 0x43b   : > { %1475 = vmatpush.msrb.mxu1 %v3471_v17 }
 0x43c   : > { %1440 = vmatpush.msra.mxu3 %v658_v18  ;;  %v2604_v18 = vld [vmem:[#allocation6 + $0x6a8] sm:$0xff] }
 0x43d   : > { %1476 = vmatpush.msrb.mxu1 %v3474_v23  ;;  %1599 = vmatpush.msra.mxu2 %v2604_v18  ;;  %v2621_v18 = vld [vmem:[#allocation6 + $0x2d8] sm:$0xff] }
 0x43e   : > { %1441 = vmatpush.msra.mxu3 %v657_v24  ;;  %v2605_v24 = vld [vmem:[#allocation6 + $0x4b8] sm:$0xff] }
 0x43f   : > { %1477 = vmatpush.msrb.mxu1 %v3480_v28  ;;  %1563 = vmatpush.msrb.mxu0 %v2605_v24  ;;  %v2622_v24 = vld [vmem:[#allocation6 + $0x3d0] sm:$0xff] }
 0x440   : > { %1538 = vmatpush.msrb.mxu3 %v2589_v35  ;;  %v2606_v35 = vld [vmem:[#allocation6 + $0x5b0] sm:$0xff] }
 0x441   : > { %1478 = vmatpush.msrb.mxu1 %v3489_v32  ;;  %1564 = vmatpush.msrb.mxu0 %v2609_v46  ;;  %v2626_v46 = vld [vmem:[#allocation6 + $0x358] sm:$0xff] }
 0x442   : > { %1539 = vmatpush.msrb.mxu3 %v2591_v45  ;;  %v2608_v45 = vld [vmem:[#allocation6 + $0x630] sm:$0xff] }
 0x443   : > { %1479 = vmatpush.msrb.mxu1 %v3495_v38  ;;  %1600 = vmatpush.msra.mxu2 %v2608_v45  ;;  %v2625_v45 = vld [vmem:[#allocation6 + $0x260] sm:$0xff] }
 0x444   : > { %1540 = vmatpush.msrb.mxu3 %v2593_v51  ;;  %v2610_v51 = vld [vmem:[#allocation6 + $0x538] sm:$0xff] }
 0x445   : > { %1480 = vmatpush.msrb.mxu1 %v3500_v42 }
 0x446   : > { %1541 = vmatpush.msrb.mxu3 %v2595_v33  ;;  %v2612_v33 = vld [vmem:[#allocation6 + $0x5b8] sm:$0xff] }
 0x447   : > { %1481 = vmatpush.msrb.mxu1 %v3507_v48  ;;  %1601 = vmatpush.msra.mxu2 %v2612_v33  ;;  %v2629_v33 = vld [vmem:[#allocation6 + $0x1e8] sm:$0xff] }
 0x448   : > { %1542 = vmatpush.msrb.mxu3 %v2598_v61  ;;  %v2615_v61 = vld [vmem:[#allocation6 + $0x348] sm:$0xff] }
 0x449   : > { %1578 = vmatpush.msra.mxu1 %v2596_v58  ;;  %v2613_v58 = vld [vmem:[#allocation6 + $0x3c8] sm:$0xff] }
 0x44a   : > { %1543 = vmatpush.msrb.mxu3 %v2603_v0  ;;  %1565 = vmatpush.msrb.mxu0 %v2613_v58  ;;  %v2620_v0 = vld [vmem:[#allocation6 + $0x4c8] sm:$0xff]  ;;  %v2630_v58 = vld [vmem:[#allocation6 + $0x2e0] sm:$0xff] }
 0x44b   : > { %1579 = vmatpush.msra.mxu1 %v2599_v36  ;;  %v2616_v36 = vld [vmem:[#allocation6 + $0x540] sm:$0xff] }
 0x44c   : > { %1544 = vmatpush.msrb.mxu3 %v2607_v25  ;;  %1602 = vmatpush.msra.mxu2 %v2616_v36  ;;  %v2624_v25 = vld [vmem:[#allocation6 + $0x450] sm:$0xff] }
 0x44d   : > { %1580 = vmatpush.msra.mxu1 %v2602_v54  ;;  %1566 = vmatpush.msrb.mxu0 %v2617_v50  ;;  %v2619_v54 = vld [vmem:[#allocation6 + $0x2d0] sm:$0xff]  ;;  %v2634_v50 = vld [vmem:[#allocation6 + $0x268] sm:$0xff] }
 0x44e   : > { %1545 = vmatpush.msrb.mxu3 %v2611_v53  ;;  %1603 = vmatpush.msra.mxu2 %v2620_v0  ;;  %v2628_v53 = vld [vmem:[#allocation6 + $0x3d8] sm:$0xff]  ;;  %v2633_v36 = vld [vmem:[#allocation6 + $0x170] sm:$0xff]  ;;  %v2636_v0 = vld [vmem:[#allocation6 + $0x2e8] sm:$0xff] }
 0x44f   : > { %1581 = vmatpush.msra.mxu1 %v2606_v35  ;;  %1567 = vmatpush.msrb.mxu0 %v2621_v18  ;;  %v2623_v35 = vld [vmem:[#allocation6 + $0x258] sm:$0xff] }
 0x450   : > { %1546 = vmatpush.msrb.mxu3 %v2615_v61  ;;  %1604 = vmatpush.msra.mxu2 %v2624_v25  ;;  %v2632_v61 = vld [vmem:[#allocation6 + $0x360] sm:$0xff]  ;;  %v2637_v18 = vld [vmem:[#allocation6 + $0xf8] sm:$0xff] }
 0x451   : > { %1582 = vmatpush.msra.mxu1 %v2610_v51  ;;  %1568 = vmatpush.msrb.mxu0 %v2625_v45  ;;  %v2627_v51 = vld [vmem:[#allocation6 + $0x1e0] sm:$0xff]  ;;  %v2640_v25 = vld [vmem:[#allocation6 + $0x78] sm:$0xff] }
 0x452   : > { %1547 = vmatpush.msrb.mxu3 %v2619_v54  ;;  %1605 = vmatpush.msra.mxu2 %v2628_v53  ;;  %v2643_v53 = vld [vmem:[#allocation6 + $0x1f8] sm:$0xff] }
 0x453   : > { %1583 = vmatpush.msra.mxu1 %v2614_v62  ;;  %1569 = vmatpush.msrb.mxu0 %v2629_v33  ;;  %v2631_v62 = vld [vmem:[#allocation6 + $0x168] sm:$0xff]  ;;  %v2644_v33 = vld [vmem:[#allocation6 + $0x100] sm:$0xff] }
 0x454   : > { %1548 = vmatpush.msrb.mxu3 %v2623_v35  ;;  %1606 = vmatpush.msra.mxu2 %v2632_v61  ;;  %v2639_v35 = vld [vmem:[#allocation6 + $0x270] sm:$0xff]  ;;  %v2647_v61 = vld [vmem:[#allocation6 + $0x8] sm:$0xff] }
 0x455   : > { %1584 = vmatpush.msra.mxu1 %v2618_v6  ;;  %1570 = vmatpush.msrb.mxu0 %v2633_v36  ;;  %v2635_v6 = vld [vmem:[#allocation6 + $0xf0] sm:$0xff]  ;;  %v2648_v36 = vld [vmem:[#allocation6 + $0x88] sm:$0xff] }
 0x456   : > { %1549 = vmatpush.msrb.mxu3 %v2627_v51  ;;  %1607 = vmatpush.msra.mxu2 %v2636_v0  ;;  %v2642_v51 = vld [vmem:[#allocation6 + $0x80] sm:$0xff]  ;;  %v2651_v0 = vld [vmem:[#allocation6 + $0x730] sm:$0xff] }
 0x457   : > { %1585 = vmatpush.msra.mxu1 %v2622_v24  ;;  %1571 = vmatpush.msrb.mxu0 %v2637_v18  ;;  %v2638_v24 = vld [vmem:[#allocation6 + $0x1f0] sm:$0xff] }
 0x458   : > { %1550 = vmatpush.msrb.mxu3 %v2631_v62  ;;  %1608 = vmatpush.msra.mxu2 %v2639_v35  ;;  %v2646_v62 = vld [vmem:[#allocation6 + $0x180] sm:$0xff]  ;;  %v2652_v18 = vld [vmem:[#allocation6 + $0x6b0] sm:$0xff] }
 0x459   : > { %1586 = vmatpush.msra.mxu1 %v2626_v46  ;;  %v2641_v46 = vld [vmem:[#allocation6 + $0x178] sm:$0xff]  ;;  %1572 = vmatpush.msrb.mxu0 %v2642_v51  ;;  %v2654_v35 = vld [vmem:[#allocation6 + $0x10] sm:$0xff] }
 0x45a   : > { %1551 = vmatpush.msrb.mxu3 %v2635_v6  ;;  %1609 = vmatpush.msra.mxu2 %v2643_v53  ;;  %v2657_v51 = vld [vmem:[#allocation6 + $0x638] sm:$0xff] }
 0x45b   : > { %1587 = vmatpush.msra.mxu1 %v2630_v58  ;;  %v2645_v58 = vld [vmem:[#allocation6] sm:$0xff]  ;;  %1573 = vmatpush.msrb.mxu0 %v2647_v61  ;;  %v2658_v53 = vld [vmem:[#allocation6 + $0x18] sm:$0xff]  ;;  %v2662_v61 = vld [vmem:[#allocation6 + $0x648] sm:$0xff] }
 0x45c   : > { %1552 = vmatpush.msrb.mxu3 %v2640_v25  ;;  %1610 = vmatpush.msra.mxu2 %v2646_v62  ;;  %v2661_v62 = vld [vmem:[#allocation6 + $0x640] sm:$0xff] }
 0x45d   : > { %1588 = vmatpush.msra.mxu1 %v2634_v50  ;;  %v2649_v50 = vld [vmem:[#allocation6 + $0x728] sm:$0xff] }
 0x45e   : > { %1553 = vmatpush.msrb.mxu3 %v2645_v58  ;;  %v2660_v58 = vld [vmem:[#allocation6 + $0x740] sm:$0xff] }
 0x45f   : > { %1589 = vmatpush.msra.mxu1 %v2638_v24  ;;  %v2653_v24 = vld [vmem:[#allocation6 + $0x90] sm:$0xff] }
 0x461   : > { %1590 = vmatpush.msra.mxu1 %v2641_v46  ;;  %v2656_v46 = vld [vmem:[#allocation6 + $0x6b8] sm:$0xff] }
 0x463   : > { %1591 = vmatpush.msra.mxu1 %v2644_v33  ;;  %v2659_v33 = vld [vmem:[#allocation6 + $0x6c0] sm:$0xff] }
 0x465   : > { %1592 = vmatpush.msra.mxu1 %v2648_v36  ;;  %v2663_v36 = vld [vmem:[#allocation6 + $0x5c0] sm:$0xff] }
 0x467   : > { %1593 = vmatpush.msra.mxu1 %v2654_v35  ;;  %v2670_v35 = vld [vmem:[#allocation6 + $0x558] sm:$0xff] }
 0x4a2   : > { %v1190_v54 = vpop.f32.mrf.mxu3 }
 0x4a3   : > { %1442 = vmatmul.f32.vlgmr.msra.gmra.mxu3 %v1190_v54  ;;  %v2650_v54 = vld [vmem:[#allocation6 + $0x108] sm:$0xff] }
 0x4a4   : > { %1618 = vmatpush.msra.mxu3 %v2649_v50  ;;  %1611 = vmatpush.msra.mxu2 %v2650_v54  ;;  %v2664_v50 = vld [vmem:[#allocation6 + $0x6c8] sm:$0xff]  ;;  %v2666_v54 = vld [vmem:[#allocation6 + $0x5d0] sm:$0xff] }
 0x4a5   : > { %v1258_v45 = vpop.f32.mrf.mxu1 }
 0x4a6   : > { %1462 = vmatmul.f32.vlgmr.msra.gmra.mxu0 %v1258_v45  ;;  %1619 = vmatpush.msra.mxu3 %v2652_v18  ;;  %v2655_v45 = vld [vmem:[#allocation6 + $0x738] sm:$0xff]  ;;  %v2668_v18 = vld [vmem:[#allocation6 + $0x650] sm:$0xff] }
 0x4a7   : > { %1638 = vmatpush.msra.mxu0 %v2651_v0  ;;  %1612 = vmatpush.msra.mxu2 %v2653_v24  ;;  %v2667_v0 = vld [vmem:[#allocation6 + $0x548] sm:$0xff]  ;;  %v2669_v24 = vld [vmem:[#allocation6 + $0x550] sm:$0xff] }
 0x4a8   : > { %1620 = vmatpush.msra.mxu3 %v2657_v51  ;;  %v2674_v51 = vld [vmem:[#allocation6 + $0x4e0] sm:$0xff] }
 0x4a9   : > { %1639 = vmatpush.msra.mxu0 %v2656_v46  ;;  %1613 = vmatpush.msra.mxu2 %v2658_v53  ;;  %v2673_v46 = vld [vmem:[#allocation6 + $0x4d8] sm:$0xff] }
 0x4aa   : > { %v1326_v6 = vpop.f32.mrf.mxu3  ;;  %1621 = vmatpush.msra.mxu3 %v2663_v36  ;;  %v2675_v53 = vld [vmem:[#allocation6 + $0x458] sm:$0xff]  ;;  %v2680_v36 = vld [vmem:[#allocation6 + $0x4e8] sm:$0xff] }
 0x4ab   : > { %1482 = vmatmul.f32.vlgmr.msrb.gmra.mxu1 %v1326_v6  ;;  %1640 = vmatpush.msra.mxu0 %v2661_v62  ;;  %v2665_v6 = vld [vmem:[#allocation6 + $0x5c8] sm:$0xff] }
 0x4ac   : > { %1658 = vmatpush.msrb.mxu1 %v2655_v45  ;;  %1622 = vmatpush.msra.mxu3 %v2667_v0  ;;  %v2672_v45 = vld [vmem:[#allocation6 + $0x5d8] sm:$0xff]  ;;  %v2678_v62 = vld [vmem:[#allocation6 + $0x468] sm:$0xff]  ;;  %v2684_v0 = vld [vmem:[#allocation6 + $0x470] sm:$0xff] }
 0x4ad   : > { %v1394_v25 = vpop.f32.mrf.mxu1  ;;  %1641 = vmatpush.msra.mxu0 %v2665_v6  ;;  %v2682_v6 = vld [vmem:[#allocation6 + $0x3f0] sm:$0xff] }
 0x4ae   : > { %1502 = vmatmul.f32.vlgmr.msrb.gmra.mxu2 %v1394_v25  ;;  %1659 = vmatpush.msrb.mxu1 %v2659_v33  ;;  %v2671_v25 = vld [vmem:[#allocation6 + $0x4d0] sm:$0xff]  ;;  %v2676_v33 = vld [vmem:[#allocation6 + $0x560] sm:$0xff] }
 0x4af   : > { %1678 = vmatpush.msrb.mxu2 %v2660_v58  ;;  %1642 = vmatpush.msra.mxu0 %v2669_v24  ;;  %v2677_v58 = vld [vmem:[#allocation6 + $0x460] sm:$0xff]  ;;  %v2686_v24 = vld [vmem:[#allocation6 + $0x378] sm:$0xff] }
 0x4b0   : > { %1660 = vmatpush.msrb.mxu1 %v2662_v61  ;;  %1623 = vmatpush.msra.mxu3 %v2671_v25  ;;  %v2679_v61 = vld [vmem:[#allocation6 + $0x3e0] sm:$0xff]  ;;  %v2688_v25 = vld [vmem:[#allocation6 + $0x3f8] sm:$0xff] }
 0x4b1   : > { %1679 = vmatpush.msrb.mxu2 %v2664_v50  ;;  %1643 = vmatpush.msra.mxu0 %v2673_v46  ;;  %v2681_v50 = vld [vmem:[#allocation6 + $0x3e8] sm:$0xff]  ;;  %v2690_v46 = vld [vmem:[#allocation6 + $0x300] sm:$0xff] }
 0x4b2   : > { %1661 = vmatpush.msrb.mxu1 %v2666_v54  ;;  %1624 = vmatpush.msra.mxu3 %v2675_v53  ;;  %v2683_v54 = vld [vmem:[#allocation6 + $0x368] sm:$0xff]  ;;  %v2692_v53 = vld [vmem:[#allocation6 + $0x380] sm:$0xff] }
 0x4b3   : > { %1680 = vmatpush.msrb.mxu2 %v2668_v18  ;;  %1644 = vmatpush.msra.mxu0 %v2677_v58  ;;  %v2685_v18 = vld [vmem:[#allocation6 + $0x370] sm:$0xff]  ;;  %v2694_v58 = vld [vmem:[#allocation6 + $0x288] sm:$0xff] }
 0x4b4   : > { %1662 = vmatpush.msrb.mxu1 %v2670_v35  ;;  %1625 = vmatpush.msra.mxu3 %v2679_v61  ;;  %v2687_v35 = vld [vmem:[#allocation6 + $0x2f0] sm:$0xff]  ;;  %v2696_v61 = vld [vmem:[#allocation6 + $0x308] sm:$0xff] }
 0x4b5   : > { %1681 = vmatpush.msrb.mxu2 %v2672_v45  ;;  %1645 = vmatpush.msra.mxu0 %v2681_v50  ;;  %v2689_v45 = vld [vmem:[#allocation6 + $0x2f8] sm:$0xff]  ;;  %v2698_v50 = vld [vmem:[#allocation6 + $0x210] sm:$0xff] }
 0x4b6   : > { %1663 = vmatpush.msrb.mxu1 %v2674_v51  ;;  %1626 = vmatpush.msra.mxu3 %v2683_v54  ;;  %v2691_v51 = vld [vmem:[#allocation6 + $0x278] sm:$0xff]  ;;  %v2700_v54 = vld [vmem:[#allocation6 + $0x290] sm:$0xff] }
 0x4b7   : > { %1682 = vmatpush.msrb.mxu2 %v2676_v33  ;;  %1646 = vmatpush.msra.mxu0 %v2685_v18  ;;  %v2693_v33 = vld [vmem:[#allocation6 + $0x280] sm:$0xff]  ;;  %v2702_v18 = vld [vmem:[#allocation6 + $0x198] sm:$0xff] }
 0x4b8   : > { %1664 = vmatpush.msrb.mxu1 %v2678_v62  ;;  %1627 = vmatpush.msra.mxu3 %v2687_v35  ;;  %v2695_v62 = vld [vmem:[#allocation6 + $0x200] sm:$0xff]  ;;  %v2704_v35 = vld [vmem:[#allocation6 + $0x218] sm:$0xff] }
 0x4b9   : > { %1683 = vmatpush.msrb.mxu2 %v2680_v36  ;;  %1647 = vmatpush.msra.mxu0 %v2689_v45  ;;  %v2697_v36 = vld [vmem:[#allocation6 + $0x208] sm:$0xff]  ;;  %v2706_v45 = vld [vmem:[#allocation6 + $0x120] sm:$0xff] }
 0x4ba   : > { %1665 = vmatpush.msrb.mxu1 %v2682_v6  ;;  %1628 = vmatpush.msra.mxu3 %v2691_v51  ;;  %v2699_v6 = vld [vmem:[#allocation6 + $0x188] sm:$0xff]  ;;  %v2708_v51 = vld [vmem:[#allocation6 + $0x1a0] sm:$0xff] }
 0x4bb   : > { %1684 = vmatpush.msrb.mxu2 %v2684_v0  ;;  %1648 = vmatpush.msra.mxu0 %v2693_v33  ;;  %v2701_v0 = vld [vmem:[#allocation6 + $0x190] sm:$0xff]  ;;  %v2710_v33 = vld [vmem:[#allocation6 + $0xa8] sm:$0xff] }
 0x4bc   : > { %1666 = vmatpush.msrb.mxu1 %v2686_v24  ;;  %1629 = vmatpush.msra.mxu3 %v2695_v62  ;;  %v2703_v24 = vld [vmem:[#allocation6 + $0x110] sm:$0xff]  ;;  %v2712_v62 = vld [vmem:[#allocation6 + $0x128] sm:$0xff] }
 0x4bd   : > { %1685 = vmatpush.msrb.mxu2 %v2688_v25  ;;  %1649 = vmatpush.msra.mxu0 %v2697_v36  ;;  %v2705_v25 = vld [vmem:[#allocation6 + $0x118] sm:$0xff]  ;;  %v2714_v36 = vld [vmem:[#allocation6 + $0x30] sm:$0xff] }
 0x4be   : > { %1667 = vmatpush.msrb.mxu1 %v2690_v46  ;;  %1630 = vmatpush.msra.mxu3 %v2699_v6  ;;  %v2707_v46 = vld [vmem:[#allocation6 + $0x98] sm:$0xff] }
 0x4bf   : > { %1686 = vmatpush.msrb.mxu2 %v2692_v53  ;;  %1650 = vmatpush.msra.mxu0 %v2701_v0  ;;  %v2709_v53 = vld [vmem:[#allocation6 + $0xa0] sm:$0xff]  ;;  %v2716_v6 = vld [vmem:[#allocation6 + $0x38] sm:$0xff]  ;;  %v1423_v0 = vpop.f32.mrf.mxu2 }
 0x4c0   : > { %1668 = vmatpush.msrb.mxu1 %v2694_v58  ;;  %1631 = vmatpush.msra.mxu3 %v2703_v24  ;;  %v2711_v58 = vld [vmem:[#allocation6 + $0x20] sm:$0xff] }
 0x4c1   : > { %1687 = vmatpush.msrb.mxu2 %v2696_v61  ;;  %1651 = vmatpush.msra.mxu0 %v2705_v25  ;;  %v2713_v61 = vld [vmem:[#allocation6 + $0x28] sm:$0xff] }
 0x4c2   : > { %1669 = vmatpush.msrb.mxu1 %v2698_v50  ;;  %1632 = vmatpush.msra.mxu3 %v2707_v46  ;;  %v2715_v50 = vld [vmem:[#allocation6 + $0xb0] sm:$0xff] }
 0x4c3   : > { %1688 = vmatpush.msrb.mxu2 %v2700_v54  ;;  %1652 = vmatpush.msra.mxu0 %v2709_v53  ;;  %v3520_v54 = vld [vmem:[%s3690_s4] ss:$0 sm:$0xff] }
 0x4c4   : > { %1670 = vmatpush.msrb.mxu1 %v2702_v18  ;;  %1633 = vmatpush.msra.mxu3 %v2711_v58  ;;  %v1424_v18 = vadd.f32 %v3520_v54, %v1423_v0  ;;  %v2717_v58 = vld [vmem:[%s3246_s2] sm:$0xff] }
 0x4c5   : > { %1689 = vmatpush.msrb.mxu2 %v2704_v35  ;;  %1653 = vmatpush.msra.mxu0 %v2713_v61  ;;  %v722_v61 = vlaneseq }
 0x4c6   : > { %1671 = vmatpush.msrb.mxu1 %v2706_v45 }
 0x4c7   : > { %1690 = vmatpush.msrb.mxu2 %v2708_v51 }
 0x4c8   : > { %1672 = vmatpush.msrb.mxu1 %v2710_v33 }
 0x4c9   : > { %1691 = vmatpush.msrb.mxu2 %v2712_v62 }
 0x4ca   : > { %1673 = vmatpush.msrb.mxu1 %v2714_v36  ;;  %v3524_v36 = vand.u32 127, %v722_v61  ;;  %v2542_v61 = vld [vmem:[%s3692_s6] ss:$0 sm:$0xff] }
 0x4cb   : > { %1692 = vmatpush.msrb.mxu2 %v2715_v50 }
 0x4cc   : > { %vm724_vm6 = vcmp.lt.s32.totalorder %v3524_v36, 40  ;;  %v2543_v36 = vld [vmem:[%s3693_s7] ss:$0 sm:$0xff] }
 0x4cd   : > { %1693 = vmatpush.msrb.mxu2 %v2716_v6 }
 0x523   : > { %v1463_v25 = vpop.f32.mrf.mxu0 }
 0x526   : > { %v1443_v24 = vpop.f32.mrf.mxu3 }
 0x527   : > { %v1444_v35 = vadd.f32 %v1443_v24, %v1424_v18 }
 0x528   : > { %v1483_v46 = vpop.f32.mrf.mxu1 }
 0x529   : > { %v1464_v45 = vadd.f32 %v1463_v25, %v1444_v35 }
 0x52b   : > { %v1484_v51 = vadd.f32 %v1483_v46, %v1464_v45 }
 0x531   : > { %v1503_v53 = vpop.f32.mrf.mxu2 }
 0x532   : > { %v1504_v33 = vadd.f32 %v1503_v53, %v1484_v51 }
 0x534   : > { %v1506_v62 = vadd.f32 %v2717_v58, %v1504_v33 }
 0x536   : > { %1509 = vadd.xlane.f32.xlu1 %v1506_v62 }
 0x5a9   : > { %v1510_v50 = vpop.xlane.xlu1 %1509 }
 0x5aa   : > { %v1511_v6 = vmul.f32 0.025, %v1510_v50 }
 0x5ac   : > { %v1512_v29 = vsub.f32 %v1506_v62, %v1511_v6  ;;  %v2541_v62 = vld [vmem:[%s3691_s5] ss:$0 sm:$0xff] }
 0x5ae   : > { %v1513_v0 = vsel %vm724_vm6, %v1512_v29, 0.0 }
 0x5af   : > { %v1514_v18 = vmul.f32 %v1513_v0, %v1513_v0 }
 0x5b1   : > { %1515 = vadd.xlane.f32.xlu2 %v1514_v18 }
 0x624   : > { %v1516_v24 = vpop.xlane.xlu2 %1515 }
 0x625   : > { %v1517_v35 = vmul.f32 0.025, %v1516_v24  ;;  %v2718_v24 = vld [vmem:[#allocation6 + $0x748] sm:$0xff] }
 0x627   : > { %v1518_v25 = vadd.f32 1e-05, %v1517_v35  ;;  %v2719_v35 = vld [vmem:[#allocation6 + $0x750] sm:$0xff] }
 0x629   : > { %2565 = vrsqrt.f32 %v1518_v25  ;;  %vm1525_vm8 = vweird.f32 %v1518_v25 }
 0x62f   : > { %v2566_v45 = vpop.eup %2565 }
 0x630   : > { %v1520_v46 = vmul.f32 %v2566_v45, %v1518_v25  ;;  %vm1526_vm7 = vweird.f32 %v2566_v45  ;;  %v2720_v25 = vld [vmem:[#allocation6 + $0x758] sm:$0xff] }
 0x631   : > { %vm1527_vm9 = vmor %vm1525_vm8, %vm1526_vm7 }
 0x632   : > { %v1521_v51 = vmul.f32 %v2566_v45, %v1520_v46  ;;  %v2723_v46 = vld [vmem:[#allocation6 + $0x6d8] sm:$0xff] }
 0x634   : > { %v1522_v53 = vmul.f32 0.5, %v1521_v51  ;;  %v2724_v51 = vld [vmem:[#allocation6 + $0x6e0] sm:$0xff] }
 0x636   : > { %v1523_v33 = vsub.f32 1.5, %v1522_v53  ;;  %v2725_v53 = vld [vmem:[#allocation6 + $0x6e8] sm:$0xff] }
 0x638   : > { %v1524_v58 = vmul.f32 %v2566_v45, %v1523_v33  ;;  %v2726_v33 = vld [vmem:[#allocation6 + $0x658] sm:$0xff] }
 0x63a   : > { %v1528_v29 = vsel %vm1527_vm9, %v2566_v45, %v1524_v58  ;;  %v2721_v45 = vld [vmem:[#allocation6 + $0x760] sm:$0xff] }
 0x63b   : > { %v1529_v50 = vmul.f32 %v1528_v29, %v1513_v0  ;;  %v2722_v0 = vld [vmem:[#allocation6 + $0x6d0] sm:$0xff]  ;;  %v2727_v58 = vld [vmem:[#allocation6 + $0x660] sm:$0xff] }
 0x63c   : > { %v2729_v29 = vld [vmem:[#allocation6 + $0x670] sm:$0xff] }
 0x63d   : > { %v1533_v6 = vmul.f32 %v2541_v62, %v1529_v50  ;;  %v2728_v62 = vld [vmem:[#allocation6 + $0x668] sm:$0xff] }
 0x63e   : > { %v2731_v50 = vld [vmem:[#allocation6 + $0x5e8] sm:$0xff] }
 0x63f   : > { %v3535_v18 = vadd.f32 %v2542_v61, %v1533_v6  ;;  %v2730_v61 = vld [vmem:[#allocation6 + $0x5e0] sm:$0xff]  ;;  %v2732_v6 = vld [vmem:[#allocation6 + $0x5f0] sm:$0xff] }
 0x641   : > { %1554 = vmatmul.f32.vlgmr.msrb.gmra.mxu3 %v3535_v18  ;;  %1574 = vmatmul.f32.vlgmr.msrb.gmra.mxu0 %v3535_v18 }
 0x642   : > { %1594 = vmatmul.f32.vlgmr.msra.gmra.mxu1 %v3535_v18  ;;  %1614 = vmatmul.f32.vlgmr.msra.gmra.mxu2 %v3535_v18 }
 0x643   : > { %1698 = vmatpush.msrb.mxu3 %v2718_v24  ;;  %1718 = vmatpush.msrb.mxu0 %v2719_v35  ;;  %v2733_v24 = vld [vmem:[#allocation6 + $0x5f8] sm:$0xff]  ;;  %v2734_v35 = vld [vmem:[#allocation6 + $0x568] sm:$0xff] }
 0x644   : > { %1738 = vmatpush.msra.mxu1 %v2720_v25  ;;  %1758 = vmatpush.msra.mxu2 %v2721_v45  ;;  %v2735_v25 = vld [vmem:[#allocation6 + $0x570] sm:$0xff]  ;;  %v2736_v45 = vld [vmem:[#allocation6 + $0x578] sm:$0xff] }
 0x645   : > { %1699 = vmatpush.msrb.mxu3 %v2722_v0  ;;  %1719 = vmatpush.msrb.mxu0 %v2723_v46  ;;  %v2737_v0 = vld [vmem:[#allocation6 + $0x580] sm:$0xff]  ;;  %v2738_v46 = vld [vmem:[#allocation6 + $0x4f0] sm:$0xff] }
 0x646   : > { %1739 = vmatpush.msra.mxu1 %v2724_v51  ;;  %1759 = vmatpush.msra.mxu2 %v2725_v53  ;;  %v2739_v51 = vld [vmem:[#allocation6 + $0x4f8] sm:$0xff]  ;;  %v2740_v53 = vld [vmem:[#allocation6 + $0x500] sm:$0xff] }
 0x647   : > { %1700 = vmatpush.msrb.mxu3 %v2726_v33  ;;  %1720 = vmatpush.msrb.mxu0 %v2727_v58  ;;  %v2741_v33 = vld [vmem:[#allocation6 + $0x508] sm:$0xff]  ;;  %v2742_v58 = vld [vmem:[#allocation6 + $0x478] sm:$0xff] }
 0x648   : > { %1740 = vmatpush.msra.mxu1 %v2728_v62  ;;  %1760 = vmatpush.msra.mxu2 %v2729_v29  ;;  %v2743_v62 = vld [vmem:[#allocation6 + $0x480] sm:$0xff]  ;;  %v2744_v29 = vld [vmem:[#allocation6 + $0x488] sm:$0xff] }
 0x649   : > { %1701 = vmatpush.msrb.mxu3 %v2730_v61  ;;  %1721 = vmatpush.msrb.mxu0 %v2731_v50  ;;  %v2745_v61 = vld [vmem:[#allocation6 + $0x490] sm:$0xff]  ;;  %v2746_v50 = vld [vmem:[#allocation6 + $0x400] sm:$0xff] }
 0x64a   : > { %1741 = vmatpush.msra.mxu1 %v2732_v6  ;;  %1761 = vmatpush.msra.mxu2 %v2733_v24  ;;  %v2747_v6 = vld [vmem:[#allocation6 + $0x408] sm:$0xff]  ;;  %v2748_v24 = vld [vmem:[#allocation6 + $0x410] sm:$0xff] }
 0x64b   : > { %1634 = vmatmul.f32.vlgmr.msra.gmra.mxu3 %v3535_v18  ;;  %1654 = vmatmul.f32.vlgmr.msra.gmra.mxu0 %v3535_v18 }
 0x64c   : > { %1674 = vmatmul.f32.vlgmr.msrb.gmra.mxu1 %v3535_v18  ;;  %1694 = vmatmul.f32.vlgmr.msrb.gmra.mxu2 %v3535_v18 }
 0x64d   : > { %1702 = vmatpush.msrb.mxu3 %v2734_v35  ;;  %1722 = vmatpush.msrb.mxu0 %v2735_v25  ;;  %v2749_v35 = vld [vmem:[#allocation6 + $0x418] sm:$0xff]  ;;  %v2750_v25 = vld [vmem:[#allocation6 + $0x388] sm:$0xff] }
 0x64e   : > { %1742 = vmatpush.msra.mxu1 %v2736_v45  ;;  %1762 = vmatpush.msra.mxu2 %v2737_v0  ;;  %v2751_v45 = vld [vmem:[#allocation6 + $0x390] sm:$0xff]  ;;  %v2752_v0 = vld [vmem:[#allocation6 + $0x398] sm:$0xff] }
 0x64f   : > { %1703 = vmatpush.msrb.mxu3 %v2738_v46  ;;  %1723 = vmatpush.msrb.mxu0 %v2739_v51  ;;  %v2753_v46 = vld [vmem:[#allocation6 + $0x3a0] sm:$0xff]  ;;  %v2754_v51 = vld [vmem:[#allocation6 + $0x310] sm:$0xff] }
 0x650   : > { %1743 = vmatpush.msra.mxu1 %v2740_v53  ;;  %1763 = vmatpush.msra.mxu2 %v2741_v33  ;;  %v2755_v53 = vld [vmem:[#allocation6 + $0x318] sm:$0xff]  ;;  %v2756_v33 = vld [vmem:[#allocation6 + $0x320] sm:$0xff] }
 0x651   : > { %1704 = vmatpush.msrb.mxu3 %v2742_v58  ;;  %1724 = vmatpush.msrb.mxu0 %v2743_v62  ;;  %v2757_v58 = vld [vmem:[#allocation6 + $0x328] sm:$0xff]  ;;  %v2758_v62 = vld [vmem:[#allocation6 + $0x298] sm:$0xff] }
 0x652   : > { %1744 = vmatpush.msra.mxu1 %v2744_v29  ;;  %1764 = vmatpush.msra.mxu2 %v2745_v61  ;;  %v2759_v29 = vld [vmem:[#allocation6 + $0x2a0] sm:$0xff]  ;;  %v2760_v61 = vld [vmem:[#allocation6 + $0x2a8] sm:$0xff] }
 0x653   : > { %1705 = vmatpush.msrb.mxu3 %v2746_v50  ;;  %1725 = vmatpush.msrb.mxu0 %v2747_v6  ;;  %v2761_v50 = vld [vmem:[#allocation6 + $0x2b0] sm:$0xff]  ;;  %v2762_v6 = vld [vmem:[#allocation6 + $0x220] sm:$0xff] }
 0x654   : > { %1745 = vmatpush.msra.mxu1 %v2748_v24  ;;  %1765 = vmatpush.msra.mxu2 %v2749_v35  ;;  %v2763_v24 = vld [vmem:[#allocation6 + $0x228] sm:$0xff]  ;;  %v2764_v35 = vld [vmem:[#allocation6 + $0x230] sm:$0xff] }
 0x655   : > { %1706 = vmatpush.msrb.mxu3 %v2750_v25  ;;  %1726 = vmatpush.msrb.mxu0 %v2751_v45  ;;  %v2765_v25 = vld [vmem:[#allocation6 + $0x238] sm:$0xff]  ;;  %v2766_v45 = vld [vmem:[#allocation6 + $0x1a8] sm:$0xff] }
 0x656   : > { %1746 = vmatpush.msra.mxu1 %v2752_v0  ;;  %1766 = vmatpush.msra.mxu2 %v2753_v46  ;;  %v2767_v0 = vld [vmem:[#allocation6 + $0x1b0] sm:$0xff]  ;;  %v2768_v46 = vld [vmem:[#allocation6 + $0x1b8] sm:$0xff] }
 0x657   : > { %1707 = vmatpush.msrb.mxu3 %v2754_v51  ;;  %1727 = vmatpush.msrb.mxu0 %v2755_v53  ;;  %v2769_v51 = vld [vmem:[#allocation6 + $0x1c0] sm:$0xff]  ;;  %v2770_v53 = vld [vmem:[#allocation6 + $0x130] sm:$0xff] }
 0x658   : > { %1747 = vmatpush.msra.mxu1 %v2756_v33  ;;  %1767 = vmatpush.msra.mxu2 %v2757_v58  ;;  %v2771_v33 = vld [vmem:[#allocation6 + $0x138] sm:$0xff]  ;;  %v2772_v58 = vld [vmem:[#allocation6 + $0x140] sm:$0xff] }
 0x659   : > { %1708 = vmatpush.msrb.mxu3 %v2758_v62  ;;  %1728 = vmatpush.msrb.mxu0 %v2759_v29  ;;  %v2773_v62 = vld [vmem:[#allocation6 + $0x148] sm:$0xff]  ;;  %v2774_v29 = vld [vmem:[#allocation6 + $0xb8] sm:$0xff] }
 0x65a   : > { %1748 = vmatpush.msra.mxu1 %v2760_v61  ;;  %1768 = vmatpush.msra.mxu2 %v2761_v50  ;;  %v2775_v61 = vld [vmem:[#allocation6 + $0xc0] sm:$0xff]  ;;  %v2776_v50 = vld [vmem:[#allocation6 + $0xc8] sm:$0xff] }
 0x65b   : > { %1709 = vmatpush.msrb.mxu3 %v2762_v6  ;;  %1729 = vmatpush.msrb.mxu0 %v2763_v24  ;;  %v2777_v6 = vld [vmem:[#allocation6 + $0xd0] sm:$0xff]  ;;  %v2778_v24 = vld [vmem:[#allocation6 + $0x40] sm:$0xff] }
 0x65c   : > { %1749 = vmatpush.msra.mxu1 %v2764_v35  ;;  %1769 = vmatpush.msra.mxu2 %v2765_v25  ;;  %v2779_v35 = vld [vmem:[#allocation6 + $0x48] sm:$0xff]  ;;  %v2780_v25 = vld [vmem:[#allocation6 + $0x50] sm:$0xff] }
 0x65d   : > { %1710 = vmatpush.msrb.mxu3 %v2766_v45  ;;  %1730 = vmatpush.msrb.mxu0 %v2767_v0  ;;  %v2781_v45 = vld [vmem:[#allocation6 + $0x58] sm:$0xff]  ;;  %v2782_v0 = vld [vmem:[#allocation6 + $0x768] sm:$0xff] }
 0x65e   : > { %1750 = vmatpush.msra.mxu1 %v2768_v46  ;;  %1770 = vmatpush.msra.mxu2 %v2769_v51  ;;  %v2783_v46 = vld [vmem:[#allocation6 + $0x770] sm:$0xff]  ;;  %v2784_v51 = vld [vmem:[#allocation6 + $0x778] sm:$0xff] }
 0x65f   : > { %1711 = vmatpush.msrb.mxu3 %v2770_v53  ;;  %1731 = vmatpush.msrb.mxu0 %v2771_v33  ;;  %v2785_v53 = vld [vmem:[#allocation6 + $0x6f0] sm:$0xff]  ;;  %v2786_v33 = vld [vmem:[#allocation6 + $0x6f8] sm:$0xff] }
 0x660   : > { %1751 = vmatpush.msra.mxu1 %v2772_v58  ;;  %1771 = vmatpush.msra.mxu2 %v2773_v62  ;;  %v2787_v58 = vld [vmem:[#allocation6 + $0x700] sm:$0xff]  ;;  %v2788_v62 = vld [vmem:[#allocation6 + $0x678] sm:$0xff] }
 0x661   : > { %1712 = vmatpush.msrb.mxu3 %v2774_v29  ;;  %1732 = vmatpush.msrb.mxu0 %v2775_v61  ;;  %v2789_v29 = vld [vmem:[#allocation6 + $0x680] sm:$0xff]  ;;  %v2790_v61 = vld [vmem:[#allocation6 + $0x688] sm:$0xff] }
 0x662   : > { %1752 = vmatpush.msra.mxu1 %v2776_v50  ;;  %1772 = vmatpush.msra.mxu2 %v2777_v6  ;;  %v2791_v50 = vld [vmem:[#allocation6 + $0x600] sm:$0xff]  ;;  %v2792_v6 = vld [vmem:[#allocation6 + $0x608] sm:$0xff] }
 0x663   : > { %1713 = vmatpush.msrb.mxu3 %v2778_v24  ;;  %1733 = vmatpush.msrb.mxu0 %v2779_v35  ;;  %v2793_v24 = vld [vmem:[#allocation6 + $0x610] sm:$0xff]  ;;  %v2794_v35 = vld [vmem:[#allocation6 + $0x588] sm:$0xff] }
 0x664   : > { %1753 = vmatpush.msra.mxu1 %v2780_v25  ;;  %1773 = vmatpush.msra.mxu2 %v2781_v45  ;;  %v2795_v25 = vld [vmem:[#allocation6 + $0x590] sm:$0xff]  ;;  %v2796_v45 = vld [vmem:[#allocation6 + $0x598] sm:$0xff] }
 0x665   : > { %1714 = vmatmul.f32.vlgmr.msrb.gmra.mxu3 %v3535_v18  ;;  %1734 = vmatmul.f32.vlgmr.msrb.gmra.mxu0 %v3535_v18 }
 0x666   : > { %1754 = vmatmul.f32.vlgmr.msra.gmra.mxu1 %v3535_v18  ;;  %1774 = vmatmul.f32.vlgmr.msra.gmra.mxu2 %v3535_v18 }
 0x667   : > { %1778 = vmatpush.msra.mxu3 %v2782_v0  ;;  %1798 = vmatpush.msra.mxu0 %v2783_v46  ;;  %v2797_v0 = vld [vmem:[#allocation6 + $0x510] sm:$0xff]  ;;  %v2798_v46 = vld [vmem:[#allocation6 + $0x518] sm:$0xff] }
 0x668   : > { %1818 = vmatpush.msrb.mxu1 %v2784_v51  ;;  %v2799_v51 = vld [vmem:[#allocation6 + $0x520] sm:$0xff] }
 0x669   : > { %1779 = vmatpush.msra.mxu3 %v2785_v53  ;;  %1799 = vmatpush.msra.mxu0 %v2786_v33  ;;  %v2800_v53 = vld [vmem:[#allocation6 + $0x498] sm:$0xff]  ;;  %v2801_v33 = vld [vmem:[#allocation6 + $0x4a0] sm:$0xff] }
 0x66a   : > { %1819 = vmatpush.msrb.mxu1 %v2787_v58  ;;  %v2802_v58 = vld [vmem:[#allocation6 + $0x4a8] sm:$0xff] }
 0x66b   : > { %1780 = vmatpush.msra.mxu3 %v2788_v62  ;;  %1800 = vmatpush.msra.mxu0 %v2789_v29  ;;  %v2803_v62 = vld [vmem:[#allocation6 + $0x420] sm:$0xff]  ;;  %v2804_v29 = vld [vmem:[#allocation6 + $0x428] sm:$0xff] }
 0x66c   : > { %1820 = vmatpush.msrb.mxu1 %v2790_v61  ;;  %v2805_v61 = vld [vmem:[#allocation6 + $0x430] sm:$0xff] }
 0x66d   : > { %1781 = vmatpush.msra.mxu3 %v2791_v50  ;;  %1801 = vmatpush.msra.mxu0 %v2792_v6  ;;  %v2806_v50 = vld [vmem:[#allocation6 + $0x3a8] sm:$0xff]  ;;  %v2807_v6 = vld [vmem:[#allocation6 + $0x3b0] sm:$0xff] }
 0x66e   : > { %1821 = vmatpush.msrb.mxu1 %v2793_v24  ;;  %v2808_v24 = vld [vmem:[#allocation6 + $0x3b8] sm:$0xff] }
 0x66f   : > { %1782 = vmatpush.msra.mxu3 %v2794_v35  ;;  %1802 = vmatpush.msra.mxu0 %v2795_v25  ;;  %v2809_v35 = vld [vmem:[#allocation6 + $0x330] sm:$0xff]  ;;  %v2810_v25 = vld [vmem:[#allocation6 + $0x338] sm:$0xff] }
 0x670   : > { %1822 = vmatpush.msrb.mxu1 %v2796_v45  ;;  %v2811_v45 = vld [vmem:[#allocation6 + $0x340] sm:$0xff] }
 0x671   : > { %1783 = vmatpush.msra.mxu3 %v2797_v0  ;;  %1803 = vmatpush.msra.mxu0 %v2798_v46  ;;  %v2812_v0 = vld [vmem:[#allocation6 + $0x2b8] sm:$0xff]  ;;  %v2813_v46 = vld [vmem:[#allocation6 + $0x2c0] sm:$0xff] }
 0x672   : > { %1823 = vmatpush.msrb.mxu1 %v2799_v51  ;;  %v2814_v51 = vld [vmem:[#allocation6 + $0x2c8] sm:$0xff] }
 0x673   : > { %1784 = vmatpush.msra.mxu3 %v2800_v53  ;;  %1804 = vmatpush.msra.mxu0 %v2801_v33  ;;  %v2815_v53 = vld [vmem:[#allocation6 + $0x240] sm:$0xff]  ;;  %v2816_v33 = vld [vmem:[#allocation6 + $0x248] sm:$0xff] }
 0x674   : > { %1824 = vmatpush.msrb.mxu1 %v2802_v58  ;;  %v2817_v58 = vld [vmem:[#allocation6 + $0x250] sm:$0xff] }
 0x675   : > { %1785 = vmatpush.msra.mxu3 %v2803_v62  ;;  %1805 = vmatpush.msra.mxu0 %v2804_v29  ;;  %v2818_v62 = vld [vmem:[#allocation6 + $0x1c8] sm:$0xff]  ;;  %v2819_v29 = vld [vmem:[#allocation6 + $0x1d0] sm:$0xff] }
 0x676   : > { %1825 = vmatpush.msrb.mxu1 %v2805_v61  ;;  %v2820_v61 = vld [vmem:[#allocation6 + $0x1d8] sm:$0xff] }
 0x677   : > { %1786 = vmatpush.msra.mxu3 %v2806_v50  ;;  %1806 = vmatpush.msra.mxu0 %v2807_v6  ;;  %v2821_v50 = vld [vmem:[#allocation6 + $0x150] sm:$0xff]  ;;  %v2822_v6 = vld [vmem:[#allocation6 + $0x158] sm:$0xff] }
 0x678   : > { %1826 = vmatpush.msrb.mxu1 %v2808_v24  ;;  %v2823_v24 = vld [vmem:[#allocation6 + $0x160] sm:$0xff] }
 0x679   : > { %1787 = vmatpush.msra.mxu3 %v2809_v35  ;;  %1807 = vmatpush.msra.mxu0 %v2810_v25  ;;  %v2824_v35 = vld [vmem:[#allocation6 + $0xd8] sm:$0xff]  ;;  %v2825_v25 = vld [vmem:[#allocation6 + $0xe0] sm:$0xff] }
 0x67a   : > { %1827 = vmatpush.msrb.mxu1 %v2811_v45  ;;  %v2826_v45 = vld [vmem:[#allocation6 + $0xe8] sm:$0xff] }
 0x67b   : > { %1788 = vmatpush.msra.mxu3 %v2812_v0  ;;  %1808 = vmatpush.msra.mxu0 %v2813_v46  ;;  %v2827_v0 = vld [vmem:[#allocation6 + $0x60] sm:$0xff]  ;;  %v2828_v46 = vld [vmem:[#allocation6 + $0x68] sm:$0xff] }
 0x67c   : > { %1828 = vmatpush.msrb.mxu1 %v2814_v51  ;;  %v2829_v51 = vld [vmem:[#allocation6 + $0x70] sm:$0xff] }
 0x67d   : > { %1789 = vmatpush.msra.mxu3 %v2815_v53  ;;  %1809 = vmatpush.msra.mxu0 %v2816_v33 }
 0x67e   : > { %1829 = vmatpush.msrb.mxu1 %v2817_v58 }
 0x67f   : > { %1790 = vmatpush.msra.mxu3 %v2818_v62  ;;  %1810 = vmatpush.msra.mxu0 %v2819_v29 }
 0x680   : > { %1830 = vmatpush.msrb.mxu1 %v2820_v61 }
 0x681   : > { %1791 = vmatpush.msra.mxu3 %v2821_v50  ;;  %1811 = vmatpush.msra.mxu0 %v2822_v6 }
 0x682   : > { %1831 = vmatpush.msrb.mxu1 %v2823_v24 }
 0x683   : > { %1792 = vmatpush.msra.mxu3 %v2824_v35  ;;  %1812 = vmatpush.msra.mxu0 %v2825_v25 }
 0x684   : > { %1832 = vmatpush.msrb.mxu1 %v2826_v45 }
 0x685   : > { %1793 = vmatpush.msra.mxu3 %v2827_v0  ;;  %1813 = vmatpush.msra.mxu0 %v2828_v46 }
 0x686   : > { %1833 = vmatpush.msrb.mxu1 %v2829_v51  ;;  %1794 = vmatmul.f32.vlgmr.msra.gmra.mxu3 %v3535_v18 }
 0x687   : > { %1814 = vmatmul.f32.vlgmr.msra.gmra.mxu0 %v3535_v18  ;;  %1834 = vmatmul.f32.vlgmr.msrb.gmra.mxu1 %v3535_v18 }
 0x6be   : > { %v3552_v53 = vpop.f32.mrf.mxu0 }
 0x6bf   : > { %v1595_v24 = vpop.f32.mrf.mxu1 }
 0x6c0   : > { %v1596_v35 = vadd.f32 %v1595_v24, %v729_v55  ;;  %v2830_v55 = vld [vmem:[#allocation9 + $0x178] sm:$0xff]  ;;  %v2837_v24 = vld [vmem:[#allocation9 + $0x68] sm:$0xff] }
 0x6c4   : > { %v1555_v62 = vpop.f32.mrf.mxu3 }
 0x6c5   : > { %v1615_v33 = vpop.f32.mrf.mxu2  ;;  %v1556_v61 = vadd.f32 %v1555_v62, %v727_v22 }
 0x6c8   : > { %v1655_v58 = vpop.f32.mrf.mxu0 }
 0x6c9   : > { %v1656_v29 = vadd.f32 %v1655_v58, %v732_v21  ;;  %v1675_v25 = vpop.f32.mrf.mxu1 }
 0x6ca   : > { %v1676_v51 = vadd.f32 %v1675_v25, %v733_v59  ;;  %v2832_v59 = vld [vmem:[#allocation9 + $0x168] sm:$0xff]  ;;  %v2840_v25 = vld [vmem:[#allocation9 + $0x58] sm:$0xff] }
 0x6cb   : > { %1853 = vmatpush.xpose.msrb.mxu2 %v1656_v29  ;;  %v2831_v29 = vld [vmem:[#allocation9 + $0x170] sm:$0xff] }
 0x6ce   : > { %1854 = vmatmul.f32.vlgmr.msrb.gmra.mxu2 %v1556_v61  ;;  %v1635_v45 = vpop.f32.mrf.mxu3  ;;  %v2833_v61 = vld [vmem:[#allocation9 + $0x78] sm:$0xff] }
 0x6cf   : > { %v1695_v50 = vpop.f32.mrf.mxu2 }
 0x6d0   : > { %v1696_v6 = vadd.f32 %v1695_v50, %v734_v52  ;;  %v1636_v52 = vadd.f32 %v1635_v45, %v731_v1  ;;  %v1616_v1 = vadd.f32 %v1615_v33, %v730_v44  ;;  %v2834_v50 = vld [vmem:[#allocation9 + $0x160] sm:$0xff]  ;;  %v2841_v44 = vld [vmem:[#allocation9 + $0x50] sm:$0xff]  ;;  %v2842_v33 = vld [vmem:[#allocation9 + $0x48] sm:$0xff] }
 0x6d1   : > { %v2843_v45 = vld [vmem:[#allocation9 + $0x40] sm:$0xff] }
 0x6d2   : > { %1989 = vmatpush.xpose.msra.mxu2 %v1696_v6  ;;  %v2835_v6 = vld [vmem:[#allocation9 + $0x70] sm:$0xff] }
 0x6d6   : > { %1990 = vmatmul.f32.vlgmr.msra.gmra.mxu2 %v1596_v35  ;;  %v2838_v35 = vld [vmem:[#allocation9 + $0x150] sm:$0xff] }
 0x6e2   : > { %v1735_v0 = vpop.f32.mrf.mxu0 }
 0x6e3   : > { %v1736_v21 = vadd.f32 %v1735_v0, %v736_v63  ;;  %v1755_v46 = vpop.f32.mrf.mxu1  ;;  %v2844_v0 = vld [vmem:[#allocation9 + $0x38] sm:$0xff] }
 0x6e4   : > { %v1756_v22 = vadd.f32 %v1755_v46, %v737_v60  ;;  %v2851_v46 = vld [vmem:[#allocation9] sm:$0xff] }
 0x6e5   : > { %2125 = vmatpush.xpose.msrb.mxu2 %v1736_v21  ;;  %v2848_v21 = vld [vmem:[#allocation9 + $0x18] sm:$0xff] }
 0x6e6   : > { %1900 = vmatpush.msrb.mxu3 %v1756_v22  ;;  %v2853_v22 = vld [vmem:[#allocation9 + $0x270] sm:$0xff] }
 0x6e8   : > { %1921 = vmatpush.xpose.msra.mxu3 %v1676_v51  ;;  %v1715_v58 = vpop.f32.mrf.mxu3  ;;  %2126 = vmatmul.f32.vlgmr.msrb.gmra.mxu2 %v1636_v52  ;;  %v2855_v51 = vld [vmem:[#allocation9 + $0x260] sm:$0xff]  ;;  %v2857_v52 = vld [vmem:[#allocation9 + $0x250] sm:$0xff] }
 0x6e9   : > { %2223 = vmatpush.msra.mxu2 %v2830_v55  ;;  %v1716_v63 = vadd.f32 %v1715_v58, %v735_v43  ;;  %v1775_v62 = vpop.f32.mrf.mxu2  ;;  %v2836_v43 = vld [vmem:[#allocation9 + $0x158] sm:$0xff] }
 0x6ea   : > { %v1776_v60 = vadd.f32 %v1775_v62, %v738_v57  ;;  %v2839_v57 = vld [vmem:[#allocation9 + $0x60] sm:$0xff] }
 0x6eb   : > { %2224 = vmatpush.msra.mxu2 %v2831_v29  ;;  %2057 = vmatpush.xpose.msrb.mxu0 %v1716_v63 }
 0x6ec   : > { %1968 = vmatpush.msra.mxu1 %v1776_v60 }
 0x6ed   : > { %2225 = vmatpush.msra.mxu2 %v2832_v59 }
 0x6ee   : > { %2058 = vmatmul.f32.vlgmr.msrb.gmra.mxu0 %v1616_v1 }
 0x6ef   : > { %2183 = vmatpush.msra.mxu0 %v2833_v61  ;;  %2226 = vmatpush.msra.mxu2 %v2834_v50 }
 0x6f1   : > { %2184 = vmatpush.msra.mxu0 %v2835_v6  ;;  %2227 = vmatpush.msra.mxu2 %v2836_v43 }
 0x6f3   : > { %2185 = vmatpush.msra.mxu0 %v2837_v24  ;;  %2228 = vmatpush.msra.mxu2 %v2838_v35 }
 0x6f5   : > { %2186 = vmatpush.msra.mxu0 %v2839_v57  ;;  %2229 = vmatpush.msra.mxu2 %v3385_v37  ;;  %v2845_v37 = vld [vmem:[#allocation9 + $0x30] sm:$0xff] }
 0x6f7   : > { %2187 = vmatpush.msra.mxu0 %v2840_v25  ;;  %2230 = vmatpush.msra.mxu2 %v3391_v47  ;;  %v2846_v47 = vld [vmem:[#allocation9 + $0x28] sm:$0xff] }
 0x6f9   : > { %2188 = vmatpush.msra.mxu0 %v2841_v44  ;;  %2231 = vmatpush.msra.mxu2 %v3403_v2  ;;  %v2847_v2 = vld [vmem:[#allocation9 + $0x20] sm:$0xff] }
 0x6fb   : > { %2189 = vmatpush.msra.mxu0 %v2842_v33  ;;  %2232 = vmatpush.msra.mxu2 %v3415_v5 }
 0x6fd   : > { %2190 = vmatpush.msra.mxu0 %v2843_v45  ;;  %2233 = vmatpush.msra.mxu2 %v3421_v19 }
 0x6ff   : > { %2191 = vmatpush.msra.mxu0 %v2844_v0  ;;  %2234 = vmatpush.msra.mxu2 %v3430_v14  ;;  %v2849_v14 = vld [vmem:[#allocation9 + $0x10] sm:$0xff] }
 0x701   : > { %2192 = vmatpush.msra.mxu0 %v2845_v37  ;;  %2235 = vmatpush.msra.mxu2 %v3439_v41  ;;  %v2850_v41 = vld [vmem:[#allocation9 + $0x8] sm:$0xff] }
 0x703   : > { %2193 = vmatpush.msra.mxu0 %v2846_v47  ;;  %2236 = vmatpush.msra.mxu2 %v3456_v8  ;;  %v2852_v8 = vld [vmem:[#allocation9 + $0x278] sm:$0xff] }
 0x704   : > { %v1815_v5 = vpop.f32.mrf.mxu0 }
 0x705   : > { %2194 = vmatpush.msra.mxu0 %v2847_v2  ;;  %2237 = vmatpush.msra.mxu2 %v3478_v27  ;;  %v1816_v19 = vadd.f32 %v1815_v5, %v740_v7  ;;  %v2854_v27 = vld [vmem:[#allocation9 + $0x268] sm:$0xff]  ;;  %v2856_v7 = vld [vmem:[#allocation9 + $0x258] sm:$0xff]  ;;  %v1835_v2 = vpop.f32.mrf.mxu1 }
 0x707   : > { %2195 = vmatpush.msra.mxu0 %v2848_v21  ;;  %2238 = vmatpush.msra.mxu2 %v3487_v31 }
 0x708   : > { %2104 = vmatpush.msrb.mxu1 %v1816_v19  ;;  %v1576_v19 = vadd.f32 %v3552_v53, %v728_v9  ;;  %v2858_v9 = vld [vmem:[#allocation9 + $0x1f8] sm:$0xff]  ;;  %v2860_v53 = vld [vmem:[#allocation9 + $0x1e8] sm:$0xff] }
 0x709   : > { %2196 = vmatpush.msra.mxu0 %v2849_v14  ;;  %v1795_v25 = vpop.f32.mrf.mxu3  ;;  %v3713_v14 = vperm.slane %v3286_v40, 6  ;;  %v2859_v40 = vld [vmem:[#allocation9 + $0x1f0] sm:$0xff] }
 0x70a   : > { %v1796_v37 = vadd.f32 %v1795_v25, %v739_v30 }
 0x70b   : > { %2197 = vmatpush.msra.mxu0 %v2850_v41  ;;  %v1836_v41 = vadd.f32 %v1835_v2, %v3713_v14 }
 0x70d   : > { %2198 = vmatpush.msra.mxu0 %v2851_v46 }
 0x70f   : > { %2263 = vmatpush.msrb.mxu0 %v2852_v8 }
 0x711   : > { %2264 = vmatpush.msrb.mxu0 %v2853_v22 }
 0x713   : > { %2265 = vmatpush.msrb.mxu0 %v2854_v27 }
 0x715   : > { %2266 = vmatpush.msrb.mxu0 %v2855_v51 }
 0x717   : > { %2267 = vmatpush.msrb.mxu0 %v2856_v7 }
 0x719   : > { %2268 = vmatpush.msrb.mxu0 %v2857_v52  ;;  %v2861_v52 = vld [vmem:[#allocation9 + $0x1e0] sm:$0xff] }
 0x71b   : > { %2269 = vmatpush.msrb.mxu0 %v3411_v4 }
 0x71d   : > { %2270 = vmatpush.msrb.mxu0 %v3418_v16 }
 0x71f   : > { %2271 = vmatpush.msrb.mxu0 %v3426_v26 }
 0x721   : > { %2272 = vmatpush.msrb.mxu0 %v3450_v12 }
 0x723   : > { %2273 = vmatpush.msrb.mxu0 %v3483_v15 }
 0x725   : > { %2274 = vmatpush.msrb.mxu0 %v3491_v34 }
 0x727   : > { %2275 = vmatpush.msrb.mxu0 %v3497_v39 }
 0x729   : > { %2276 = vmatpush.msrb.mxu0 %v3503_v56 }
 0x72b   : > { %2277 = vmatpush.msrb.mxu0 %v3509_v49 }
 0x72d   : > { %2278 = vmatpush.msrb.mxu0 %v3514_v13 }
 0x751   : > { %v1855_v31 = vpop.f32.mrf.mxu2 }
 0x752   : > { %v1858_v4 = vsel %vm1077_vm0, %v1855_v31, -inf }
 0x753   : > { %1859 = vmax.xlane.f32.xlu0 %v1858_v4  ;;  %v2863_v4 = vld [vmem:[#allocation9 + $0x1d0] sm:$0xff] }
 0x759   : > { %v1991_v16 = vpop.f32.mrf.mxu2 }
 0x75a   : > { %v1994_v26 = vsel %vm1077_vm0, %v1991_v16, -inf }
 0x75b   : > { %1995 = vmax.xlane.f32.xlu0 %v1994_v26 }
 0x76b   : > { %v3601_v13 = vpop.f32.mrf.mxu0 }
 0x76c   : > { %v2062_v63 = vsel %vm1077_vm0, %v3601_v13, -inf }
 0x7c6   : > { %v1860_v12 = vpop.xlane.xlu0 %1859 }
 0x7c7   : > { %v1861_v15 = vsub.f32 %v1855_v31, %v1860_v12  ;;  %v2862_v31 = vld [vmem:[#allocation9 + $0x1d8] sm:$0xff] }
 0x7c9   : > { %v1862_v55 = vmul.f32 1.442695, %v1861_v15 }
 0x7cb   : > { %2567 = vpow2.f32 %v1862_v55 }
 0x7ce   : > { %v1996_v34 = vpop.xlane.xlu0 %1995 }
 0x7cf   : > { %v1997_v58 = vsub.f32 %v1991_v16, %v1996_v34 }
 0x7d1   : > { %v2568_v39 = vpop.eup %2567  ;;  %v1998_v49 = vmul.f32 1.442695, %v1997_v58 }
 0x7d2   : > { %v1864_v56 = vsel %vm1077_vm0, %v2568_v39, 0.0 }
 0x7d3   : > { %1865 = vadd.xlane.f32.xlu1 %v1864_v56  ;;  %2569 = vpow2.f32 %v1998_v49 }
 0x7d9   : > { %v2570_v62 = vpop.eup %2569 }
 0x7da   : > { %v2000_v29 = vsel %vm1077_vm0, %v2570_v62, 0.0 }
 0x7db   : > { %2063 = vmax.xlane.f32.xlu1 %v2062_v63 }
 0x7e3   : > { %2001 = vadd.xlane.f32.xlu1 %v2000_v29 }
 0x846   : > { %v1866_v60 = vpop.xlane.xlu1 %1865 }
 0x847   : > { %2571 = vrcp.f32 %v1866_v60  ;;  %v1878_v6 = vand.u32 2147483648, %v1866_v60  ;;  %v1876_v24 = vand.u32 2147483647, %v1866_v60  ;;  %vm1872_vm11 = vweird.f32 %v1866_v60 }
 0x849   : > { %v1879_v57 = vor.u32 1.1754944e-38, %v1878_v6  ;;  %vm1877_vm13 = vcmp.eq.f32.partialorder %v1876_v24, 8.507059e+37 }
 0x84d   : > { %v2572_v59 = vpop.eup %2571 }
 0x84e   : > { %v1868_v1 = vmul.f32 %v2572_v59, %v1866_v60  ;;  %v3606_v61 = vpop.xlane.xlu1 %2063  ;;  %vm1873_vm10 = vweird.f32 %v2572_v59 }
 0x84f   : > { %vm1874_vm12 = vmor %vm1872_vm11, %vm1873_vm10 }
 0x850   : > { %v1869_v50 = vsub.f32 1.0, %v1868_v1 }
 0x852   : > { %v1870_v43 = vmul.f32 %v2572_v59, %v1869_v50 }
 0x854   : > { %v1871_v35 = vadd.f32 %v2572_v59, %v1870_v43 }
 0x856   : > { %v1875_v44 = vsel %vm1874_vm12, %v2572_v59, %v1871_v35  ;;  %v2002_v33 = vpop.xlane.xlu1 %2001 }
 0x857   : > { %v1880_v45 = vsel %vm1877_vm13, %v1879_v57, %v1875_v44  ;;  %2573 = vrcp.f32 %v2002_v33  ;;  %v2014_v46 = vand.u32 2147483648, %v2002_v33  ;;  %v2012_v22 = vand.u32 2147483647, %v2002_v33 }
 0x858   : > { %v1881_v0 = vmul.f32 %v2568_v39, %v1880_v45  ;;  %vm2008_vm15 = vweird.f32 %v2002_v33 }
 0x859   : > { %v2015_v27 = vor.u32 1.1754944e-38, %v2014_v46  ;;  %vm2013_vm2 = vcmp.eq.f32.partialorder %v2012_v22, 8.507059e+37  ;;  %v2864_v22 = vld [vmem:[#allocation9 + $0xf8] sm:$0xff] }
 0x85a   : > { %2450 = vmatmul.msk.f32.vlgmr.msrb.gmra.mxu3 %vm1077_vm0, %v1881_v0 }
 0x85b   : > { %2036 = vmatpush.msrb.mxu3 %v1796_v37 }
 0x85d   : > { %v2574_v47 = vpop.eup %2573 }
 0x85e   : > { %v2004_v5 = vmul.f32 %v2574_v47, %v2002_v33  ;;  %vm2009_vm14 = vweird.f32 %v2574_v47 }
 0x85f   : > { %vm2010_vm1 = vmor %vm2008_vm15, %vm2009_vm14 }
 0x860   : > { %v2005_v21 = vsub.f32 1.0, %v2004_v5 }
 0x862   : > { %v2006_v8 = vmul.f32 %v2574_v47, %v2005_v21  ;;  %1922 = vmatmul.f32.vlgmr.msra.gmra.mxu3 %v1576_v19 }
 0x863   : > { %2172 = vmatpush.msra.mxu3 %v1836_v41 }
 0x864   : > { %v2007_v30 = vadd.f32 %v2574_v47, %v2006_v8 }
 0x866   : > { %v2011_v51 = vsel %vm2010_vm1, %v2574_v47, %v2007_v30 }
 0x867   : > { %v2016_v7 = vsel %vm2013_vm2, %v2015_v27, %v2011_v51 }
 0x868   : > { %v2017_v20 = vmul.f32 %v2570_v62, %v2016_v7  ;;  %v2865_v7 = vld [vmem:[#allocation9 + $0xf0] sm:$0xff] }
 0x86a   : > { %2452 = vmatmul.msk.f32.vlgmr.msrb.gmra.mxu3 %vm1077_vm0, %v2017_v20 }
 0x86b   : > { %2243 = vmatpush.msrb.mxu3 %v2858_v9 }
 0x86d   : > { %2244 = vmatpush.msrb.mxu3 %v2859_v40  ;;  %v2866_v40 = vld [vmem:[#allocation9 + $0xe8] sm:$0xff] }
 0x86f   : > { %2245 = vmatpush.msrb.mxu3 %v2860_v53 }
 0x871   : > { %2246 = vmatpush.msrb.mxu3 %v2861_v52 }
 0x873   : > { %2247 = vmatpush.msrb.mxu3 %v2862_v31  ;;  %v2867_v31 = vld [vmem:[#allocation9 + $0xe0] sm:$0xff] }
 0x875   : > { %2248 = vmatpush.msrb.mxu3 %v2863_v4  ;;  %v2868_v4 = vld [vmem:[#allocation9 + $0xd8] sm:$0xff] }
 0x877   : > { %2249 = vmatpush.msrb.mxu3 %v3463_v3  ;;  %v2065_v3 = vsub.f32 %v3601_v13, %v3606_v61 }
 0x879   : > { %2250 = vmatpush.msrb.mxu3 %v3465_v10 }
 0x87b   : > { %2251 = vmatpush.msrb.mxu3 %v3468_v11 }
 0x87d   : > { %2252 = vmatpush.msrb.mxu3 %v3471_v17  ;;  %v2066_v17 = vmul.f32 1.442695, %v2065_v3  ;;  %v2870_v3 = vld [vmem:[#allocation9 + $0xc8] sm:$0xff] }
 0x87f   : > { %2253 = vmatpush.msrb.mxu3 %v3474_v23  ;;  %v2127_v23 = vpop.f32.mrf.mxu2  ;;  %2575 = vpow2.f32 %v2066_v17  ;;  %v2873_v17 = vld [vmem:[#allocation9 + $0xb0] sm:$0xff] }
 0x881   : > { %2254 = vmatpush.msrb.mxu3 %v3480_v28 }
 0x883   : > { %2255 = vmatpush.msrb.mxu3 %v3489_v32  ;;  %v2130_v32 = vsel %vm1077_vm0, %v2127_v23, -inf }
 0x885   : > { %2256 = vmatpush.msrb.mxu3 %v3495_v38  ;;  %v3631_v38 = vpop.eup %2575 }
 0x887   : > { %2257 = vmatpush.msrb.mxu3 %v3500_v42  ;;  %v2068_v42 = vsel %vm1077_vm0, %v3631_v38, 0.0 }
 0x889   : > { %2258 = vmatpush.msrb.mxu3 %v3507_v48 }
 0x8dd   : > { %v1902_v16 = vpop.f32.mrf.mxu3 }
 0x8de   : > { %2199 = vmatmul.f32.vlgmr.msra.gmra.mxu0 %v1902_v16  ;;  %v2869_v16 = vld [vmem:[#allocation9 + $0xd0] sm:$0xff] }
 0x8e5   : > { %v1923_v10 = vpop.f32.mrf.mxu3 }
 0x8e6   : > { %v1926_v11 = vsel %vm1077_vm0, %v1923_v10, -inf }
 0x8e7   : > { %1927 = vmax.xlane.f32.xlu2 %v1926_v11  ;;  %v2872_v11 = vld [vmem:[#allocation9 + $0xb8] sm:$0xff] }
 0x8ed   : > { %v2038_v28 = vpop.f32.mrf.mxu3 }
 0x8ee   : > { %2239 = vmatmul.f32.vlgmr.msra.gmra.mxu2 %v2038_v28  ;;  %v2875_v28 = vld [vmem:[#allocation9 + $0xa0] sm:$0xff] }
 0x8ef   : > { %2131 = vmax.xlane.f32.xlu2 %v2130_v32  ;;  %v2876_v32 = vld [vmem:[#allocation9 + $0x98] sm:$0xff] }
 0x8f7   : > { %2069 = vadd.xlane.f32.xlu2 %v2068_v42  ;;  %v2878_v42 = vld [vmem:[#allocation9 + $0x88] sm:$0xff] }
 0x95a   : > { %v1928_v48 = vpop.xlane.xlu2 %1927 }
 0x95b   : > { %v1929_v26 = vsub.f32 %v1923_v10, %v1928_v48  ;;  %v2871_v10 = vld [vmem:[#allocation9 + $0xc0] sm:$0xff] }
 0x95c   : > { %v2879_v48 = vld [vmem:[#allocation9 + $0x80] sm:$0xff] }
 0x95d   : > { %v1930_v12 = vmul.f32 1.442695, %v1929_v26 }
 0x95f   : > { %2577 = vpow2.f32 %v1930_v12 }
 0x962   : > { %v2132_v15 = vpop.xlane.xlu2 %2131 }
 0x963   : > { %v2133_v55 = vsub.f32 %v2127_v23, %v2132_v15  ;;  %v2874_v23 = vld [vmem:[#allocation9 + $0xa8] sm:$0xff] }
 0x965   : > { %v2578_v34 = vpop.eup %2577  ;;  %v2134_v39 = vmul.f32 1.442695, %v2133_v55  ;;  %v2200_v55 = vpop.f32.mrf.mxu0 }
 0x966   : > { %v1932_v58 = vsel %vm1077_vm0, %v2578_v34, 0.0 }
 0x967   : > { %2579 = vpow2.f32 %v2134_v39  ;;  %1933 = vadd.xlane.f32.xlu0 %v1932_v58  ;;  %v2201_v39 = vadd.f32 %v3520_v54, %v2200_v55 }
 0x96a   : > { %v2070_v13 = vpop.xlane.xlu2 %2069 }
 0x96b   : > { %2581 = vrcp.f32 %v2070_v13  ;;  %v2082_v37 = vand.u32 2147483648, %v2070_v13  ;;  %vm2076_vm9 = vweird.f32 %v2070_v13  ;;  %v2080_v2 = vand.u32 2147483647, %v2070_v13 }
 0x96d   : > { %v2580_v56 = vpop.eup %2579  ;;  %v2083_v8 = vor.u32 1.1754944e-38, %v2082_v37  ;;  %vm2081_vm12 = vcmp.eq.f32.partialorder %v2080_v2, 8.507059e+37  ;;  %v2544_v37 = vld [vmem:[%s3694_s8] ss:$0 sm:$0xff] }
 0x96e   : > { %v2136_v49 = vsel %vm1077_vm0, %v2580_v56, 0.0 }
 0x96f   : > { %2137 = vadd.xlane.f32.xlu0 %v2136_v49 }
 0x971   : > { %v2582_v62 = vpop.eup %2581 }
 0x972   : > { %v2072_v29 = vmul.f32 %v2582_v62, %v2070_v13  ;;  %vm2077_vm5 = vweird.f32 %v2582_v62 }
 0x973   : > { %vm2078_vm10 = vmor %vm2076_vm9, %vm2077_vm5 }
 0x974   : > { %v2073_v59 = vsub.f32 1.0, %v2072_v29 }
 0x976   : > { %v2074_v43 = vmul.f32 %v2582_v62, %v2073_v59 }
 0x978   : > { %v2075_v33 = vadd.f32 %v2582_v62, %v2074_v43 }
 0x97a   : > { %v2079_v14 = vsel %vm2078_vm10, %v2582_v62, %v2075_v33 }
 0x97b   : > { %v2084_v27 = vsel %vm2081_vm12, %v2083_v8, %v2079_v14 }
 0x97c   : > { %v2085_v52 = vmul.f32 %v3631_v38, %v2084_v27  ;;  %v2877_v38 = vld [vmem:[#allocation9 + $0x90] sm:$0xff] }
 0x9da   : > { %v1934_v63 = vpop.xlane.xlu0 %1933 }
 0x9db   : > { %2583 = vrcp.f32 %v1934_v63  ;;  %v1946_v6 = vand.u32 2147483648, %v1934_v63  ;;  %v1944_v35 = vand.u32 2147483647, %v1934_v63  ;;  %vm1940_vm4 = vweird.f32 %v1934_v63 }
 0x9dd   : > { %v1947_v44 = vor.u32 1.1754944e-38, %v1946_v6  ;;  %vm1945_vm8 = vcmp.eq.f32.partialorder %v1944_v35, 8.507059e+37 }
 0x9e1   : > { %v2584_v60 = vpop.eup %2583 }
 0x9e2   : > { %v1936_v1 = vmul.f32 %v2584_v60, %v1934_v63  ;;  %v2138_v61 = vpop.xlane.xlu0 %2137  ;;  %vm1941_vm3 = vweird.f32 %v2584_v60 }
 0x9e3   : > { %2585 = vrcp.f32 %v2138_v61  ;;  %vm1942_vm7 = vmor %vm1940_vm4, %vm1941_vm3  ;;  %v2150_v21 = vand.u32 2147483648, %v2138_v61  ;;  %v2148_v46 = vand.u32 2147483647, %v2138_v61  ;;  %vm2144_vm13 = vweird.f32 %v2138_v61 }
 0x9e4   : > { %v1937_v50 = vsub.f32 1.0, %v1936_v1 }
 0x9e5   : > { %v2151_v51 = vor.u32 1.1754944e-38, %v2150_v21  ;;  %vm2149_vm15 = vcmp.eq.f32.partialorder %v2148_v46, 8.507059e+37 }
 0x9e6   : > { %v1938_v24 = vmul.f32 %v2584_v60, %v1937_v50 }
 0x9e8   : > { %v1939_v57 = vadd.f32 %v2584_v60, %v1938_v24 }
 0x9e9   : > { %v2586_v25 = vpop.eup %2585 }
 0x9ea   : > { %v1943_v45 = vsel %vm1942_vm7, %v2584_v60, %v1939_v57  ;;  %v2140_v0 = vmul.f32 %v2586_v25, %v2138_v61  ;;  %vm2145_vm11 = vweird.f32 %v2586_v25 }
 0x9eb   : > { %v1948_v47 = vsel %vm1945_vm8, %v1947_v44, %v1943_v45  ;;  %vm2146_vm14 = vmor %vm2144_vm13, %vm2145_vm11 }
 0x9ec   : > { %v2141_v5 = vsub.f32 1.0, %v2140_v0  ;;  %v1949_v19 = vmul.f32 %v2578_v34, %v1948_v47 }
 0x9ee   : > { %v2142_v41 = vmul.f32 %v2586_v25, %v2141_v5  ;;  %2451 = vmatmul.msk.f32.vlgmr.msra.gmra.mxu1 %vm1077_vm0, %v1949_v19 }
 0x9ef   : > { %2203 = vmatpush.msra.mxu1 %v2864_v22 }
 0x9f0   : > { %v2143_v30 = vadd.f32 %v2586_v25, %v2142_v41 }
 0x9f1   : > { %2204 = vmatpush.msra.mxu1 %v2865_v7 }
 0x9f2   : > { %v2147_v20 = vsel %vm2146_vm14, %v2586_v25, %v2143_v30 }
 0x9f3   : > { %v2152_v9 = vsel %vm2149_vm15, %v2151_v51, %v2147_v20  ;;  %2205 = vmatpush.msra.mxu1 %v2866_v40 }
 0x9f4   : > { %v2153_v53 = vmul.f32 %v2580_v56, %v2152_v9  ;;  %v2240_v56 = vpop.f32.mrf.mxu2 }
 0x9f5   : > { %2206 = vmatpush.msra.mxu1 %v2867_v31 }
 0x9f6   : > { %2453 = vmatmul.msk.f32.vlgmr.msrb.gmra.mxu1 %vm1077_vm0, %v2085_v52  ;;  %2454 = vmatmul.msk.f32.vlgmr.msra.gmra.mxu3 %vm1077_vm0, %v2153_v53 }
 0x9f7   : > { %2207 = vmatpush.msra.mxu1 %v2868_v4 }
 0x9f9   : > { %2208 = vmatpush.msra.mxu1 %v2869_v16 }
 0x9fb   : > { %2209 = vmatpush.msra.mxu1 %v2870_v3 }
 0x9fd   : > { %2210 = vmatpush.msra.mxu1 %v2871_v10 }
 0x9ff   : > { %2211 = vmatpush.msra.mxu1 %v2872_v11 }
 0xa01   : > { %2212 = vmatpush.msra.mxu1 %v2873_v17 }
 0xa03   : > { %2213 = vmatpush.msra.mxu1 %v2874_v23 }
 0xa05   : > { %2214 = vmatpush.msra.mxu1 %v2875_v28 }
 0xa07   : > { %2215 = vmatpush.msra.mxu1 %v2876_v32 }
 0xa09   : > { %2216 = vmatpush.msra.mxu1 %v2877_v38 }
 0xa0b   : > { %2217 = vmatpush.msra.mxu1 %v2878_v42 }
 0xa0d   : > { %2218 = vmatpush.msra.mxu1 %v2879_v48 }
 0xa6b   : > { %v1970_v26 = vpop.f32.mrf.mxu1 }
 0xa6c   : > { %2219 = vmatmul.f32.vlgmr.msra.gmra.mxu1 %v1970_v26 }
 0xa73   : > { %v2106_v12 = vpop.f32.mrf.mxu1 }
 0xa74   : > { %2259 = vmatmul.f32.vlgmr.msrb.gmra.mxu3 %v2106_v12 }
 0xa79   : > { %v2174_v15 = vpop.f32.mrf.mxu3 }
 0xa7a   : > { %2279 = vmatmul.f32.vlgmr.msrb.gmra.mxu0 %v2174_v15 }
 0xae9   : > { %v2220_v34 = vpop.f32.mrf.mxu1 }
 0xaea   : > { %v2221_v58 = vadd.f32 %v2220_v34, %v2201_v39 }
 0xaec   : > { %v2241_v49 = vadd.f32 %v2240_v56, %v2221_v58 }
 0xaf7   : > { %v2260_v13 = vpop.f32.mrf.mxu3  ;;  %v2280_v62 = vpop.f32.mrf.mxu0 }
 0xaf8   : > { %v2261_v63 = vadd.f32 %v2260_v13, %v2241_v49 }
 0xafa   : > { %v2281_v29 = vadd.f32 %v2280_v62, %v2261_v63 }
 0xafc   : > { %v2283_v60 = vadd.f32 %v2281_v29, %v3535_v18 }
 0xafe   : > { %2286 = vadd.xlane.f32.xlu1 %v2283_v60 }
 0xb71   : > { %v2287_v59 = vpop.xlane.xlu1 %2286 }
 0xb72   : > { %v2288_v1 = vmul.f32 0.025, %v2287_v59 }
 0xb74   : > { %v2289_v61 = vsub.f32 %v2283_v60, %v2288_v1 }
 0xb76   : > { %v2290_v50 = vsel %vm724_vm6, %v2289_v61, 0.0 }
 0xb77   : > { %v2291_v6 = vmul.f32 %v2290_v50, %v2290_v50 }
 0xb79   : > { %2292 = vadd.xlane.f32.xlu2 %v2291_v6 }
 0xbec   : > { %v2293_v54 = vpop.xlane.xlu2 %2292 }
 0xbed   : > { %v2294_v43 = vmul.f32 0.025, %v2293_v54 }
 0xbef   : > { %v2295_v24 = vadd.f32 1e-05, %v2294_v43 }
 0xbf1   : > { %2587 = vrsqrt.f32 %v2295_v24  ;;  %vm2302_vm1 = vweird.f32 %v2295_v24 }
 0xbf7   : > { %v2588_v35 = vpop.eup %2587 }
 0xbf8   : > { %v2297_v57 = vmul.f32 %v2588_v35, %v2295_v24  ;;  %vm2303_vm0 = vweird.f32 %v2588_v35 }
 0xbf9   : > { %vm2304_vm6 = vmor %vm2302_vm1, %vm2303_vm0 }
 0xbfa   : > { %v2298_v25 = vmul.f32 %v2588_v35, %v2297_v57 }
 0xbfc   : > { %v2299_v44 = vmul.f32 0.5, %v2298_v25 }
 0xbfe   : > { %v2300_v18 = vsub.f32 1.5, %v2299_v44 }
 0xc00   : > { %v2301_v33 = vmul.f32 %v2588_v35, %v2300_v18 }
 0xc02   : > { %v2305_v45 = vsel %vm2304_vm6, %v2588_v35, %v2301_v33 }
 0xc03   : > { %v2306_v0 = vmul.f32 %v2305_v45, %v2290_v50 }
 0xc05   : > { %v2310_v47 = vmul.f32 %v2543_v36, %v2306_v0 }
 0xc07   : > { %v2314_v2 = vadd.f32 %v2544_v37, %v2310_v47 }
 0xc09   : > { %2315 = vst [vmem:[%s397_s16] sm:$0xff] %v2314_v2 }
 0xc0a   : > { %3027 = shalt.err (!%p3024_p9)
}
 0xc0b   : > { %2473 = dma.vmem_to_hbm [thread:$0]  (%p3209_p13), %s2330_s3, 128, %s2332_s17, %s2317_s23  }
 0xc0c PF: > { %s2343_s27 = sand.u32 1, %s3062_s30   ;;  %p3714_p10 = scmp.ge.s32.totalorder %s3074_s12, 2 }
 0xc0d   : > { %s2344_s20 = scalar_lea.sflag [#allocation5], %s2343_s27 }
 0xc0e   : > { %p2490_p11 = pnand %p3714_p10, %p3214_p4 }
 0xc10   : > { %p2491_p0 = pneg %p2490_p11 }
 0xc12   : > { %3057 = dma.done.wait (%p2491_p0), %s2344_s20, 128  }
 0xc13   : > { %3059 = vsyncadd (%p2491_p0), %s2344_s20, 4294967168  ;;  %p24_p2 = scmp.ge.s32.totalorder %s3189_s15, 4   ;;  %s3715_s30 = smov %s3066_s10 }
 0xc14   : > { %s3716_s10 = smov %s3070_s11  ;;  %s3717_s11 = smov %s3201_s22 }
 0xc15   : > { %s3718_s12 = smov %s3189_s15  ;;  %26 = sbr.rel (!%p24_p2) target bundleno = 11 (0xb), region = 113 }
 0xc1a   :  { %2350 = vsyncpa [#allocation4], 1 }
 0xc1b   :  { %2352 = vsyncpa [#allocation4 + $0x1], 1 }
 0xc1c   :  { %2353 = vsyncpa [#allocation7], 1 }
 0xc1d   :  { %2354 = vsyncpa [#allocation10], 1 }
 0xc1e   :  { %2355 = vsyncpa [#allocation5], 1 }
 0xc1f   :  { %2357 = vsyncpa [#allocation5 + $0x1], 1 }

</bundles_post_ra>
